<compile_context>
chip_gen: v7x
topology: tpu7x:2x2x1
jax: 0.10.0
libtpu: 0.0.40
codegen_flags: <defaults>
</compile_context>

<pallas_src>
import functools

import jax
import jax.numpy as jnp
from jax.experimental import pallas as pl
from jax.experimental.pallas import tpu as pltpu


SPACETIME_DIM = 2
IN_FEATURES = SPACETIME_DIM + 1   # 3
HIDDEN = 12

LANES = 128            # lane width of the data layout (last dim)
CHUNK = 16             # sublane rows processed per inner-loop step (mult of 8)
DEFAULT_BLOCK_SUBLANES = 256   # sublane rows per grid step -> 32768 rows/step


# ----------------------------------------------------------------------------
# Pallas kernel: fused Linear(3->12) -> tanh -> Linear(12->12) -> tanh
#                      -> Linear(12->1) -> relu,  computed on the VPU.
# ----------------------------------------------------------------------------
def _mlp_head_kernel(x_ref, w1_ref, b1_ref, w2_ref, b2_ref, w3_ref, b3_ref,
                     o_ref, *, chunk):
    # x_ref : (in_f, blk_r, 128) VMEM     o_ref : (blk_r, 128) VMEM
    # w1_ref: (in_f, H) SMEM   b1_ref: (H,) SMEM
    # w2_ref: (H, H)  SMEM     b2_ref: (H,) SMEM
    # w3_ref: (H,)    SMEM     b3_ref: (1,) SMEM
    in_f = x_ref.shape[0]
    hidden = w2_ref.shape[0]
    blk_r = o_ref.shape[0]

    def body(c, carry):
        r0 = pl.multiple_of(c * chunk, chunk)
        rows = pl.ds(r0, chunk)

        # (chunk, 128) tile per input feature channel — fully dense vregs.
        xs = [x_ref[k, rows, :] for k in range(in_f)]

        # ---- Layer 1: 3 -> 12, tanh (VPU MACs with SMEM scalar weights) ----
        h1 = []
        for j in range(hidden):
            a = xs[0] * w1_ref[0, j]
            for k in range(1, in_f):
                a = a + xs[k] * w1_ref[k, j]
            h1.append(jnp.tanh(a + b1_ref[j]))

        # ---- Layer 2 (12 -> 12, tanh) fused with layer 3 (12 -> 1) ---------
        out = None
        for j in range(hidden):
            a = h1[0] * w2_ref[0, j]
            for k in range(1, hidden):
                a = a + h1[k] * w2_ref[k, j]
            h2j = jnp.tanh(a + b2_ref[j])
            term = h2j * w3_ref[j]
            out = term if out is None else out + term
        out = out + b3_ref[0]

        # ---- ReLU + lane-dense, unmasked store ------------------------------
        o_ref[rows, :] = jnp.maximum(out, 0.0).astype(o_ref.dtype)
        return carry

    jax.lax.fori_loop(0, blk_r // chunk, body, 0)


# ----------------------------------------------------------------------------
# Wrapper: padding + lane-dense re-layout + pallas_call
# ----------------------------------------------------------------------------
@functools.partial(jax.jit, static_argnames=("block_sublanes",))
def mlp_head_pallas(x2d, w1, b1, w2, b2, w3, b3,
                    *, block_sublanes=DEFAULT_BLOCK_SUBLANES):
    """x2d: (N, in_f) float32 (any N). Returns (N, 1) float32."""
    n, in_f = x2d.shape

    # Tile geometry (all static under jit).
    blk_cap = max(CHUNK, (int(block_sublanes) // CHUNK) * CHUNK)
    needed = pl.cdiv(n, LANES)                       # sublane rows needed
    needed = pl.cdiv(needed, CHUNK) * CHUNK          # round up to CHUNK
    blk_r = min(blk_cap, needed)                     # sublane rows per block
    steps = pl.cdiv(needed, blk_r)                   # grid length
    r_total = steps * blk_r
    n_pad = r_total * LANES

    # Lane-dense transposed layout: x_t[k, i, j] = x[i*128 + j, k].
    x_pad = jnp.pad(x2d.astype(jnp.float32), ((0, n_pad - n), (0, 0)))
    x_t = x_pad.T.reshape(in_f, r_total, LANES)

    out = pl.pallas_call(
        functools.partial(_mlp_head_kernel, chunk=CHUNK),
        out_shape=jax.ShapeDtypeStruct((r_total, LANES), jnp.float32),
        grid_spec=pltpu.PrefetchScalarGridSpec(
            num_scalar_prefetch=0,
            grid=(steps,),
            in_specs=[
                # Row-tiled, lane-dense input slab (contiguous DMA per step).
                pl.BlockSpec((in_f, blk_r, LANES), lambda i: (0, i, 0)),
                # Tiny weights/biases live in SMEM as scalars (resident;
                # constant index -> not re-DMAed per step).
                pl.BlockSpec(memory_space=pltpu.MemorySpace.SMEM),  # w1
                pl.BlockSpec(memory_space=pltpu.MemorySpace.SMEM),  # b1
                pl.BlockSpec(memory_space=pltpu.MemorySpace.SMEM),  # w2
                pl.BlockSpec(memory_space=pltpu.MemorySpace.SMEM),  # b2
                pl.BlockSpec(memory_space=pltpu.MemorySpace.SMEM),  # w3
                pl.BlockSpec(memory_space=pltpu.MemorySpace.SMEM),  # b3
            ],
            out_specs=pl.BlockSpec((blk_r, LANES), lambda i: (i, 0)),
        ),
        compiler_params=pltpu.CompilerParams(
            dimension_semantics=("parallel",)),   # lets v7x split the row grid
    )(x_t, w1.astype(jnp.float32), b1.astype(jnp.float32),
      w2.astype(jnp.float32), b2.astype(jnp.float32),
      w3.reshape(-1).astype(jnp.float32), b3.reshape(-1).astype(jnp.float32))

    return out.reshape(n_pad)[:n].reshape(n, 1)


# ----------------------------------------------------------------------------
# Parameter construction (deterministic, PyTorch-style uniform init)
# ----------------------------------------------------------------------------
def _init_linear(key, fan_in, fan_out):
    kw, kb = jax.random.split(key)
    bound = 1.0 / jnp.sqrt(jnp.float32(fan_in))
    # Stored as (fan_in, fan_out) so forward computes x @ W + b,
    # matching torch's x @ W.T with W of shape (fan_out, fan_in).
    w = jax.random.uniform(kw, (fan_in, fan_out), jnp.float32, -bound, bound)
    b = jax.random.uniform(kb, (fan_out,), jnp.float32, -bound, bound)
    return w, b


def init_multi_measurement_heads(key, spacetime_dim=SPACETIME_DIM):
    in_f = spacetime_dim + 1
    params = {}
    for name in ("heat", "diffusion", "wave"):
        key, k1, k2, k3 = jax.random.split(key, 4)
        w1, b1 = _init_linear(k1, in_f, HIDDEN)
        w2, b2 = _init_linear(k2, HIDDEN, HIDDEN)
        w3, b3 = _init_linear(k3, HIDDEN, 1)
        params[name] = (w1, b1, w2, b2, w3, b3)
    return params


def multi_measurement_heads_forward(params, xtz_mat, physical_measurement,
                                    *, block_sublanes=DEFAULT_BLOCK_SUBLANES):
    """Equivalent of MultiMeasurementHeads.forward.

    xtz_mat: (..., spacetime_dim + 1) float32; returns (..., 1) float32.
    """
    w1, b1, w2, b2, w3, b3 = params[physical_measurement]
    lead_shape = xtz_mat.shape[:-1]
    x2d = xtz_mat.reshape(-1, xtz_mat.shape[-1]).astype(jnp.float32)
    out = mlp_head_pallas(x2d, w1, b1, w2, b2, w3, b3,
                          block_sublanes=block_sublanes)
    return out.reshape(*lead_shape, 1)


# ----------------------------------------------------------------------------
# Reference (plain JAX) for sanity checks
# ----------------------------------------------------------------------------
def _reference_forward(params, xtz_mat, physical_measurement):
    w1, b1, w2, b2, w3, b3 = params[physical_measurement]
    h1 = jnp.tanh(xtz_mat @ w1 + b1)
    h2 = jnp.tanh(h1 @ w2 + b2)
    return jnp.maximum(h2 @ w3 + b3, 0.0)


if __name__ == "__main__":
    key = jax.random.PRNGKey(0)
    pkey, xkey1, xkey2 = jax.random.split(key, 3)

    params = init_multi_measurement_heads(pkey)

    # Small case: batch=2, seq=8, features = spacetime_dim + 1 = 3.
    xtz_mat = jax.random.normal(xkey1, (2, 8, IN_FEATURES), jnp.float32)
    out = jax.block_until_ready(
        multi_measurement_heads_forward(params, xtz_mat, "heat"))
    ref = _reference_forward(params, xtz_mat, "heat")
    assert out.shape == (2, 8, 1), out.shape
    assert jnp.allclose(out, ref, atol=1e-4, rtol=1e-4), (
        float(jnp.max(jnp.abs(out - ref))))

    # Other heads (string-selected, same kernel).
    for name in ("diffusion", "wave"):
        o = jax.block_until_ready(
            multi_measurement_heads_forward(params, xtz_mat, name))
        r = _reference_forward(params, xtz_mat, name)
        assert jnp.allclose(o, r, atol=1e-4, rtol=1e-4)

    # Larger, non-tile-multiple N exercising padding + a multi-step grid.
    xtz_big = jax.random.normal(xkey2, (5, 10000, IN_FEATURES), jnp.float32)
    ob = jax.block_until_ready(
        multi_measurement_heads_forward(params, xtz_big, "wave",
                                        block_sublanes=64))
    rb = _reference_forward(params, xtz_big, "wave")
    assert ob.shape == (5, 10000, 1), ob.shape
    assert jnp.allclose(ob, rb, atol=1e-4, rtol=1e-4), (
        float(jnp.max(jnp.abs(ob - rb))))

    print("KERNEL_OK")
</pallas_src>

<mosaic_0001>
module attributes {stable_mosaic.version = 11 : i64} {
  func.func @_mlp_head_kernel(%arg0: i32, %arg1: memref<3x16x128xf32, #tpu.memory_space<vmem>>, %arg2: memref<3x12xf32, #tpu.memory_space<smem>>, %arg3: memref<12xf32, #tpu.memory_space<smem>>, %arg4: memref<12x12xf32, #tpu.memory_space<smem>>, %arg5: memref<12xf32, #tpu.memory_space<smem>>, %arg6: memref<12xf32, #tpu.memory_space<smem>>, %arg7: memref<1xf32, #tpu.memory_space<smem>>, %arg8: memref<16x128xf32, #tpu.memory_space<vmem>>) attributes {dimension_semantics = [#tpu.dimension_semantics<parallel>], iteration_bounds = array<i64: 1>, scalar_prefetch = 0 : i64, scratch_operands = 0 : i64, tpu.core_type = #tpu.core_type<tc>, window_params = [{transform_indices = @transform_0, window_bounds = array<i64: 3, 16, 128>}, {transform_indices = @transform_1, window_bounds = array<i64: 3, 12>}, {transform_indices = @transform_2, window_bounds = array<i64: 12>}, {transform_indices = @transform_3, window_bounds = array<i64: 12, 12>}, {transform_indices = @transform_4, window_bounds = array<i64: 12>}, {transform_indices = @transform_5, window_bounds = array<i64: 12>}, {transform_indices = @transform_6, window_bounds = array<i64: 1>}, {transform_indices = @transform_7, window_bounds = array<i64: 16, 128>}]} {
    %c0_i32 = arith.constant 0 : i32
    %c16_i32 = arith.constant 16 : i32
    %0 = arith.muli %c0_i32, %c16_i32 : i32
    %1 = tpu.assume_multiple %0, 16 : i32
    %c0 = arith.constant 0 : index
    %2 = arith.index_cast %1 : i32 to index
    %c0_0 = arith.constant 0 : index
    %3 = vector.load %arg1[%c0, %2, %c0_0] : memref<3x16x128xf32, #tpu.memory_space<vmem>>, vector<1x16x128xf32>
    %4 = vector.shape_cast %3 : vector<1x16x128xf32> to vector<16x128xf32>
    %c1 = arith.constant 1 : index
    %5 = arith.index_cast %1 : i32 to index
    %c0_1 = arith.constant 0 : index
    %6 = vector.load %arg1[%c1, %5, %c0_1] : memref<3x16x128xf32, #tpu.memory_space<vmem>>, vector<1x16x128xf32>
    %7 = vector.shape_cast %6 : vector<1x16x128xf32> to vector<16x128xf32>
    %c2 = arith.constant 2 : index
    %8 = arith.index_cast %1 : i32 to index
    %c0_2 = arith.constant 0 : index
    %9 = vector.load %arg1[%c2, %8, %c0_2] : memref<3x16x128xf32, #tpu.memory_space<vmem>>, vector<1x16x128xf32>
    %10 = vector.shape_cast %9 : vector<1x16x128xf32> to vector<16x128xf32>
    %c0_3 = arith.constant 0 : index
    %c0_4 = arith.constant 0 : index
    %11 = memref.load %arg2[%c0_3, %c0_4] : memref<3x12xf32, #tpu.memory_space<smem>>
    %12 = vector.broadcast %11 : f32 to vector<16x128xf32>
    %13 = arith.mulf %4, %12 : vector<16x128xf32>
    %c1_5 = arith.constant 1 : index
    %c0_6 = arith.constant 0 : index
    %14 = memref.load %arg2[%c1_5, %c0_6] : memref<3x12xf32, #tpu.memory_space<smem>>
    %15 = vector.broadcast %14 : f32 to vector<16x128xf32>
    %16 = arith.mulf %7, %15 : vector<16x128xf32>
    %17 = arith.addf %13, %16 : vector<16x128xf32>
    %c2_7 = arith.constant 2 : index
    %c0_8 = arith.constant 0 : index
    %18 = memref.load %arg2[%c2_7, %c0_8] : memref<3x12xf32, #tpu.memory_space<smem>>
    %19 = vector.broadcast %18 : f32 to vector<16x128xf32>
    %20 = arith.mulf %10, %19 : vector<16x128xf32>
    %21 = arith.addf %17, %20 : vector<16x128xf32>
    %c0_9 = arith.constant 0 : index
    %22 = memref.load %arg3[%c0_9] : memref<12xf32, #tpu.memory_space<smem>>
    %23 = vector.broadcast %22 : f32 to vector<16x128xf32>
    %24 = arith.addf %21, %23 : vector<16x128xf32>
    %25 = math.tanh %24 : vector<16x128xf32>
    %c0_10 = arith.constant 0 : index
    %c1_11 = arith.constant 1 : index
    %26 = memref.load %arg2[%c0_10, %c1_11] : memref<3x12xf32, #tpu.memory_space<smem>>
    %27 = vector.broadcast %26 : f32 to vector<16x128xf32>
    %28 = arith.mulf %4, %27 : vector<16x128xf32>
    %c1_12 = arith.constant 1 : index
    %c1_13 = arith.constant 1 : index
    %29 = memref.load %arg2[%c1_12, %c1_13] : memref<3x12xf32, #tpu.memory_space<smem>>
    %30 = vector.broadcast %29 : f32 to vector<16x128xf32>
    %31 = arith.mulf %7, %30 : vector<16x128xf32>
    %32 = arith.addf %28, %31 : vector<16x128xf32>
    %c2_14 = arith.constant 2 : index
    %c1_15 = arith.constant 1 : index
    %33 = memref.load %arg2[%c2_14, %c1_15] : memref<3x12xf32, #tpu.memory_space<smem>>
    %34 = vector.broadcast %33 : f32 to vector<16x128xf32>
    %35 = arith.mulf %10, %34 : vector<16x128xf32>
    %36 = arith.addf %32, %35 : vector<16x128xf32>
    %c1_16 = arith.constant 1 : index
    %37 = memref.load %arg3[%c1_16] : memref<12xf32, #tpu.memory_space<smem>>
    %38 = vector.broadcast %37 : f32 to vector<16x128xf32>
    %39 = arith.addf %36, %38 : vector<16x128xf32>
    %40 = math.tanh %39 : vector<16x128xf32>
    %c0_17 = arith.constant 0 : index
    %c2_18 = arith.constant 2 : index
    %41 = memref.load %arg2[%c0_17, %c2_18] : memref<3x12xf32, #tpu.memory_space<smem>>
    %42 = vector.broadcast %41 : f32 to vector<16x128xf32>
    %43 = arith.mulf %4, %42 : vector<16x128xf32>
    %c1_19 = arith.constant 1 : index
    %c2_20 = arith.constant 2 : index
    %44 = memref.load %arg2[%c1_19, %c2_20] : memref<3x12xf32, #tpu.memory_space<smem>>
    %45 = vector.broadcast %44 : f32 to vector<16x128xf32>
    %46 = arith.mulf %7, %45 : vector<16x128xf32>
    %47 = arith.addf %43, %46 : vector<16x128xf32>
    %c2_21 = arith.constant 2 : index
    %c2_22 = arith.constant 2 : index
    %48 = memref.load %arg2[%c2_21, %c2_22] : memref<3x12xf32, #tpu.memory_space<smem>>
    %49 = vector.broadcast %48 : f32 to vector<16x128xf32>
    %50 = arith.mulf %10, %49 : vector<16x128xf32>
    %51 = arith.addf %47, %50 : vector<16x128xf32>
    %c2_23 = arith.constant 2 : index
    %52 = memref.load %arg3[%c2_23] : memref<12xf32, #tpu.memory_space<smem>>
    %53 = vector.broadcast %52 : f32 to vector<16x128xf32>
    %54 = arith.addf %51, %53 : vector<16x128xf32>
    %55 = math.tanh %54 : vector<16x128xf32>
    %c0_24 = arith.constant 0 : index
    %c3 = arith.constant 3 : index
    %56 = memref.load %arg2[%c0_24, %c3] : memref<3x12xf32, #tpu.memory_space<smem>>
    %57 = vector.broadcast %56 : f32 to vector<16x128xf32>
    %58 = arith.mulf %4, %57 : vector<16x128xf32>
    %c1_25 = arith.constant 1 : index
    %c3_26 = arith.constant 3 : index
    %59 = memref.load %arg2[%c1_25, %c3_26] : memref<3x12xf32, #tpu.memory_space<smem>>
    %60 = vector.broadcast %59 : f32 to vector<16x128xf32>
    %61 = arith.mulf %7, %60 : vector<16x128xf32>
    %62 = arith.addf %58, %61 : vector<16x128xf32>
    %c2_27 = arith.constant 2 : index
    %c3_28 = arith.constant 3 : index
    %63 = memref.load %arg2[%c2_27, %c3_28] : memref<3x12xf32, #tpu.memory_space<smem>>
    %64 = vector.broadcast %63 : f32 to vector<16x128xf32>
    %65 = arith.mulf %10, %64 : vector<16x128xf32>
    %66 = arith.addf %62, %65 : vector<16x128xf32>
    %c3_29 = arith.constant 3 : index
    %67 = memref.load %arg3[%c3_29] : memref<12xf32, #tpu.memory_space<smem>>
    %68 = vector.broadcast %67 : f32 to vector<16x128xf32>
    %69 = arith.addf %66, %68 : vector<16x128xf32>
    %70 = math.tanh %69 : vector<16x128xf32>
    %c0_30 = arith.constant 0 : index
    %c4 = arith.constant 4 : index
    %71 = memref.load %arg2[%c0_30, %c4] : memref<3x12xf32, #tpu.memory_space<smem>>
    %72 = vector.broadcast %71 : f32 to vector<16x128xf32>
    %73 = arith.mulf %4, %72 : vector<16x128xf32>
    %c1_31 = arith.constant 1 : index
    %c4_32 = arith.constant 4 : index
    %74 = memref.load %arg2[%c1_31, %c4_32] : memref<3x12xf32, #tpu.memory_space<smem>>
    %75 = vector.broadcast %74 : f32 to vector<16x128xf32>
    %76 = arith.mulf %7, %75 : vector<16x128xf32>
    %77 = arith.addf %73, %76 : vector<16x128xf32>
    %c2_33 = arith.constant 2 : index
    %c4_34 = arith.constant 4 : index
    %78 = memref.load %arg2[%c2_33, %c4_34] : memref<3x12xf32, #tpu.memory_space<smem>>
    %79 = vector.broadcast %78 : f32 to vector<16x128xf32>
    %80 = arith.mulf %10, %79 : vector<16x128xf32>
    %81 = arith.addf %77, %80 : vector<16x128xf32>
    %c4_35 = arith.constant 4 : index
    %82 = memref.load %arg3[%c4_35] : memref<12xf32, #tpu.memory_space<smem>>
    %83 = vector.broadcast %82 : f32 to vector<16x128xf32>
    %84 = arith.addf %81, %83 : vector<16x128xf32>
    %85 = math.tanh %84 : vector<16x128xf32>
    %c0_36 = arith.constant 0 : index
    %c5 = arith.constant 5 : index
    %86 = memref.load %arg2[%c0_36, %c5] : memref<3x12xf32, #tpu.memory_space<smem>>
    %87 = vector.broadcast %86 : f32 to vector<16x128xf32>
    %88 = arith.mulf %4, %87 : vector<16x128xf32>
    %c1_37 = arith.constant 1 : index
    %c5_38 = arith.constant 5 : index
    %89 = memref.load %arg2[%c1_37, %c5_38] : memref<3x12xf32, #tpu.memory_space<smem>>
    %90 = vector.broadcast %89 : f32 to vector<16x128xf32>
    %91 = arith.mulf %7, %90 : vector<16x128xf32>
    %92 = arith.addf %88, %91 : vector<16x128xf32>
    %c2_39 = arith.constant 2 : index
    %c5_40 = arith.constant 5 : index
    %93 = memref.load %arg2[%c2_39, %c5_40] : memref<3x12xf32, #tpu.memory_space<smem>>
    %94 = vector.broadcast %93 : f32 to vector<16x128xf32>
    %95 = arith.mulf %10, %94 : vector<16x128xf32>
    %96 = arith.addf %92, %95 : vector<16x128xf32>
    %c5_41 = arith.constant 5 : index
    %97 = memref.load %arg3[%c5_41] : memref<12xf32, #tpu.memory_space<smem>>
    %98 = vector.broadcast %97 : f32 to vector<16x128xf32>
    %99 = arith.addf %96, %98 : vector<16x128xf32>
    %100 = math.tanh %99 : vector<16x128xf32>
    %c0_42 = arith.constant 0 : index
    %c6 = arith.constant 6 : index
    %101 = memref.load %arg2[%c0_42, %c6] : memref<3x12xf32, #tpu.memory_space<smem>>
    %102 = vector.broadcast %101 : f32 to vector<16x128xf32>
    %103 = arith.mulf %4, %102 : vector<16x128xf32>
    %c1_43 = arith.constant 1 : index
    %c6_44 = arith.constant 6 : index
    %104 = memref.load %arg2[%c1_43, %c6_44] : memref<3x12xf32, #tpu.memory_space<smem>>
    %105 = vector.broadcast %104 : f32 to vector<16x128xf32>
    %106 = arith.mulf %7, %105 : vector<16x128xf32>
    %107 = arith.addf %103, %106 : vector<16x128xf32>
    %c2_45 = arith.constant 2 : index
    %c6_46 = arith.constant 6 : index
    %108 = memref.load %arg2[%c2_45, %c6_46] : memref<3x12xf32, #tpu.memory_space<smem>>
    %109 = vector.broadcast %108 : f32 to vector<16x128xf32>
    %110 = arith.mulf %10, %109 : vector<16x128xf32>
    %111 = arith.addf %107, %110 : vector<16x128xf32>
    %c6_47 = arith.constant 6 : index
    %112 = memref.load %arg3[%c6_47] : memref<12xf32, #tpu.memory_space<smem>>
    %113 = vector.broadcast %112 : f32 to vector<16x128xf32>
    %114 = arith.addf %111, %113 : vector<16x128xf32>
    %115 = math.tanh %114 : vector<16x128xf32>
    %c0_48 = arith.constant 0 : index
    %c7 = arith.constant 7 : index
    %116 = memref.load %arg2[%c0_48, %c7] : memref<3x12xf32, #tpu.memory_space<smem>>
    %117 = vector.broadcast %116 : f32 to vector<16x128xf32>
    %118 = arith.mulf %4, %117 : vector<16x128xf32>
    %c1_49 = arith.constant 1 : index
    %c7_50 = arith.constant 7 : index
    %119 = memref.load %arg2[%c1_49, %c7_50] : memref<3x12xf32, #tpu.memory_space<smem>>
    %120 = vector.broadcast %119 : f32 to vector<16x128xf32>
    %121 = arith.mulf %7, %120 : vector<16x128xf32>
    %122 = arith.addf %118, %121 : vector<16x128xf32>
    %c2_51 = arith.constant 2 : index
    %c7_52 = arith.constant 7 : index
    %123 = memref.load %arg2[%c2_51, %c7_52] : memref<3x12xf32, #tpu.memory_space<smem>>
    %124 = vector.broadcast %123 : f32 to vector<16x128xf32>
    %125 = arith.mulf %10, %124 : vector<16x128xf32>
    %126 = arith.addf %122, %125 : vector<16x128xf32>
    %c7_53 = arith.constant 7 : index
    %127 = memref.load %arg3[%c7_53] : memref<12xf32, #tpu.memory_space<smem>>
    %128 = vector.broadcast %127 : f32 to vector<16x128xf32>
    %129 = arith.addf %126, %128 : vector<16x128xf32>
    %130 = math.tanh %129 : vector<16x128xf32>
    %c0_54 = arith.constant 0 : index
    %c8 = arith.constant 8 : index
    %131 = memref.load %arg2[%c0_54, %c8] : memref<3x12xf32, #tpu.memory_space<smem>>
    %132 = vector.broadcast %131 : f32 to vector<16x128xf32>
    %133 = arith.mulf %4, %132 : vector<16x128xf32>
    %c1_55 = arith.constant 1 : index
    %c8_56 = arith.constant 8 : index
    %134 = memref.load %arg2[%c1_55, %c8_56] : memref<3x12xf32, #tpu.memory_space<smem>>
    %135 = vector.broadcast %134 : f32 to vector<16x128xf32>
    %136 = arith.mulf %7, %135 : vector<16x128xf32>
    %137 = arith.addf %133, %136 : vector<16x128xf32>
    %c2_57 = arith.constant 2 : index
    %c8_58 = arith.constant 8 : index
    %138 = memref.load %arg2[%c2_57, %c8_58] : memref<3x12xf32, #tpu.memory_space<smem>>
    %139 = vector.broadcast %138 : f32 to vector<16x128xf32>
    %140 = arith.mulf %10, %139 : vector<16x128xf32>
    %141 = arith.addf %137, %140 : vector<16x128xf32>
    %c8_59 = arith.constant 8 : index
    %142 = memref.load %arg3[%c8_59] : memref<12xf32, #tpu.memory_space<smem>>
    %143 = vector.broadcast %142 : f32 to vector<16x128xf32>
    %144 = arith.addf %141, %143 : vector<16x128xf32>
    %145 = math.tanh %144 : vector<16x128xf32>
    %c0_60 = arith.constant 0 : index
    %c9 = arith.constant 9 : index
    %146 = memref.load %arg2[%c0_60, %c9] : memref<3x12xf32, #tpu.memory_space<smem>>
    %147 = vector.broadcast %146 : f32 to vector<16x128xf32>
    %148 = arith.mulf %4, %147 : vector<16x128xf32>
    %c1_61 = arith.constant 1 : index
    %c9_62 = arith.constant 9 : index
    %149 = memref.load %arg2[%c1_61, %c9_62] : memref<3x12xf32, #tpu.memory_space<smem>>
    %150 = vector.broadcast %149 : f32 to vector<16x128xf32>
    %151 = arith.mulf %7, %150 : vector<16x128xf32>
    %152 = arith.addf %148, %151 : vector<16x128xf32>
    %c2_63 = arith.constant 2 : index
    %c9_64 = arith.constant 9 : index
    %153 = memref.load %arg2[%c2_63, %c9_64] : memref<3x12xf32, #tpu.memory_space<smem>>
    %154 = vector.broadcast %153 : f32 to vector<16x128xf32>
    %155 = arith.mulf %10, %154 : vector<16x128xf32>
    %156 = arith.addf %152, %155 : vector<16x128xf32>
    %c9_65 = arith.constant 9 : index
    %157 = memref.load %arg3[%c9_65] : memref<12xf32, #tpu.memory_space<smem>>
    %158 = vector.broadcast %157 : f32 to vector<16x128xf32>
    %159 = arith.addf %156, %158 : vector<16x128xf32>
    %160 = math.tanh %159 : vector<16x128xf32>
    %c0_66 = arith.constant 0 : index
    %c10 = arith.constant 10 : index
    %161 = memref.load %arg2[%c0_66, %c10] : memref<3x12xf32, #tpu.memory_space<smem>>
    %162 = vector.broadcast %161 : f32 to vector<16x128xf32>
    %163 = arith.mulf %4, %162 : vector<16x128xf32>
    %c1_67 = arith.constant 1 : index
    %c10_68 = arith.constant 10 : index
    %164 = memref.load %arg2[%c1_67, %c10_68] : memref<3x12xf32, #tpu.memory_space<smem>>
    %165 = vector.broadcast %164 : f32 to vector<16x128xf32>
    %166 = arith.mulf %7, %165 : vector<16x128xf32>
    %167 = arith.addf %163, %166 : vector<16x128xf32>
    %c2_69 = arith.constant 2 : index
    %c10_70 = arith.constant 10 : index
    %168 = memref.load %arg2[%c2_69, %c10_70] : memref<3x12xf32, #tpu.memory_space<smem>>
    %169 = vector.broadcast %168 : f32 to vector<16x128xf32>
    %170 = arith.mulf %10, %169 : vector<16x128xf32>
    %171 = arith.addf %167, %170 : vector<16x128xf32>
    %c10_71 = arith.constant 10 : index
    %172 = memref.load %arg3[%c10_71] : memref<12xf32, #tpu.memory_space<smem>>
    %173 = vector.broadcast %172 : f32 to vector<16x128xf32>
    %174 = arith.addf %171, %173 : vector<16x128xf32>
    %175 = math.tanh %174 : vector<16x128xf32>
    %c0_72 = arith.constant 0 : index
    %c11 = arith.constant 11 : index
    %176 = memref.load %arg2[%c0_72, %c11] : memref<3x12xf32, #tpu.memory_space<smem>>
    %177 = vector.broadcast %176 : f32 to vector<16x128xf32>
    %178 = arith.mulf %4, %177 : vector<16x128xf32>
    %c1_73 = arith.constant 1 : index
    %c11_74 = arith.constant 11 : index
    %179 = memref.load %arg2[%c1_73, %c11_74] : memref<3x12xf32, #tpu.memory_space<smem>>
    %180 = vector.broadcast %179 : f32 to vector<16x128xf32>
    %181 = arith.mulf %7, %180 : vector<16x128xf32>
    %182 = arith.addf %178, %181 : vector<16x128xf32>
    %c2_75 = arith.constant 2 : index
    %c11_76 = arith.constant 11 : index
    %183 = memref.load %arg2[%c2_75, %c11_76] : memref<3x12xf32, #tpu.memory_space<smem>>
    %184 = vector.broadcast %183 : f32 to vector<16x128xf32>
    %185 = arith.mulf %10, %184 : vector<16x128xf32>
    %186 = arith.addf %182, %185 : vector<16x128xf32>
    %c11_77 = arith.constant 11 : index
    %187 = memref.load %arg3[%c11_77] : memref<12xf32, #tpu.memory_space<smem>>
    %188 = vector.broadcast %187 : f32 to vector<16x128xf32>
    %189 = arith.addf %186, %188 : vector<16x128xf32>
    %190 = math.tanh %189 : vector<16x128xf32>
    %c0_78 = arith.constant 0 : index
    %c0_79 = arith.constant 0 : index
    %191 = memref.load %arg4[%c0_78, %c0_79] : memref<12x12xf32, #tpu.memory_space<smem>>
    %192 = vector.broadcast %191 : f32 to vector<16x128xf32>
    %193 = arith.mulf %25, %192 : vector<16x128xf32>
    %c1_80 = arith.constant 1 : index
    %c0_81 = arith.constant 0 : index
    %194 = memref.load %arg4[%c1_80, %c0_81] : memref<12x12xf32, #tpu.memory_space<smem>>
    %195 = vector.broadcast %194 : f32 to vector<16x128xf32>
    %196 = arith.mulf %40, %195 : vector<16x128xf32>
    %197 = arith.addf %193, %196 : vector<16x128xf32>
    %c2_82 = arith.constant 2 : index
    %c0_83 = arith.constant 0 : index
    %198 = memref.load %arg4[%c2_82, %c0_83] : memref<12x12xf32, #tpu.memory_space<smem>>
    %199 = vector.broadcast %198 : f32 to vector<16x128xf32>
    %200 = arith.mulf %55, %199 : vector<16x128xf32>
    %201 = arith.addf %197, %200 : vector<16x128xf32>
    %c3_84 = arith.constant 3 : index
    %c0_85 = arith.constant 0 : index
    %202 = memref.load %arg4[%c3_84, %c0_85] : memref<12x12xf32, #tpu.memory_space<smem>>
    %203 = vector.broadcast %202 : f32 to vector<16x128xf32>
    %204 = arith.mulf %70, %203 : vector<16x128xf32>
    %205 = arith.addf %201, %204 : vector<16x128xf32>
    %c4_86 = arith.constant 4 : index
    %c0_87 = arith.constant 0 : index
    %206 = memref.load %arg4[%c4_86, %c0_87] : memref<12x12xf32, #tpu.memory_space<smem>>
    %207 = vector.broadcast %206 : f32 to vector<16x128xf32>
    %208 = arith.mulf %85, %207 : vector<16x128xf32>
    %209 = arith.addf %205, %208 : vector<16x128xf32>
    %c5_88 = arith.constant 5 : index
    %c0_89 = arith.constant 0 : index
    %210 = memref.load %arg4[%c5_88, %c0_89] : memref<12x12xf32, #tpu.memory_space<smem>>
    %211 = vector.broadcast %210 : f32 to vector<16x128xf32>
    %212 = arith.mulf %100, %211 : vector<16x128xf32>
    %213 = arith.addf %209, %212 : vector<16x128xf32>
    %c6_90 = arith.constant 6 : index
    %c0_91 = arith.constant 0 : index
    %214 = memref.load %arg4[%c6_90, %c0_91] : memref<12x12xf32, #tpu.memory_space<smem>>
    %215 = vector.broadcast %214 : f32 to vector<16x128xf32>
    %216 = arith.mulf %115, %215 : vector<16x128xf32>
    %217 = arith.addf %213, %216 : vector<16x128xf32>
    %c7_92 = arith.constant 7 : index
    %c0_93 = arith.constant 0 : index
    %218 = memref.load %arg4[%c7_92, %c0_93] : memref<12x12xf32, #tpu.memory_space<smem>>
    %219 = vector.broadcast %218 : f32 to vector<16x128xf32>
    %220 = arith.mulf %130, %219 : vector<16x128xf32>
    %221 = arith.addf %217, %220 : vector<16x128xf32>
    %c8_94 = arith.constant 8 : index
    %c0_95 = arith.constant 0 : index
    %222 = memref.load %arg4[%c8_94, %c0_95] : memref<12x12xf32, #tpu.memory_space<smem>>
    %223 = vector.broadcast %222 : f32 to vector<16x128xf32>
    %224 = arith.mulf %145, %223 : vector<16x128xf32>
    %225 = arith.addf %221, %224 : vector<16x128xf32>
    %c9_96 = arith.constant 9 : index
    %c0_97 = arith.constant 0 : index
    %226 = memref.load %arg4[%c9_96, %c0_97] : memref<12x12xf32, #tpu.memory_space<smem>>
    %227 = vector.broadcast %226 : f32 to vector<16x128xf32>
    %228 = arith.mulf %160, %227 : vector<16x128xf32>
    %229 = arith.addf %225, %228 : vector<16x128xf32>
    %c10_98 = arith.constant 10 : index
    %c0_99 = arith.constant 0 : index
    %230 = memref.load %arg4[%c10_98, %c0_99] : memref<12x12xf32, #tpu.memory_space<smem>>
    %231 = vector.broadcast %230 : f32 to vector<16x128xf32>
    %232 = arith.mulf %175, %231 : vector<16x128xf32>
    %233 = arith.addf %229, %232 : vector<16x128xf32>
    %c11_100 = arith.constant 11 : index
    %c0_101 = arith.constant 0 : index
    %234 = memref.load %arg4[%c11_100, %c0_101] : memref<12x12xf32, #tpu.memory_space<smem>>
    %235 = vector.broadcast %234 : f32 to vector<16x128xf32>
    %236 = arith.mulf %190, %235 : vector<16x128xf32>
    %237 = arith.addf %233, %236 : vector<16x128xf32>
    %c0_102 = arith.constant 0 : index
    %238 = memref.load %arg5[%c0_102] : memref<12xf32, #tpu.memory_space<smem>>
    %239 = vector.broadcast %238 : f32 to vector<16x128xf32>
    %240 = arith.addf %237, %239 : vector<16x128xf32>
    %241 = math.tanh %240 : vector<16x128xf32>
    %c0_103 = arith.constant 0 : index
    %242 = memref.load %arg6[%c0_103] : memref<12xf32, #tpu.memory_space<smem>>
    %243 = vector.broadcast %242 : f32 to vector<16x128xf32>
    %244 = arith.mulf %241, %243 : vector<16x128xf32>
    %c0_104 = arith.constant 0 : index
    %c1_105 = arith.constant 1 : index
    %245 = memref.load %arg4[%c0_104, %c1_105] : memref<12x12xf32, #tpu.memory_space<smem>>
    %246 = vector.broadcast %245 : f32 to vector<16x128xf32>
    %247 = arith.mulf %25, %246 : vector<16x128xf32>
    %c1_106 = arith.constant 1 : index
    %c1_107 = arith.constant 1 : index
    %248 = memref.load %arg4[%c1_106, %c1_107] : memref<12x12xf32, #tpu.memory_space<smem>>
    %249 = vector.broadcast %248 : f32 to vector<16x128xf32>
    %250 = arith.mulf %40, %249 : vector<16x128xf32>
    %251 = arith.addf %247, %250 : vector<16x128xf32>
    %c2_108 = arith.constant 2 : index
    %c1_109 = arith.constant 1 : index
    %252 = memref.load %arg4[%c2_108, %c1_109] : memref<12x12xf32, #tpu.memory_space<smem>>
    %253 = vector.broadcast %252 : f32 to vector<16x128xf32>
    %254 = arith.mulf %55, %253 : vector<16x128xf32>
    %255 = arith.addf %251, %254 : vector<16x128xf32>
    %c3_110 = arith.constant 3 : index
    %c1_111 = arith.constant 1 : index
    %256 = memref.load %arg4[%c3_110, %c1_111] : memref<12x12xf32, #tpu.memory_space<smem>>
    %257 = vector.broadcast %256 : f32 to vector<16x128xf32>
    %258 = arith.mulf %70, %257 : vector<16x128xf32>
    %259 = arith.addf %255, %258 : vector<16x128xf32>
    %c4_112 = arith.constant 4 : index
    %c1_113 = arith.constant 1 : index
    %260 = memref.load %arg4[%c4_112, %c1_113] : memref<12x12xf32, #tpu.memory_space<smem>>
    %261 = vector.broadcast %260 : f32 to vector<16x128xf32>
    %262 = arith.mulf %85, %261 : vector<16x128xf32>
    %263 = arith.addf %259, %262 : vector<16x128xf32>
    %c5_114 = arith.constant 5 : index
    %c1_115 = arith.constant 1 : index
    %264 = memref.load %arg4[%c5_114, %c1_115] : memref<12x12xf32, #tpu.memory_space<smem>>
    %265 = vector.broadcast %264 : f32 to vector<16x128xf32>
    %266 = arith.mulf %100, %265 : vector<16x128xf32>
    %267 = arith.addf %263, %266 : vector<16x128xf32>
    %c6_116 = arith.constant 6 : index
    %c1_117 = arith.constant 1 : index
    %268 = memref.load %arg4[%c6_116, %c1_117] : memref<12x12xf32, #tpu.memory_space<smem>>
    %269 = vector.broadcast %268 : f32 to vector<16x128xf32>
    %270 = arith.mulf %115, %269 : vector<16x128xf32>
    %271 = arith.addf %267, %270 : vector<16x128xf32>
    %c7_118 = arith.constant 7 : index
    %c1_119 = arith.constant 1 : index
    %272 = memref.load %arg4[%c7_118, %c1_119] : memref<12x12xf32, #tpu.memory_space<smem>>
    %273 = vector.broadcast %272 : f32 to vector<16x128xf32>
    %274 = arith.mulf %130, %273 : vector<16x128xf32>
    %275 = arith.addf %271, %274 : vector<16x128xf32>
    %c8_120 = arith.constant 8 : index
    %c1_121 = arith.constant 1 : index
    %276 = memref.load %arg4[%c8_120, %c1_121] : memref<12x12xf32, #tpu.memory_space<smem>>
    %277 = vector.broadcast %276 : f32 to vector<16x128xf32>
    %278 = arith.mulf %145, %277 : vector<16x128xf32>
    %279 = arith.addf %275, %278 : vector<16x128xf32>
    %c9_122 = arith.constant 9 : index
    %c1_123 = arith.constant 1 : index
    %280 = memref.load %arg4[%c9_122, %c1_123] : memref<12x12xf32, #tpu.memory_space<smem>>
    %281 = vector.broadcast %280 : f32 to vector<16x128xf32>
    %282 = arith.mulf %160, %281 : vector<16x128xf32>
    %283 = arith.addf %279, %282 : vector<16x128xf32>
    %c10_124 = arith.constant 10 : index
    %c1_125 = arith.constant 1 : index
    %284 = memref.load %arg4[%c10_124, %c1_125] : memref<12x12xf32, #tpu.memory_space<smem>>
    %285 = vector.broadcast %284 : f32 to vector<16x128xf32>
    %286 = arith.mulf %175, %285 : vector<16x128xf32>
    %287 = arith.addf %283, %286 : vector<16x128xf32>
    %c11_126 = arith.constant 11 : index
    %c1_127 = arith.constant 1 : index
    %288 = memref.load %arg4[%c11_126, %c1_127] : memref<12x12xf32, #tpu.memory_space<smem>>
    %289 = vector.broadcast %288 : f32 to vector<16x128xf32>
    %290 = arith.mulf %190, %289 : vector<16x128xf32>
    %291 = arith.addf %287, %290 : vector<16x128xf32>
    %c1_128 = arith.constant 1 : index
    %292 = memref.load %arg5[%c1_128] : memref<12xf32, #tpu.memory_space<smem>>
    %293 = vector.broadcast %292 : f32 to vector<16x128xf32>
    %294 = arith.addf %291, %293 : vector<16x128xf32>
    %295 = math.tanh %294 : vector<16x128xf32>
    %c1_129 = arith.constant 1 : index
    %296 = memref.load %arg6[%c1_129] : memref<12xf32, #tpu.memory_space<smem>>
    %297 = vector.broadcast %296 : f32 to vector<16x128xf32>
    %298 = arith.mulf %295, %297 : vector<16x128xf32>
    %299 = arith.addf %244, %298 : vector<16x128xf32>
    %c0_130 = arith.constant 0 : index
    %c2_131 = arith.constant 2 : index
    %300 = memref.load %arg4[%c0_130, %c2_131] : memref<12x12xf32, #tpu.memory_space<smem>>
    %301 = vector.broadcast %300 : f32 to vector<16x128xf32>
    %302 = arith.mulf %25, %301 : vector<16x128xf32>
    %c1_132 = arith.constant 1 : index
    %c2_133 = arith.constant 2 : index
    %303 = memref.load %arg4[%c1_132, %c2_133] : memref<12x12xf32, #tpu.memory_space<smem>>
    %304 = vector.broadcast %303 : f32 to vector<16x128xf32>
    %305 = arith.mulf %40, %304 : vector<16x128xf32>
    %306 = arith.addf %302, %305 : vector<16x128xf32>
    %c2_134 = arith.constant 2 : index
    %c2_135 = arith.constant 2 : index
    %307 = memref.load %arg4[%c2_134, %c2_135] : memref<12x12xf32, #tpu.memory_space<smem>>
    %308 = vector.broadcast %307 : f32 to vector<16x128xf32>
    %309 = arith.mulf %55, %308 : vector<16x128xf32>
    %310 = arith.addf %306, %309 : vector<16x128xf32>
    %c3_136 = arith.constant 3 : index
    %c2_137 = arith.constant 2 : index
    %311 = memref.load %arg4[%c3_136, %c2_137] : memref<12x12xf32, #tpu.memory_space<smem>>
    %312 = vector.broadcast %311 : f32 to vector<16x128xf32>
    %313 = arith.mulf %70, %312 : vector<16x128xf32>
    %314 = arith.addf %310, %313 : vector<16x128xf32>
    %c4_138 = arith.constant 4 : index
    %c2_139 = arith.constant 2 : index
    %315 = memref.load %arg4[%c4_138, %c2_139] : memref<12x12xf32, #tpu.memory_space<smem>>
    %316 = vector.broadcast %315 : f32 to vector<16x128xf32>
    %317 = arith.mulf %85, %316 : vector<16x128xf32>
    %318 = arith.addf %314, %317 : vector<16x128xf32>
    %c5_140 = arith.constant 5 : index
    %c2_141 = arith.constant 2 : index
    %319 = memref.load %arg4[%c5_140, %c2_141] : memref<12x12xf32, #tpu.memory_space<smem>>
    %320 = vector.broadcast %319 : f32 to vector<16x128xf32>
    %321 = arith.mulf %100, %320 : vector<16x128xf32>
    %322 = arith.addf %318, %321 : vector<16x128xf32>
    %c6_142 = arith.constant 6 : index
    %c2_143 = arith.constant 2 : index
    %323 = memref.load %arg4[%c6_142, %c2_143] : memref<12x12xf32, #tpu.memory_space<smem>>
    %324 = vector.broadcast %323 : f32 to vector<16x128xf32>
    %325 = arith.mulf %115, %324 : vector<16x128xf32>
    %326 = arith.addf %322, %325 : vector<16x128xf32>
    %c7_144 = arith.constant 7 : index
    %c2_145 = arith.constant 2 : index
    %327 = memref.load %arg4[%c7_144, %c2_145] : memref<12x12xf32, #tpu.memory_space<smem>>
    %328 = vector.broadcast %327 : f32 to vector<16x128xf32>
    %329 = arith.mulf %130, %328 : vector<16x128xf32>
    %330 = arith.addf %326, %329 : vector<16x128xf32>
    %c8_146 = arith.constant 8 : index
    %c2_147 = arith.constant 2 : index
    %331 = memref.load %arg4[%c8_146, %c2_147] : memref<12x12xf32, #tpu.memory_space<smem>>
    %332 = vector.broadcast %331 : f32 to vector<16x128xf32>
    %333 = arith.mulf %145, %332 : vector<16x128xf32>
    %334 = arith.addf %330, %333 : vector<16x128xf32>
    %c9_148 = arith.constant 9 : index
    %c2_149 = arith.constant 2 : index
    %335 = memref.load %arg4[%c9_148, %c2_149] : memref<12x12xf32, #tpu.memory_space<smem>>
    %336 = vector.broadcast %335 : f32 to vector<16x128xf32>
    %337 = arith.mulf %160, %336 : vector<16x128xf32>
    %338 = arith.addf %334, %337 : vector<16x128xf32>
    %c10_150 = arith.constant 10 : index
    %c2_151 = arith.constant 2 : index
    %339 = memref.load %arg4[%c10_150, %c2_151] : memref<12x12xf32, #tpu.memory_space<smem>>
    %340 = vector.broadcast %339 : f32 to vector<16x128xf32>
    %341 = arith.mulf %175, %340 : vector<16x128xf32>
    %342 = arith.addf %338, %341 : vector<16x128xf32>
    %c11_152 = arith.constant 11 : index
    %c2_153 = arith.constant 2 : index
    %343 = memref.load %arg4[%c11_152, %c2_153] : memref<12x12xf32, #tpu.memory_space<smem>>
    %344 = vector.broadcast %343 : f32 to vector<16x128xf32>
    %345 = arith.mulf %190, %344 : vector<16x128xf32>
    %346 = arith.addf %342, %345 : vector<16x128xf32>
    %c2_154 = arith.constant 2 : index
    %347 = memref.load %arg5[%c2_154] : memref<12xf32, #tpu.memory_space<smem>>
    %348 = vector.broadcast %347 : f32 to vector<16x128xf32>
    %349 = arith.addf %346, %348 : vector<16x128xf32>
    %350 = math.tanh %349 : vector<16x128xf32>
    %c2_155 = arith.constant 2 : index
    %351 = memref.load %arg6[%c2_155] : memref<12xf32, #tpu.memory_space<smem>>
    %352 = vector.broadcast %351 : f32 to vector<16x128xf32>
    %353 = arith.mulf %350, %352 : vector<16x128xf32>
    %354 = arith.addf %299, %353 : vector<16x128xf32>
    %c0_156 = arith.constant 0 : index
    %c3_157 = arith.constant 3 : index
    %355 = memref.load %arg4[%c0_156, %c3_157] : memref<12x12xf32, #tpu.memory_space<smem>>
    %356 = vector.broadcast %355 : f32 to vector<16x128xf32>
    %357 = arith.mulf %25, %356 : vector<16x128xf32>
    %c1_158 = arith.constant 1 : index
    %c3_159 = arith.constant 3 : index
    %358 = memref.load %arg4[%c1_158, %c3_159] : memref<12x12xf32, #tpu.memory_space<smem>>
    %359 = vector.broadcast %358 : f32 to vector<16x128xf32>
    %360 = arith.mulf %40, %359 : vector<16x128xf32>
    %361 = arith.addf %357, %360 : vector<16x128xf32>
    %c2_160 = arith.constant 2 : index
    %c3_161 = arith.constant 3 : index
    %362 = memref.load %arg4[%c2_160, %c3_161] : memref<12x12xf32, #tpu.memory_space<smem>>
    %363 = vector.broadcast %362 : f32 to vector<16x128xf32>
    %364 = arith.mulf %55, %363 : vector<16x128xf32>
    %365 = arith.addf %361, %364 : vector<16x128xf32>
    %c3_162 = arith.constant 3 : index
    %c3_163 = arith.constant 3 : index
    %366 = memref.load %arg4[%c3_162, %c3_163] : memref<12x12xf32, #tpu.memory_space<smem>>
    %367 = vector.broadcast %366 : f32 to vector<16x128xf32>
    %368 = arith.mulf %70, %367 : vector<16x128xf32>
    %369 = arith.addf %365, %368 : vector<16x128xf32>
    %c4_164 = arith.constant 4 : index
    %c3_165 = arith.constant 3 : index
    %370 = memref.load %arg4[%c4_164, %c3_165] : memref<12x12xf32, #tpu.memory_space<smem>>
    %371 = vector.broadcast %370 : f32 to vector<16x128xf32>
    %372 = arith.mulf %85, %371 : vector<16x128xf32>
    %373 = arith.addf %369, %372 : vector<16x128xf32>
    %c5_166 = arith.constant 5 : index
    %c3_167 = arith.constant 3 : index
    %374 = memref.load %arg4[%c5_166, %c3_167] : memref<12x12xf32, #tpu.memory_space<smem>>
    %375 = vector.broadcast %374 : f32 to vector<16x128xf32>
    %376 = arith.mulf %100, %375 : vector<16x128xf32>
    %377 = arith.addf %373, %376 : vector<16x128xf32>
    %c6_168 = arith.constant 6 : index
    %c3_169 = arith.constant 3 : index
    %378 = memref.load %arg4[%c6_168, %c3_169] : memref<12x12xf32, #tpu.memory_space<smem>>
    %379 = vector.broadcast %378 : f32 to vector<16x128xf32>
    %380 = arith.mulf %115, %379 : vector<16x128xf32>
    %381 = arith.addf %377, %380 : vector<16x128xf32>
    %c7_170 = arith.constant 7 : index
    %c3_171 = arith.constant 3 : index
    %382 = memref.load %arg4[%c7_170, %c3_171] : memref<12x12xf32, #tpu.memory_space<smem>>
    %383 = vector.broadcast %382 : f32 to vector<16x128xf32>
    %384 = arith.mulf %130, %383 : vector<16x128xf32>
    %385 = arith.addf %381, %384 : vector<16x128xf32>
    %c8_172 = arith.constant 8 : index
    %c3_173 = arith.constant 3 : index
    %386 = memref.load %arg4[%c8_172, %c3_173] : memref<12x12xf32, #tpu.memory_space<smem>>
    %387 = vector.broadcast %386 : f32 to vector<16x128xf32>
    %388 = arith.mulf %145, %387 : vector<16x128xf32>
    %389 = arith.addf %385, %388 : vector<16x128xf32>
    %c9_174 = arith.constant 9 : index
    %c3_175 = arith.constant 3 : index
    %390 = memref.load %arg4[%c9_174, %c3_175] : memref<12x12xf32, #tpu.memory_space<smem>>
    %391 = vector.broadcast %390 : f32 to vector<16x128xf32>
    %392 = arith.mulf %160, %391 : vector<16x128xf32>
    %393 = arith.addf %389, %392 : vector<16x128xf32>
    %c10_176 = arith.constant 10 : index
    %c3_177 = arith.constant 3 : index
    %394 = memref.load %arg4[%c10_176, %c3_177] : memref<12x12xf32, #tpu.memory_space<smem>>
    %395 = vector.broadcast %394 : f32 to vector<16x128xf32>
    %396 = arith.mulf %175, %395 : vector<16x128xf32>
    %397 = arith.addf %393, %396 : vector<16x128xf32>
    %c11_178 = arith.constant 11 : index
    %c3_179 = arith.constant 3 : index
    %398 = memref.load %arg4[%c11_178, %c3_179] : memref<12x12xf32, #tpu.memory_space<smem>>
    %399 = vector.broadcast %398 : f32 to vector<16x128xf32>
    %400 = arith.mulf %190, %399 : vector<16x128xf32>
    %401 = arith.addf %397, %400 : vector<16x128xf32>
    %c3_180 = arith.constant 3 : index
    %402 = memref.load %arg5[%c3_180] : memref<12xf32, #tpu.memory_space<smem>>
    %403 = vector.broadcast %402 : f32 to vector<16x128xf32>
    %404 = arith.addf %401, %403 : vector<16x128xf32>
    %405 = math.tanh %404 : vector<16x128xf32>
    %c3_181 = arith.constant 3 : index
    %406 = memref.load %arg6[%c3_181] : memref<12xf32, #tpu.memory_space<smem>>
    %407 = vector.broadcast %406 : f32 to vector<16x128xf32>
    %408 = arith.mulf %405, %407 : vector<16x128xf32>
    %409 = arith.addf %354, %408 : vector<16x128xf32>
    %c0_182 = arith.constant 0 : index
    %c4_183 = arith.constant 4 : index
    %410 = memref.load %arg4[%c0_182, %c4_183] : memref<12x12xf32, #tpu.memory_space<smem>>
    %411 = vector.broadcast %410 : f32 to vector<16x128xf32>
    %412 = arith.mulf %25, %411 : vector<16x128xf32>
    %c1_184 = arith.constant 1 : index
    %c4_185 = arith.constant 4 : index
    %413 = memref.load %arg4[%c1_184, %c4_185] : memref<12x12xf32, #tpu.memory_space<smem>>
    %414 = vector.broadcast %413 : f32 to vector<16x128xf32>
    %415 = arith.mulf %40, %414 : vector<16x128xf32>
    %416 = arith.addf %412, %415 : vector<16x128xf32>
    %c2_186 = arith.constant 2 : index
    %c4_187 = arith.constant 4 : index
    %417 = memref.load %arg4[%c2_186, %c4_187] : memref<12x12xf32, #tpu.memory_space<smem>>
    %418 = vector.broadcast %417 : f32 to vector<16x128xf32>
    %419 = arith.mulf %55, %418 : vector<16x128xf32>
    %420 = arith.addf %416, %419 : vector<16x128xf32>
    %c3_188 = arith.constant 3 : index
    %c4_189 = arith.constant 4 : index
    %421 = memref.load %arg4[%c3_188, %c4_189] : memref<12x12xf32, #tpu.memory_space<smem>>
    %422 = vector.broadcast %421 : f32 to vector<16x128xf32>
    %423 = arith.mulf %70, %422 : vector<16x128xf32>
    %424 = arith.addf %420, %423 : vector<16x128xf32>
    %c4_190 = arith.constant 4 : index
    %c4_191 = arith.constant 4 : index
    %425 = memref.load %arg4[%c4_190, %c4_191] : memref<12x12xf32, #tpu.memory_space<smem>>
    %426 = vector.broadcast %425 : f32 to vector<16x128xf32>
    %427 = arith.mulf %85, %426 : vector<16x128xf32>
    %428 = arith.addf %424, %427 : vector<16x128xf32>
    %c5_192 = arith.constant 5 : index
    %c4_193 = arith.constant 4 : index
    %429 = memref.load %arg4[%c5_192, %c4_193] : memref<12x12xf32, #tpu.memory_space<smem>>
    %430 = vector.broadcast %429 : f32 to vector<16x128xf32>
    %431 = arith.mulf %100, %430 : vector<16x128xf32>
    %432 = arith.addf %428, %431 : vector<16x128xf32>
    %c6_194 = arith.constant 6 : index
    %c4_195 = arith.constant 4 : index
    %433 = memref.load %arg4[%c6_194, %c4_195] : memref<12x12xf32, #tpu.memory_space<smem>>
    %434 = vector.broadcast %433 : f32 to vector<16x128xf32>
    %435 = arith.mulf %115, %434 : vector<16x128xf32>
    %436 = arith.addf %432, %435 : vector<16x128xf32>
    %c7_196 = arith.constant 7 : index
    %c4_197 = arith.constant 4 : index
    %437 = memref.load %arg4[%c7_196, %c4_197] : memref<12x12xf32, #tpu.memory_space<smem>>
    %438 = vector.broadcast %437 : f32 to vector<16x128xf32>
    %439 = arith.mulf %130, %438 : vector<16x128xf32>
    %440 = arith.addf %436, %439 : vector<16x128xf32>
    %c8_198 = arith.constant 8 : index
    %c4_199 = arith.constant 4 : index
    %441 = memref.load %arg4[%c8_198, %c4_199] : memref<12x12xf32, #tpu.memory_space<smem>>
    %442 = vector.broadcast %441 : f32 to vector<16x128xf32>
    %443 = arith.mulf %145, %442 : vector<16x128xf32>
    %444 = arith.addf %440, %443 : vector<16x128xf32>
    %c9_200 = arith.constant 9 : index
    %c4_201 = arith.constant 4 : index
    %445 = memref.load %arg4[%c9_200, %c4_201] : memref<12x12xf32, #tpu.memory_space<smem>>
    %446 = vector.broadcast %445 : f32 to vector<16x128xf32>
    %447 = arith.mulf %160, %446 : vector<16x128xf32>
    %448 = arith.addf %444, %447 : vector<16x128xf32>
    %c10_202 = arith.constant 10 : index
    %c4_203 = arith.constant 4 : index
    %449 = memref.load %arg4[%c10_202, %c4_203] : memref<12x12xf32, #tpu.memory_space<smem>>
    %450 = vector.broadcast %449 : f32 to vector<16x128xf32>
    %451 = arith.mulf %175, %450 : vector<16x128xf32>
    %452 = arith.addf %448, %451 : vector<16x128xf32>
    %c11_204 = arith.constant 11 : index
    %c4_205 = arith.constant 4 : index
    %453 = memref.load %arg4[%c11_204, %c4_205] : memref<12x12xf32, #tpu.memory_space<smem>>
    %454 = vector.broadcast %453 : f32 to vector<16x128xf32>
    %455 = arith.mulf %190, %454 : vector<16x128xf32>
    %456 = arith.addf %452, %455 : vector<16x128xf32>
    %c4_206 = arith.constant 4 : index
    %457 = memref.load %arg5[%c4_206] : memref<12xf32, #tpu.memory_space<smem>>
    %458 = vector.broadcast %457 : f32 to vector<16x128xf32>
    %459 = arith.addf %456, %458 : vector<16x128xf32>
    %460 = math.tanh %459 : vector<16x128xf32>
    %c4_207 = arith.constant 4 : index
    %461 = memref.load %arg6[%c4_207] : memref<12xf32, #tpu.memory_space<smem>>
    %462 = vector.broadcast %461 : f32 to vector<16x128xf32>
    %463 = arith.mulf %460, %462 : vector<16x128xf32>
    %464 = arith.addf %409, %463 : vector<16x128xf32>
    %c0_208 = arith.constant 0 : index
    %c5_209 = arith.constant 5 : index
    %465 = memref.load %arg4[%c0_208, %c5_209] : memref<12x12xf32, #tpu.memory_space<smem>>
    %466 = vector.broadcast %465 : f32 to vector<16x128xf32>
    %467 = arith.mulf %25, %466 : vector<16x128xf32>
    %c1_210 = arith.constant 1 : index
    %c5_211 = arith.constant 5 : index
    %468 = memref.load %arg4[%c1_210, %c5_211] : memref<12x12xf32, #tpu.memory_space<smem>>
    %469 = vector.broadcast %468 : f32 to vector<16x128xf32>
    %470 = arith.mulf %40, %469 : vector<16x128xf32>
    %471 = arith.addf %467, %470 : vector<16x128xf32>
    %c2_212 = arith.constant 2 : index
    %c5_213 = arith.constant 5 : index
    %472 = memref.load %arg4[%c2_212, %c5_213] : memref<12x12xf32, #tpu.memory_space<smem>>
    %473 = vector.broadcast %472 : f32 to vector<16x128xf32>
    %474 = arith.mulf %55, %473 : vector<16x128xf32>
    %475 = arith.addf %471, %474 : vector<16x128xf32>
    %c3_214 = arith.constant 3 : index
    %c5_215 = arith.constant 5 : index
    %476 = memref.load %arg4[%c3_214, %c5_215] : memref<12x12xf32, #tpu.memory_space<smem>>
    %477 = vector.broadcast %476 : f32 to vector<16x128xf32>
    %478 = arith.mulf %70, %477 : vector<16x128xf32>
    %479 = arith.addf %475, %478 : vector<16x128xf32>
    %c4_216 = arith.constant 4 : index
    %c5_217 = arith.constant 5 : index
    %480 = memref.load %arg4[%c4_216, %c5_217] : memref<12x12xf32, #tpu.memory_space<smem>>
    %481 = vector.broadcast %480 : f32 to vector<16x128xf32>
    %482 = arith.mulf %85, %481 : vector<16x128xf32>
    %483 = arith.addf %479, %482 : vector<16x128xf32>
    %c5_218 = arith.constant 5 : index
    %c5_219 = arith.constant 5 : index
    %484 = memref.load %arg4[%c5_218, %c5_219] : memref<12x12xf32, #tpu.memory_space<smem>>
    %485 = vector.broadcast %484 : f32 to vector<16x128xf32>
    %486 = arith.mulf %100, %485 : vector<16x128xf32>
    %487 = arith.addf %483, %486 : vector<16x128xf32>
    %c6_220 = arith.constant 6 : index
    %c5_221 = arith.constant 5 : index
    %488 = memref.load %arg4[%c6_220, %c5_221] : memref<12x12xf32, #tpu.memory_space<smem>>
    %489 = vector.broadcast %488 : f32 to vector<16x128xf32>
    %490 = arith.mulf %115, %489 : vector<16x128xf32>
    %491 = arith.addf %487, %490 : vector<16x128xf32>
    %c7_222 = arith.constant 7 : index
    %c5_223 = arith.constant 5 : index
    %492 = memref.load %arg4[%c7_222, %c5_223] : memref<12x12xf32, #tpu.memory_space<smem>>
    %493 = vector.broadcast %492 : f32 to vector<16x128xf32>
    %494 = arith.mulf %130, %493 : vector<16x128xf32>
    %495 = arith.addf %491, %494 : vector<16x128xf32>
    %c8_224 = arith.constant 8 : index
    %c5_225 = arith.constant 5 : index
    %496 = memref.load %arg4[%c8_224, %c5_225] : memref<12x12xf32, #tpu.memory_space<smem>>
    %497 = vector.broadcast %496 : f32 to vector<16x128xf32>
    %498 = arith.mulf %145, %497 : vector<16x128xf32>
    %499 = arith.addf %495, %498 : vector<16x128xf32>
    %c9_226 = arith.constant 9 : index
    %c5_227 = arith.constant 5 : index
    %500 = memref.load %arg4[%c9_226, %c5_227] : memref<12x12xf32, #tpu.memory_space<smem>>
    %501 = vector.broadcast %500 : f32 to vector<16x128xf32>
    %502 = arith.mulf %160, %501 : vector<16x128xf32>
    %503 = arith.addf %499, %502 : vector<16x128xf32>
    %c10_228 = arith.constant 10 : index
    %c5_229 = arith.constant 5 : index
    %504 = memref.load %arg4[%c10_228, %c5_229] : memref<12x12xf32, #tpu.memory_space<smem>>
    %505 = vector.broadcast %504 : f32 to vector<16x128xf32>
    %506 = arith.mulf %175, %505 : vector<16x128xf32>
    %507 = arith.addf %503, %506 : vector<16x128xf32>
    %c11_230 = arith.constant 11 : index
    %c5_231 = arith.constant 5 : index
    %508 = memref.load %arg4[%c11_230, %c5_231] : memref<12x12xf32, #tpu.memory_space<smem>>
    %509 = vector.broadcast %508 : f32 to vector<16x128xf32>
    %510 = arith.mulf %190, %509 : vector<16x128xf32>
    %511 = arith.addf %507, %510 : vector<16x128xf32>
    %c5_232 = arith.constant 5 : index
    %512 = memref.load %arg5[%c5_232] : memref<12xf32, #tpu.memory_space<smem>>
    %513 = vector.broadcast %512 : f32 to vector<16x128xf32>
    %514 = arith.addf %511, %513 : vector<16x128xf32>
    %515 = math.tanh %514 : vector<16x128xf32>
    %c5_233 = arith.constant 5 : index
    %516 = memref.load %arg6[%c5_233] : memref<12xf32, #tpu.memory_space<smem>>
    %517 = vector.broadcast %516 : f32 to vector<16x128xf32>
    %518 = arith.mulf %515, %517 : vector<16x128xf32>
    %519 = arith.addf %464, %518 : vector<16x128xf32>
    %c0_234 = arith.constant 0 : index
    %c6_235 = arith.constant 6 : index
    %520 = memref.load %arg4[%c0_234, %c6_235] : memref<12x12xf32, #tpu.memory_space<smem>>
    %521 = vector.broadcast %520 : f32 to vector<16x128xf32>
    %522 = arith.mulf %25, %521 : vector<16x128xf32>
    %c1_236 = arith.constant 1 : index
    %c6_237 = arith.constant 6 : index
    %523 = memref.load %arg4[%c1_236, %c6_237] : memref<12x12xf32, #tpu.memory_space<smem>>
    %524 = vector.broadcast %523 : f32 to vector<16x128xf32>
    %525 = arith.mulf %40, %524 : vector<16x128xf32>
    %526 = arith.addf %522, %525 : vector<16x128xf32>
    %c2_238 = arith.constant 2 : index
    %c6_239 = arith.constant 6 : index
    %527 = memref.load %arg4[%c2_238, %c6_239] : memref<12x12xf32, #tpu.memory_space<smem>>
    %528 = vector.broadcast %527 : f32 to vector<16x128xf32>
    %529 = arith.mulf %55, %528 : vector<16x128xf32>
    %530 = arith.addf %526, %529 : vector<16x128xf32>
    %c3_240 = arith.constant 3 : index
    %c6_241 = arith.constant 6 : index
    %531 = memref.load %arg4[%c3_240, %c6_241] : memref<12x12xf32, #tpu.memory_space<smem>>
    %532 = vector.broadcast %531 : f32 to vector<16x128xf32>
    %533 = arith.mulf %70, %532 : vector<16x128xf32>
    %534 = arith.addf %530, %533 : vector<16x128xf32>
    %c4_242 = arith.constant 4 : index
    %c6_243 = arith.constant 6 : index
    %535 = memref.load %arg4[%c4_242, %c6_243] : memref<12x12xf32, #tpu.memory_space<smem>>
    %536 = vector.broadcast %535 : f32 to vector<16x128xf32>
    %537 = arith.mulf %85, %536 : vector<16x128xf32>
    %538 = arith.addf %534, %537 : vector<16x128xf32>
    %c5_244 = arith.constant 5 : index
    %c6_245 = arith.constant 6 : index
    %539 = memref.load %arg4[%c5_244, %c6_245] : memref<12x12xf32, #tpu.memory_space<smem>>
    %540 = vector.broadcast %539 : f32 to vector<16x128xf32>
    %541 = arith.mulf %100, %540 : vector<16x128xf32>
    %542 = arith.addf %538, %541 : vector<16x128xf32>
    %c6_246 = arith.constant 6 : index
    %c6_247 = arith.constant 6 : index
    %543 = memref.load %arg4[%c6_246, %c6_247] : memref<12x12xf32, #tpu.memory_space<smem>>
    %544 = vector.broadcast %543 : f32 to vector<16x128xf32>
    %545 = arith.mulf %115, %544 : vector<16x128xf32>
    %546 = arith.addf %542, %545 : vector<16x128xf32>
    %c7_248 = arith.constant 7 : index
    %c6_249 = arith.constant 6 : index
    %547 = memref.load %arg4[%c7_248, %c6_249] : memref<12x12xf32, #tpu.memory_space<smem>>
    %548 = vector.broadcast %547 : f32 to vector<16x128xf32>
    %549 = arith.mulf %130, %548 : vector<16x128xf32>
    %550 = arith.addf %546, %549 : vector<16x128xf32>
    %c8_250 = arith.constant 8 : index
    %c6_251 = arith.constant 6 : index
    %551 = memref.load %arg4[%c8_250, %c6_251] : memref<12x12xf32, #tpu.memory_space<smem>>
    %552 = vector.broadcast %551 : f32 to vector<16x128xf32>
    %553 = arith.mulf %145, %552 : vector<16x128xf32>
    %554 = arith.addf %550, %553 : vector<16x128xf32>
    %c9_252 = arith.constant 9 : index
    %c6_253 = arith.constant 6 : index
    %555 = memref.load %arg4[%c9_252, %c6_253] : memref<12x12xf32, #tpu.memory_space<smem>>
    %556 = vector.broadcast %555 : f32 to vector<16x128xf32>
    %557 = arith.mulf %160, %556 : vector<16x128xf32>
    %558 = arith.addf %554, %557 : vector<16x128xf32>
    %c10_254 = arith.constant 10 : index
    %c6_255 = arith.constant 6 : index
    %559 = memref.load %arg4[%c10_254, %c6_255] : memref<12x12xf32, #tpu.memory_space<smem>>
    %560 = vector.broadcast %559 : f32 to vector<16x128xf32>
    %561 = arith.mulf %175, %560 : vector<16x128xf32>
    %562 = arith.addf %558, %561 : vector<16x128xf32>
    %c11_256 = arith.constant 11 : index
    %c6_257 = arith.constant 6 : index
    %563 = memref.load %arg4[%c11_256, %c6_257] : memref<12x12xf32, #tpu.memory_space<smem>>
    %564 = vector.broadcast %563 : f32 to vector<16x128xf32>
    %565 = arith.mulf %190, %564 : vector<16x128xf32>
    %566 = arith.addf %562, %565 : vector<16x128xf32>
    %c6_258 = arith.constant 6 : index
    %567 = memref.load %arg5[%c6_258] : memref<12xf32, #tpu.memory_space<smem>>
    %568 = vector.broadcast %567 : f32 to vector<16x128xf32>
    %569 = arith.addf %566, %568 : vector<16x128xf32>
    %570 = math.tanh %569 : vector<16x128xf32>
    %c6_259 = arith.constant 6 : index
    %571 = memref.load %arg6[%c6_259] : memref<12xf32, #tpu.memory_space<smem>>
    %572 = vector.broadcast %571 : f32 to vector<16x128xf32>
    %573 = arith.mulf %570, %572 : vector<16x128xf32>
    %574 = arith.addf %519, %573 : vector<16x128xf32>
    %c0_260 = arith.constant 0 : index
    %c7_261 = arith.constant 7 : index
    %575 = memref.load %arg4[%c0_260, %c7_261] : memref<12x12xf32, #tpu.memory_space<smem>>
    %576 = vector.broadcast %575 : f32 to vector<16x128xf32>
    %577 = arith.mulf %25, %576 : vector<16x128xf32>
    %c1_262 = arith.constant 1 : index
    %c7_263 = arith.constant 7 : index
    %578 = memref.load %arg4[%c1_262, %c7_263] : memref<12x12xf32, #tpu.memory_space<smem>>
    %579 = vector.broadcast %578 : f32 to vector<16x128xf32>
    %580 = arith.mulf %40, %579 : vector<16x128xf32>
    %581 = arith.addf %577, %580 : vector<16x128xf32>
    %c2_264 = arith.constant 2 : index
    %c7_265 = arith.constant 7 : index
    %582 = memref.load %arg4[%c2_264, %c7_265] : memref<12x12xf32, #tpu.memory_space<smem>>
    %583 = vector.broadcast %582 : f32 to vector<16x128xf32>
    %584 = arith.mulf %55, %583 : vector<16x128xf32>
    %585 = arith.addf %581, %584 : vector<16x128xf32>
    %c3_266 = arith.constant 3 : index
    %c7_267 = arith.constant 7 : index
    %586 = memref.load %arg4[%c3_266, %c7_267] : memref<12x12xf32, #tpu.memory_space<smem>>
    %587 = vector.broadcast %586 : f32 to vector<16x128xf32>
    %588 = arith.mulf %70, %587 : vector<16x128xf32>
    %589 = arith.addf %585, %588 : vector<16x128xf32>
    %c4_268 = arith.constant 4 : index
    %c7_269 = arith.constant 7 : index
    %590 = memref.load %arg4[%c4_268, %c7_269] : memref<12x12xf32, #tpu.memory_space<smem>>
    %591 = vector.broadcast %590 : f32 to vector<16x128xf32>
    %592 = arith.mulf %85, %591 : vector<16x128xf32>
    %593 = arith.addf %589, %592 : vector<16x128xf32>
    %c5_270 = arith.constant 5 : index
    %c7_271 = arith.constant 7 : index
    %594 = memref.load %arg4[%c5_270, %c7_271] : memref<12x12xf32, #tpu.memory_space<smem>>
    %595 = vector.broadcast %594 : f32 to vector<16x128xf32>
    %596 = arith.mulf %100, %595 : vector<16x128xf32>
    %597 = arith.addf %593, %596 : vector<16x128xf32>
    %c6_272 = arith.constant 6 : index
    %c7_273 = arith.constant 7 : index
    %598 = memref.load %arg4[%c6_272, %c7_273] : memref<12x12xf32, #tpu.memory_space<smem>>
    %599 = vector.broadcast %598 : f32 to vector<16x128xf32>
    %600 = arith.mulf %115, %599 : vector<16x128xf32>
    %601 = arith.addf %597, %600 : vector<16x128xf32>
    %c7_274 = arith.constant 7 : index
    %c7_275 = arith.constant 7 : index
    %602 = memref.load %arg4[%c7_274, %c7_275] : memref<12x12xf32, #tpu.memory_space<smem>>
    %603 = vector.broadcast %602 : f32 to vector<16x128xf32>
    %604 = arith.mulf %130, %603 : vector<16x128xf32>
    %605 = arith.addf %601, %604 : vector<16x128xf32>
    %c8_276 = arith.constant 8 : index
    %c7_277 = arith.constant 7 : index
    %606 = memref.load %arg4[%c8_276, %c7_277] : memref<12x12xf32, #tpu.memory_space<smem>>
    %607 = vector.broadcast %606 : f32 to vector<16x128xf32>
    %608 = arith.mulf %145, %607 : vector<16x128xf32>
    %609 = arith.addf %605, %608 : vector<16x128xf32>
    %c9_278 = arith.constant 9 : index
    %c7_279 = arith.constant 7 : index
    %610 = memref.load %arg4[%c9_278, %c7_279] : memref<12x12xf32, #tpu.memory_space<smem>>
    %611 = vector.broadcast %610 : f32 to vector<16x128xf32>
    %612 = arith.mulf %160, %611 : vector<16x128xf32>
    %613 = arith.addf %609, %612 : vector<16x128xf32>
    %c10_280 = arith.constant 10 : index
    %c7_281 = arith.constant 7 : index
    %614 = memref.load %arg4[%c10_280, %c7_281] : memref<12x12xf32, #tpu.memory_space<smem>>
    %615 = vector.broadcast %614 : f32 to vector<16x128xf32>
    %616 = arith.mulf %175, %615 : vector<16x128xf32>
    %617 = arith.addf %613, %616 : vector<16x128xf32>
    %c11_282 = arith.constant 11 : index
    %c7_283 = arith.constant 7 : index
    %618 = memref.load %arg4[%c11_282, %c7_283] : memref<12x12xf32, #tpu.memory_space<smem>>
    %619 = vector.broadcast %618 : f32 to vector<16x128xf32>
    %620 = arith.mulf %190, %619 : vector<16x128xf32>
    %621 = arith.addf %617, %620 : vector<16x128xf32>
    %c7_284 = arith.constant 7 : index
    %622 = memref.load %arg5[%c7_284] : memref<12xf32, #tpu.memory_space<smem>>
    %623 = vector.broadcast %622 : f32 to vector<16x128xf32>
    %624 = arith.addf %621, %623 : vector<16x128xf32>
    %625 = math.tanh %624 : vector<16x128xf32>
    %c7_285 = arith.constant 7 : index
    %626 = memref.load %arg6[%c7_285] : memref<12xf32, #tpu.memory_space<smem>>
    %627 = vector.broadcast %626 : f32 to vector<16x128xf32>
    %628 = arith.mulf %625, %627 : vector<16x128xf32>
    %629 = arith.addf %574, %628 : vector<16x128xf32>
    %c0_286 = arith.constant 0 : index
    %c8_287 = arith.constant 8 : index
    %630 = memref.load %arg4[%c0_286, %c8_287] : memref<12x12xf32, #tpu.memory_space<smem>>
    %631 = vector.broadcast %630 : f32 to vector<16x128xf32>
    %632 = arith.mulf %25, %631 : vector<16x128xf32>
    %c1_288 = arith.constant 1 : index
    %c8_289 = arith.constant 8 : index
    %633 = memref.load %arg4[%c1_288, %c8_289] : memref<12x12xf32, #tpu.memory_space<smem>>
    %634 = vector.broadcast %633 : f32 to vector<16x128xf32>
    %635 = arith.mulf %40, %634 : vector<16x128xf32>
    %636 = arith.addf %632, %635 : vector<16x128xf32>
    %c2_290 = arith.constant 2 : index
    %c8_291 = arith.constant 8 : index
    %637 = memref.load %arg4[%c2_290, %c8_291] : memref<12x12xf32, #tpu.memory_space<smem>>
    %638 = vector.broadcast %637 : f32 to vector<16x128xf32>
    %639 = arith.mulf %55, %638 : vector<16x128xf32>
    %640 = arith.addf %636, %639 : vector<16x128xf32>
    %c3_292 = arith.constant 3 : index
    %c8_293 = arith.constant 8 : index
    %641 = memref.load %arg4[%c3_292, %c8_293] : memref<12x12xf32, #tpu.memory_space<smem>>
    %642 = vector.broadcast %641 : f32 to vector<16x128xf32>
    %643 = arith.mulf %70, %642 : vector<16x128xf32>
    %644 = arith.addf %640, %643 : vector<16x128xf32>
    %c4_294 = arith.constant 4 : index
    %c8_295 = arith.constant 8 : index
    %645 = memref.load %arg4[%c4_294, %c8_295] : memref<12x12xf32, #tpu.memory_space<smem>>
    %646 = vector.broadcast %645 : f32 to vector<16x128xf32>
    %647 = arith.mulf %85, %646 : vector<16x128xf32>
    %648 = arith.addf %644, %647 : vector<16x128xf32>
    %c5_296 = arith.constant 5 : index
    %c8_297 = arith.constant 8 : index
    %649 = memref.load %arg4[%c5_296, %c8_297] : memref<12x12xf32, #tpu.memory_space<smem>>
    %650 = vector.broadcast %649 : f32 to vector<16x128xf32>
    %651 = arith.mulf %100, %650 : vector<16x128xf32>
    %652 = arith.addf %648, %651 : vector<16x128xf32>
    %c6_298 = arith.constant 6 : index
    %c8_299 = arith.constant 8 : index
    %653 = memref.load %arg4[%c6_298, %c8_299] : memref<12x12xf32, #tpu.memory_space<smem>>
    %654 = vector.broadcast %653 : f32 to vector<16x128xf32>
    %655 = arith.mulf %115, %654 : vector<16x128xf32>
    %656 = arith.addf %652, %655 : vector<16x128xf32>
    %c7_300 = arith.constant 7 : index
    %c8_301 = arith.constant 8 : index
    %657 = memref.load %arg4[%c7_300, %c8_301] : memref<12x12xf32, #tpu.memory_space<smem>>
    %658 = vector.broadcast %657 : f32 to vector<16x128xf32>
    %659 = arith.mulf %130, %658 : vector<16x128xf32>
    %660 = arith.addf %656, %659 : vector<16x128xf32>
    %c8_302 = arith.constant 8 : index
    %c8_303 = arith.constant 8 : index
    %661 = memref.load %arg4[%c8_302, %c8_303] : memref<12x12xf32, #tpu.memory_space<smem>>
    %662 = vector.broadcast %661 : f32 to vector<16x128xf32>
    %663 = arith.mulf %145, %662 : vector<16x128xf32>
    %664 = arith.addf %660, %663 : vector<16x128xf32>
    %c9_304 = arith.constant 9 : index
    %c8_305 = arith.constant 8 : index
    %665 = memref.load %arg4[%c9_304, %c8_305] : memref<12x12xf32, #tpu.memory_space<smem>>
    %666 = vector.broadcast %665 : f32 to vector<16x128xf32>
    %667 = arith.mulf %160, %666 : vector<16x128xf32>
    %668 = arith.addf %664, %667 : vector<16x128xf32>
    %c10_306 = arith.constant 10 : index
    %c8_307 = arith.constant 8 : index
    %669 = memref.load %arg4[%c10_306, %c8_307] : memref<12x12xf32, #tpu.memory_space<smem>>
    %670 = vector.broadcast %669 : f32 to vector<16x128xf32>
    %671 = arith.mulf %175, %670 : vector<16x128xf32>
    %672 = arith.addf %668, %671 : vector<16x128xf32>
    %c11_308 = arith.constant 11 : index
    %c8_309 = arith.constant 8 : index
    %673 = memref.load %arg4[%c11_308, %c8_309] : memref<12x12xf32, #tpu.memory_space<smem>>
    %674 = vector.broadcast %673 : f32 to vector<16x128xf32>
    %675 = arith.mulf %190, %674 : vector<16x128xf32>
    %676 = arith.addf %672, %675 : vector<16x128xf32>
    %c8_310 = arith.constant 8 : index
    %677 = memref.load %arg5[%c8_310] : memref<12xf32, #tpu.memory_space<smem>>
    %678 = vector.broadcast %677 : f32 to vector<16x128xf32>
    %679 = arith.addf %676, %678 : vector<16x128xf32>
    %680 = math.tanh %679 : vector<16x128xf32>
    %c8_311 = arith.constant 8 : index
    %681 = memref.load %arg6[%c8_311] : memref<12xf32, #tpu.memory_space<smem>>
    %682 = vector.broadcast %681 : f32 to vector<16x128xf32>
    %683 = arith.mulf %680, %682 : vector<16x128xf32>
    %684 = arith.addf %629, %683 : vector<16x128xf32>
    %c0_312 = arith.constant 0 : index
    %c9_313 = arith.constant 9 : index
    %685 = memref.load %arg4[%c0_312, %c9_313] : memref<12x12xf32, #tpu.memory_space<smem>>
    %686 = vector.broadcast %685 : f32 to vector<16x128xf32>
    %687 = arith.mulf %25, %686 : vector<16x128xf32>
    %c1_314 = arith.constant 1 : index
    %c9_315 = arith.constant 9 : index
    %688 = memref.load %arg4[%c1_314, %c9_315] : memref<12x12xf32, #tpu.memory_space<smem>>
    %689 = vector.broadcast %688 : f32 to vector<16x128xf32>
    %690 = arith.mulf %40, %689 : vector<16x128xf32>
    %691 = arith.addf %687, %690 : vector<16x128xf32>
    %c2_316 = arith.constant 2 : index
    %c9_317 = arith.constant 9 : index
    %692 = memref.load %arg4[%c2_316, %c9_317] : memref<12x12xf32, #tpu.memory_space<smem>>
    %693 = vector.broadcast %692 : f32 to vector<16x128xf32>
    %694 = arith.mulf %55, %693 : vector<16x128xf32>
    %695 = arith.addf %691, %694 : vector<16x128xf32>
    %c3_318 = arith.constant 3 : index
    %c9_319 = arith.constant 9 : index
    %696 = memref.load %arg4[%c3_318, %c9_319] : memref<12x12xf32, #tpu.memory_space<smem>>
    %697 = vector.broadcast %696 : f32 to vector<16x128xf32>
    %698 = arith.mulf %70, %697 : vector<16x128xf32>
    %699 = arith.addf %695, %698 : vector<16x128xf32>
    %c4_320 = arith.constant 4 : index
    %c9_321 = arith.constant 9 : index
    %700 = memref.load %arg4[%c4_320, %c9_321] : memref<12x12xf32, #tpu.memory_space<smem>>
    %701 = vector.broadcast %700 : f32 to vector<16x128xf32>
    %702 = arith.mulf %85, %701 : vector<16x128xf32>
    %703 = arith.addf %699, %702 : vector<16x128xf32>
    %c5_322 = arith.constant 5 : index
    %c9_323 = arith.constant 9 : index
    %704 = memref.load %arg4[%c5_322, %c9_323] : memref<12x12xf32, #tpu.memory_space<smem>>
    %705 = vector.broadcast %704 : f32 to vector<16x128xf32>
    %706 = arith.mulf %100, %705 : vector<16x128xf32>
    %707 = arith.addf %703, %706 : vector<16x128xf32>
    %c6_324 = arith.constant 6 : index
    %c9_325 = arith.constant 9 : index
    %708 = memref.load %arg4[%c6_324, %c9_325] : memref<12x12xf32, #tpu.memory_space<smem>>
    %709 = vector.broadcast %708 : f32 to vector<16x128xf32>
    %710 = arith.mulf %115, %709 : vector<16x128xf32>
    %711 = arith.addf %707, %710 : vector<16x128xf32>
    %c7_326 = arith.constant 7 : index
    %c9_327 = arith.constant 9 : index
    %712 = memref.load %arg4[%c7_326, %c9_327] : memref<12x12xf32, #tpu.memory_space<smem>>
    %713 = vector.broadcast %712 : f32 to vector<16x128xf32>
    %714 = arith.mulf %130, %713 : vector<16x128xf32>
    %715 = arith.addf %711, %714 : vector<16x128xf32>
    %c8_328 = arith.constant 8 : index
    %c9_329 = arith.constant 9 : index
    %716 = memref.load %arg4[%c8_328, %c9_329] : memref<12x12xf32, #tpu.memory_space<smem>>
    %717 = vector.broadcast %716 : f32 to vector<16x128xf32>
    %718 = arith.mulf %145, %717 : vector<16x128xf32>
    %719 = arith.addf %715, %718 : vector<16x128xf32>
    %c9_330 = arith.constant 9 : index
    %c9_331 = arith.constant 9 : index
    %720 = memref.load %arg4[%c9_330, %c9_331] : memref<12x12xf32, #tpu.memory_space<smem>>
    %721 = vector.broadcast %720 : f32 to vector<16x128xf32>
    %722 = arith.mulf %160, %721 : vector<16x128xf32>
    %723 = arith.addf %719, %722 : vector<16x128xf32>
    %c10_332 = arith.constant 10 : index
    %c9_333 = arith.constant 9 : index
    %724 = memref.load %arg4[%c10_332, %c9_333] : memref<12x12xf32, #tpu.memory_space<smem>>
    %725 = vector.broadcast %724 : f32 to vector<16x128xf32>
    %726 = arith.mulf %175, %725 : vector<16x128xf32>
    %727 = arith.addf %723, %726 : vector<16x128xf32>
    %c11_334 = arith.constant 11 : index
    %c9_335 = arith.constant 9 : index
    %728 = memref.load %arg4[%c11_334, %c9_335] : memref<12x12xf32, #tpu.memory_space<smem>>
    %729 = vector.broadcast %728 : f32 to vector<16x128xf32>
    %730 = arith.mulf %190, %729 : vector<16x128xf32>
    %731 = arith.addf %727, %730 : vector<16x128xf32>
    %c9_336 = arith.constant 9 : index
    %732 = memref.load %arg5[%c9_336] : memref<12xf32, #tpu.memory_space<smem>>
    %733 = vector.broadcast %732 : f32 to vector<16x128xf32>
    %734 = arith.addf %731, %733 : vector<16x128xf32>
    %735 = math.tanh %734 : vector<16x128xf32>
    %c9_337 = arith.constant 9 : index
    %736 = memref.load %arg6[%c9_337] : memref<12xf32, #tpu.memory_space<smem>>
    %737 = vector.broadcast %736 : f32 to vector<16x128xf32>
    %738 = arith.mulf %735, %737 : vector<16x128xf32>
    %739 = arith.addf %684, %738 : vector<16x128xf32>
    %c0_338 = arith.constant 0 : index
    %c10_339 = arith.constant 10 : index
    %740 = memref.load %arg4[%c0_338, %c10_339] : memref<12x12xf32, #tpu.memory_space<smem>>
    %741 = vector.broadcast %740 : f32 to vector<16x128xf32>
    %742 = arith.mulf %25, %741 : vector<16x128xf32>
    %c1_340 = arith.constant 1 : index
    %c10_341 = arith.constant 10 : index
    %743 = memref.load %arg4[%c1_340, %c10_341] : memref<12x12xf32, #tpu.memory_space<smem>>
    %744 = vector.broadcast %743 : f32 to vector<16x128xf32>
    %745 = arith.mulf %40, %744 : vector<16x128xf32>
    %746 = arith.addf %742, %745 : vector<16x128xf32>
    %c2_342 = arith.constant 2 : index
    %c10_343 = arith.constant 10 : index
    %747 = memref.load %arg4[%c2_342, %c10_343] : memref<12x12xf32, #tpu.memory_space<smem>>
    %748 = vector.broadcast %747 : f32 to vector<16x128xf32>
    %749 = arith.mulf %55, %748 : vector<16x128xf32>
    %750 = arith.addf %746, %749 : vector<16x128xf32>
    %c3_344 = arith.constant 3 : index
    %c10_345 = arith.constant 10 : index
    %751 = memref.load %arg4[%c3_344, %c10_345] : memref<12x12xf32, #tpu.memory_space<smem>>
    %752 = vector.broadcast %751 : f32 to vector<16x128xf32>
    %753 = arith.mulf %70, %752 : vector<16x128xf32>
    %754 = arith.addf %750, %753 : vector<16x128xf32>
    %c4_346 = arith.constant 4 : index
    %c10_347 = arith.constant 10 : index
    %755 = memref.load %arg4[%c4_346, %c10_347] : memref<12x12xf32, #tpu.memory_space<smem>>
    %756 = vector.broadcast %755 : f32 to vector<16x128xf32>
    %757 = arith.mulf %85, %756 : vector<16x128xf32>
    %758 = arith.addf %754, %757 : vector<16x128xf32>
    %c5_348 = arith.constant 5 : index
    %c10_349 = arith.constant 10 : index
    %759 = memref.load %arg4[%c5_348, %c10_349] : memref<12x12xf32, #tpu.memory_space<smem>>
    %760 = vector.broadcast %759 : f32 to vector<16x128xf32>
    %761 = arith.mulf %100, %760 : vector<16x128xf32>
    %762 = arith.addf %758, %761 : vector<16x128xf32>
    %c6_350 = arith.constant 6 : index
    %c10_351 = arith.constant 10 : index
    %763 = memref.load %arg4[%c6_350, %c10_351] : memref<12x12xf32, #tpu.memory_space<smem>>
    %764 = vector.broadcast %763 : f32 to vector<16x128xf32>
    %765 = arith.mulf %115, %764 : vector<16x128xf32>
    %766 = arith.addf %762, %765 : vector<16x128xf32>
    %c7_352 = arith.constant 7 : index
    %c10_353 = arith.constant 10 : index
    %767 = memref.load %arg4[%c7_352, %c10_353] : memref<12x12xf32, #tpu.memory_space<smem>>
    %768 = vector.broadcast %767 : f32 to vector<16x128xf32>
    %769 = arith.mulf %130, %768 : vector<16x128xf32>
    %770 = arith.addf %766, %769 : vector<16x128xf32>
    %c8_354 = arith.constant 8 : index
    %c10_355 = arith.constant 10 : index
    %771 = memref.load %arg4[%c8_354, %c10_355] : memref<12x12xf32, #tpu.memory_space<smem>>
    %772 = vector.broadcast %771 : f32 to vector<16x128xf32>
    %773 = arith.mulf %145, %772 : vector<16x128xf32>
    %774 = arith.addf %770, %773 : vector<16x128xf32>
    %c9_356 = arith.constant 9 : index
    %c10_357 = arith.constant 10 : index
    %775 = memref.load %arg4[%c9_356, %c10_357] : memref<12x12xf32, #tpu.memory_space<smem>>
    %776 = vector.broadcast %775 : f32 to vector<16x128xf32>
    %777 = arith.mulf %160, %776 : vector<16x128xf32>
    %778 = arith.addf %774, %777 : vector<16x128xf32>
    %c10_358 = arith.constant 10 : index
    %c10_359 = arith.constant 10 : index
    %779 = memref.load %arg4[%c10_358, %c10_359] : memref<12x12xf32, #tpu.memory_space<smem>>
    %780 = vector.broadcast %779 : f32 to vector<16x128xf32>
    %781 = arith.mulf %175, %780 : vector<16x128xf32>
    %782 = arith.addf %778, %781 : vector<16x128xf32>
    %c11_360 = arith.constant 11 : index
    %c10_361 = arith.constant 10 : index
    %783 = memref.load %arg4[%c11_360, %c10_361] : memref<12x12xf32, #tpu.memory_space<smem>>
    %784 = vector.broadcast %783 : f32 to vector<16x128xf32>
    %785 = arith.mulf %190, %784 : vector<16x128xf32>
    %786 = arith.addf %782, %785 : vector<16x128xf32>
    %c10_362 = arith.constant 10 : index
    %787 = memref.load %arg5[%c10_362] : memref<12xf32, #tpu.memory_space<smem>>
    %788 = vector.broadcast %787 : f32 to vector<16x128xf32>
    %789 = arith.addf %786, %788 : vector<16x128xf32>
    %790 = math.tanh %789 : vector<16x128xf32>
    %c10_363 = arith.constant 10 : index
    %791 = memref.load %arg6[%c10_363] : memref<12xf32, #tpu.memory_space<smem>>
    %792 = vector.broadcast %791 : f32 to vector<16x128xf32>
    %793 = arith.mulf %790, %792 : vector<16x128xf32>
    %794 = arith.addf %739, %793 : vector<16x128xf32>
    %c0_364 = arith.constant 0 : index
    %c11_365 = arith.constant 11 : index
    %795 = memref.load %arg4[%c0_364, %c11_365] : memref<12x12xf32, #tpu.memory_space<smem>>
    %796 = vector.broadcast %795 : f32 to vector<16x128xf32>
    %797 = arith.mulf %25, %796 : vector<16x128xf32>
    %c1_366 = arith.constant 1 : index
    %c11_367 = arith.constant 11 : index
    %798 = memref.load %arg4[%c1_366, %c11_367] : memref<12x12xf32, #tpu.memory_space<smem>>
    %799 = vector.broadcast %798 : f32 to vector<16x128xf32>
    %800 = arith.mulf %40, %799 : vector<16x128xf32>
    %801 = arith.addf %797, %800 : vector<16x128xf32>
    %c2_368 = arith.constant 2 : index
    %c11_369 = arith.constant 11 : index
    %802 = memref.load %arg4[%c2_368, %c11_369] : memref<12x12xf32, #tpu.memory_space<smem>>
    %803 = vector.broadcast %802 : f32 to vector<16x128xf32>
    %804 = arith.mulf %55, %803 : vector<16x128xf32>
    %805 = arith.addf %801, %804 : vector<16x128xf32>
    %c3_370 = arith.constant 3 : index
    %c11_371 = arith.constant 11 : index
    %806 = memref.load %arg4[%c3_370, %c11_371] : memref<12x12xf32, #tpu.memory_space<smem>>
    %807 = vector.broadcast %806 : f32 to vector<16x128xf32>
    %808 = arith.mulf %70, %807 : vector<16x128xf32>
    %809 = arith.addf %805, %808 : vector<16x128xf32>
    %c4_372 = arith.constant 4 : index
    %c11_373 = arith.constant 11 : index
    %810 = memref.load %arg4[%c4_372, %c11_373] : memref<12x12xf32, #tpu.memory_space<smem>>
    %811 = vector.broadcast %810 : f32 to vector<16x128xf32>
    %812 = arith.mulf %85, %811 : vector<16x128xf32>
    %813 = arith.addf %809, %812 : vector<16x128xf32>
    %c5_374 = arith.constant 5 : index
    %c11_375 = arith.constant 11 : index
    %814 = memref.load %arg4[%c5_374, %c11_375] : memref<12x12xf32, #tpu.memory_space<smem>>
    %815 = vector.broadcast %814 : f32 to vector<16x128xf32>
    %816 = arith.mulf %100, %815 : vector<16x128xf32>
    %817 = arith.addf %813, %816 : vector<16x128xf32>
    %c6_376 = arith.constant 6 : index
    %c11_377 = arith.constant 11 : index
    %818 = memref.load %arg4[%c6_376, %c11_377] : memref<12x12xf32, #tpu.memory_space<smem>>
    %819 = vector.broadcast %818 : f32 to vector<16x128xf32>
    %820 = arith.mulf %115, %819 : vector<16x128xf32>
    %821 = arith.addf %817, %820 : vector<16x128xf32>
    %c7_378 = arith.constant 7 : index
    %c11_379 = arith.constant 11 : index
    %822 = memref.load %arg4[%c7_378, %c11_379] : memref<12x12xf32, #tpu.memory_space<smem>>
    %823 = vector.broadcast %822 : f32 to vector<16x128xf32>
    %824 = arith.mulf %130, %823 : vector<16x128xf32>
    %825 = arith.addf %821, %824 : vector<16x128xf32>
    %c8_380 = arith.constant 8 : index
    %c11_381 = arith.constant 11 : index
    %826 = memref.load %arg4[%c8_380, %c11_381] : memref<12x12xf32, #tpu.memory_space<smem>>
    %827 = vector.broadcast %826 : f32 to vector<16x128xf32>
    %828 = arith.mulf %145, %827 : vector<16x128xf32>
    %829 = arith.addf %825, %828 : vector<16x128xf32>
    %c9_382 = arith.constant 9 : index
    %c11_383 = arith.constant 11 : index
    %830 = memref.load %arg4[%c9_382, %c11_383] : memref<12x12xf32, #tpu.memory_space<smem>>
    %831 = vector.broadcast %830 : f32 to vector<16x128xf32>
    %832 = arith.mulf %160, %831 : vector<16x128xf32>
    %833 = arith.addf %829, %832 : vector<16x128xf32>
    %c10_384 = arith.constant 10 : index
    %c11_385 = arith.constant 11 : index
    %834 = memref.load %arg4[%c10_384, %c11_385] : memref<12x12xf32, #tpu.memory_space<smem>>
    %835 = vector.broadcast %834 : f32 to vector<16x128xf32>
    %836 = arith.mulf %175, %835 : vector<16x128xf32>
    %837 = arith.addf %833, %836 : vector<16x128xf32>
    %c11_386 = arith.constant 11 : index
    %c11_387 = arith.constant 11 : index
    %838 = memref.load %arg4[%c11_386, %c11_387] : memref<12x12xf32, #tpu.memory_space<smem>>
    %839 = vector.broadcast %838 : f32 to vector<16x128xf32>
    %840 = arith.mulf %190, %839 : vector<16x128xf32>
    %841 = arith.addf %837, %840 : vector<16x128xf32>
    %c11_388 = arith.constant 11 : index
    %842 = memref.load %arg5[%c11_388] : memref<12xf32, #tpu.memory_space<smem>>
    %843 = vector.broadcast %842 : f32 to vector<16x128xf32>
    %844 = arith.addf %841, %843 : vector<16x128xf32>
    %845 = math.tanh %844 : vector<16x128xf32>
    %c11_389 = arith.constant 11 : index
    %846 = memref.load %arg6[%c11_389] : memref<12xf32, #tpu.memory_space<smem>>
    %847 = vector.broadcast %846 : f32 to vector<16x128xf32>
    %848 = arith.mulf %845, %847 : vector<16x128xf32>
    %849 = arith.addf %794, %848 : vector<16x128xf32>
    %c0_390 = arith.constant 0 : index
    %850 = memref.load %arg7[%c0_390] : memref<1xf32, #tpu.memory_space<smem>>
    %851 = vector.broadcast %850 : f32 to vector<16x128xf32>
    %852 = arith.addf %849, %851 : vector<16x128xf32>
    %cst = arith.constant 0.000000e+00 : f32
    %853 = vector.broadcast %cst : f32 to vector<16x128xf32>
    %854 = arith.maximumf %852, %853 : vector<16x128xf32>
    %855 = arith.index_cast %1 : i32 to index
    %c0_391 = arith.constant 0 : index
    %856 = vector.load %arg8[%855, %c0_391] : memref<16x128xf32, #tpu.memory_space<vmem>>, vector<16x128xf32>
    tpu.vector_store %arg8[%855, %c0_391], %854 {strides = array<i32>} : memref<16x128xf32, #tpu.memory_space<vmem>>, vector<16x128xf32>,
    %c1_i32 = arith.constant 1 : i32
    return
  }
  func.func @transform_0(%arg0: i32) -> (i32, i32, i32) {
    %c0_i32 = arith.constant 0 : i32
    %c0_i32_0 = arith.constant 0 : i32
    %c0_i32_1 = arith.constant 0 : i32
    return %c0_i32, %arg0, %c0_i32_0 : i32, i32, i32
  }
  func.func @transform_1(%arg0: i32) -> (i32, i32) {
    %c0_i32 = arith.constant 0 : i32
    %c0_i32_0 = arith.constant 0 : i32
    %c0_i32_1 = arith.constant 0 : i32
    return %c0_i32, %c0_i32_0 : i32, i32
  }
  func.func @transform_2(%arg0: i32) -> i32 {
    %c0_i32 = arith.constant 0 : i32
    %c0_i32_0 = arith.constant 0 : i32
    return %c0_i32 : i32
  }
  func.func @transform_3(%arg0: i32) -> (i32, i32) {
    %c0_i32 = arith.constant 0 : i32
    %c0_i32_0 = arith.constant 0 : i32
    %c0_i32_1 = arith.constant 0 : i32
    return %c0_i32, %c0_i32_0 : i32, i32
  }
  func.func @transform_4(%arg0: i32) -> i32 {
    %c0_i32 = arith.constant 0 : i32
    %c0_i32_0 = arith.constant 0 : i32
    return %c0_i32 : i32
  }
  func.func @transform_5(%arg0: i32) -> i32 {
    %c0_i32 = arith.constant 0 : i32
    %c0_i32_0 = arith.constant 0 : i32
    return %c0_i32 : i32
  }
  func.func @transform_6(%arg0: i32) -> i32 {
    %c0_i32 = arith.constant 0 : i32
    %c0_i32_0 = arith.constant 0 : i32
    return %c0_i32 : i32
  }
  func.func @transform_7(%arg0: i32) -> (i32, i32) {
    %c0_i32 = arith.constant 0 : i32
    %c0_i32_0 = arith.constant 0 : i32
    return %arg0, %c0_i32 : i32, i32
  }
}

</mosaic_0001>

<bundles_post_ra>
// kernel: mlp_head_pallas.1
= control target key start
LH: loop header
LB: loop body
LE: loop exit
PB: predicated region body
PF: predicated region fallthrough
CT: control target
= control target key end

     0   :  { %13 = vsyncpa [#allocation4], 0  ;;  %s2988_s0 = inlined_call_operand.vmem [shape: f32[3,16,128], index: 0, kind: input, shape index: {}]   ;;  %s2989_s1 = inlined_call_operand.vmem [shape: f32[3,12], index: 1, kind: input, shape index: {}]   ;;  %s2990_s2 = inlined_call_operand.vmem [shape: f32[12], index: 2, kind: input, shape index: {}]   ;;  %s2991_s3 = inlined_call_operand.vmem [shape: f32[12,12], index: 3, kind: input, shape index: {}]   ;;  %s2992_s4 = inlined_call_operand.vmem [shape: f32[12], index: 4, kind: input, shape index: {}]   ;;  %s2993_s5 = inlined_call_operand.vmem [shape: f32[12], index: 5, kind: input, shape index: {}]   ;;  %s2994_s6 = inlined_call_operand.<no memory space> [shape: f32[1], index: 6, kind: input, shape index: {}]   ;;  %s2995_s7 = inlined_call_operand.vmem [shape: f32[16,128], index: 7, kind: output, shape index: {}]  }
   0x1   :  { %14 = vsyncpa [#allocation6], 0  ;;  %s34_s26 = sshll.u32 %s2990_s2, 4  ;;  %s35_s26 = int_to_ptr.vmem [resolvable:$true] %s34_s26 }
   0x2   :  { %15 = vsyncpa [#allocation9], 0  ;;  %s56_s29 = sshll.u32 %s2992_s4, 4  ;;  %s1679_s30 = scalar_lea.vmem %s35_s26, 16  ;;  %s57_s29 = int_to_ptr.vmem [resolvable:$true] %s56_s29 }
   0x3   :  { %p1680_p0 = scmp.ne.s32.totalorder %s35_s26, %s1679_s30  ;;  %p1684_p1 = scmp.lt.s32.totalorder %s35_s26, %s35_s26 }
   0x4   :  { %p1685_p2 = scmp.lt.s32.totalorder %s1679_s30, %s1679_s30 }
   0x6   :  { %p1686_p3 = por %p1685_p2, %p1684_p1 }
   0x8   :  { %p1687_p4 = pnand %p1686_p3, %p1680_p0 }
   0xa   :  { %1690 = shalt.err (!%p1687_p4)
}
   0xb   :  { %s1745_s8 = smov [#allocation5]   ;;  %s1691_s9 = scalar_lea.vmem %s57_s29, 16 }
   0xc   :  { %37 = dma.vmem_to_smem %s35_s26, 16, %s1745_s8, [#allocation6]  }
   0xd   :  { %p1692_p5 = scmp.ne.s32.totalorder %s57_s29, %s1691_s9  ;;  %p1696_p6 = scmp.lt.s32.totalorder %s57_s29, %s57_s29 }
   0xe   :  { %p1697_p7 = scmp.lt.s32.totalorder %s1691_s9, %s1691_s9 }
  0x10   :  { %p1698_p8 = por %p1697_p7, %p1696_p6 }
  0x12   :  { %p1699_p9 = pnand %p1698_p8, %p1692_p5 }
  0x14   :  { %1702 = shalt.err (!%p1699_p9)
}
  0x15   :  { %s1746_s2 = smov [#allocation8]   ;;  %s24_s11 = sshll.u32 %s2989_s1, 4  ;;  %s25_s11 = int_to_ptr.vmem [resolvable:$true] %s24_s11 }
  0x16   :  { %59 = dma.vmem_to_smem %s57_s29, 16, %s1746_s2, [#allocation9]  }
  0x17   :  { %s43_s14 = sshll.u32 %s2991_s3, 4  ;;  %s1703_s15 = scalar_lea.vmem %s25_s11, 64  ;;  %s44_s14 = int_to_ptr.vmem [resolvable:$true] %s43_s14 }
  0x18   :  { %p1704_p10 = scmp.ne.s32.totalorder %s25_s11, %s1703_s15  ;;  %p1708_p11 = scmp.lt.s32.totalorder %s25_s11, %s25_s11 }
  0x19   :  { %p1709_p12 = scmp.lt.s32.totalorder %s1703_s15, %s1703_s15 }
  0x1b   :  { %p1710_p13 = por %p1709_p12, %p1708_p11 }
  0x1d   :  { %p1711_p0 = pnand %p1710_p13, %p1704_p10 }
  0x1f   :  { %1714 = shalt.err (!%p1711_p0)
}
  0x20   :  { %s1747_s16 = smov [#allocation3]   ;;  %s1715_s17 = scalar_lea.vmem %s44_s14, 256 }
  0x21   :  { %27 = dma.vmem_to_smem %s25_s11, 64, %s1747_s16, [#allocation4]  }
  0x22   :  { %p1716_p1 = scmp.ne.s32.totalorder %s44_s14, %s1715_s17  ;;  %p1720_p2 = scmp.lt.s32.totalorder %s44_s14, %s44_s14 }
  0x23   :  { %p1721_p3 = scmp.lt.s32.totalorder %s1715_s17, %s1715_s17 }
  0x25   :  { %p1722_p4 = por %p1721_p3, %p1720_p2 }
  0x27   :  { %p1723_p5 = pnand %p1722_p4, %p1716_p1 }
  0x29   :  { %1726 = shalt.err (!%p1723_p5)
}
  0x2a   :  { %s1748_s1 = smov [#allocation7]   ;;  %s1749_s18 = smov 128  }
  0x2b   :  { %s1750_s3 = smov 8   ;;  %s66_s21 = sshll.u32 %s2993_s5, 4  ;;  %s67_s21 = int_to_ptr.vmem [resolvable:$true] %s66_s21 }
  0x2c   :  { %49 = dma.vmem_to_smem %s44_s14, 256, %s1748_s1, [#allocation6], %s1749_s18, %s1749_s18, %s1750_s3  }
  0x2d   :  { %s1727_s22 = scalar_lea.vmem %s67_s21, 16  ;;  %p1732_p7 = scmp.lt.s32.totalorder %s67_s21, %s67_s21 }
  0x2e   :  { %p1728_p6 = scmp.ne.s32.totalorder %s67_s21, %s1727_s22  ;;  %p1733_p8 = scmp.lt.s32.totalorder %s1727_s22, %s1727_s22 }
  0x30   :  { %p1734_p9 = por %p1733_p8, %p1732_p7 }
  0x32   :  { %p1735_p10 = pnand %p1734_p9, %p1728_p6 }
  0x34   :  { %1738 = shalt.err (!%p1735_p10)
}
  0x35   :  { %s1751_s23 = smov [#allocation10]  }
  0x36   :  { %69 = dma.vmem_to_smem %s67_s21, 16, %s1751_s23, [#allocation9]  }
  0x37   :  { %1739 = dma.done.wait [#allocation4], 64  }
  0x38   :  { %1740 = vsyncadd [#allocation4], 4294967232 }
  0x39   :  { %1741 = dma.done.wait [#allocation6], 272  }
  0x3a   :  { %1742 = vsyncadd [#allocation6], 4294967024 }
  0x3b   :  { %1743 = dma.done.wait [#allocation9], 32  }
  0x3c   :  { %1744 = vsyncadd [#allocation9], 4294967264 }
  0x3d   :  { %87 = sfence }
  0x3e   :  { %s98_s24 = sld [smem:[#allocation3]]  ;;  %s1367_s27 = sld [smem:[#allocation3 + $0x1]]  ;;  %v1814_v0 = vld [vmem:[%s2988_s0] sm:$0xff]  ;;  %v1819_v1 = vld [vmem:[%s2988_s0 + $0x8] sm:$0xff]  ;;  %v1826_v2 = vld [vmem:[%s2988_s0 + $0x10] sm:$0xff] }
  0x3f   :  { %s1365_s25 = sld [smem:[#allocation3 + $0x80]]  ;;  %s1809_s28 = sld [smem:[#allocation3 + $0x81]]  ;;  %v1831_v3 = vld [vmem:[%s2988_s0 + $0x18] sm:$0xff]  ;;  %v1840_v4 = vld [vmem:[%s2988_s0 + $0x20] sm:$0xff]  ;;  %v1845_v5 = vld [vmem:[%s2988_s0 + $0x28] sm:$0xff] }
  0x40   :  { %s1366_s5 = sld [smem:[#allocation3 + $0x100]]  ;;  %s1821_s2 = sld [smem:[#allocation3 + $0x101]] }
  0x41   :  { %s1807_s26 = sld [smem:[#allocation5]]  ;;  %s1833_s13 = sld [smem:[#allocation3 + $0x2]] }
  0x42   :  { %s1835_s14 = sld [smem:[#allocation3 + $0x82]]  ;;  %s1853_s3 = sld [smem:[#allocation3 + $0x3]] }
  0x43   :  { %s1851_s18 = sld [smem:[#allocation3 + $0x102]]  ;;  %s1858_s0 = sld [smem:[#allocation5 + $0x1]] }
  0x44   :  { %v99_v6 = vstv %s98_s24  ;;  %v121_v15 = vstv %s1367_s27  ;;  %s1860_s19 = sld [smem:[#allocation5 + $0x2]]  ;;  %s1868_s20 = sld [smem:[#allocation3 + $0x83]] }
  0x45   :  { %v100_v7 = vmul.f32 %v99_v6, %v1814_v0  ;;  %v101_v8 = vmul.f32 %v99_v6, %v1819_v1  ;;  %v103_v9 = vstv %s1365_s25  ;;  %v125_v16 = vstv %s1809_s28  ;;  %s1870_s21 = sld [smem:[#allocation3 + $0x103]]  ;;  %s1880_s23 = sld [smem:[#allocation3 + $0x4]] }
  0x46   :  { %v104_v10 = vmul.f32 %v1826_v2, %v103_v9  ;;  %v105_v11 = vmul.f32 %v1831_v3, %v103_v9  ;;  %v109_v12 = vstv %s1366_s5  ;;  %v122_v19 = vmul.f32 %v121_v15, %v1814_v0  ;;  %s1878_s22 = sld [smem:[#allocation5 + $0x3]]  ;;  %s1884_s24 = sld [smem:[#allocation3 + $0x84]] }
  0x47   :  { %v110_v13 = vmul.f32 %v1840_v4, %v109_v12  ;;  %v111_v14 = vmul.f32 %v1845_v5, %v109_v12  ;;  %v123_v20 = vmul.f32 %v121_v15, %v1819_v1  ;;  %v115_v21 = vstv %s1807_s26  ;;  %s1890_s25 = sld [smem:[#allocation3 + $0x104]]  ;;  %s1898_s5 = sld [smem:[#allocation3 + $0x5]] }
  0x48   :  { %v106_v17 = vadd.f32 %v104_v10, %v100_v7  ;;  %v107_v18 = vadd.f32 %v105_v11, %v101_v8  ;;  %v126_v22 = vmul.f32 %v1826_v2, %v125_v16  ;;  %v127_v23 = vmul.f32 %v1831_v3, %v125_v16  ;;  %s1900_s26 = sld [smem:[#allocation3 + $0x85]]  ;;  %s1903_s27 = sld [smem:[#allocation5 + $0x4]] }
  0x49   :  { %v131_v24 = vstv %s1821_s2  ;;  %v143_v31 = vstv %s1833_s13  ;;  %v147_v32 = vstv %s1835_s14  ;;  %v153_v41 = vstv %s1851_s18  ;;  %s1910_s28 = sld [smem:[#allocation3 + $0x105]]  ;;  %s1912_s29 = sld [smem:[#allocation3 + $0x6]] }
  0x4a   :  { %v112_v25 = vadd.f32 %v110_v13, %v106_v17  ;;  %v113_v26 = vadd.f32 %v111_v14, %v107_v18  ;;  %v132_v27 = vmul.f32 %v1840_v4, %v131_v24  ;;  %v133_v28 = vmul.f32 %v1845_v5, %v131_v24  ;;  %s1919_s30 = sld [smem:[#allocation5 + $0x5]]  ;;  %s1922_s8 = sld [smem:[#allocation3 + $0x86]] }
  0x4b   :  { %v128_v29 = vadd.f32 %v126_v22, %v122_v19  ;;  %v129_v30 = vadd.f32 %v127_v23, %v123_v20  ;;  %v144_v34 = vmul.f32 %v143_v31, %v1814_v0  ;;  %v145_v35 = vmul.f32 %v143_v31, %v1819_v1  ;;  %s1924_s9 = sld [smem:[#allocation3 + $0x106]]  ;;  %s1932_s2 = sld [smem:[#allocation3 + $0x7]] }
  0x4c   :  { %v116_v33 = vadd.f32 %v115_v21, %v112_v25  ;;  %v117_v36 = vadd.f32 %v115_v21, %v113_v26  ;;  %v148_v37 = vmul.f32 %v1826_v2, %v147_v32  ;;  %v149_v38 = vmul.f32 %v1831_v3, %v147_v32  ;;  %s1941_s4 = sld [smem:[#allocation3 + $0x87]]  ;;  %s1947_s11 = sld [smem:[#allocation5 + $0x6]] }
  0x4d   :  { %v134_v39 = vadd.f32 %v132_v27, %v128_v29  ;;  %v135_v40 = vadd.f32 %v133_v28, %v129_v30  ;;  %v165_v42 = vstv %s1853_s3  ;;  %v137_v43 = vstv %s1858_s0  ;;  %s1943_s10 = sld [smem:[#allocation3 + $0x107]]  ;;  %s1956_s13 = sld [smem:[#allocation3 + $0x8]] }
  0x4e   :  { %1583 = vtanh.f32 %v116_v33  ;;  %v150_v44 = vadd.f32 %v148_v37, %v144_v34  ;;  %v159_v45 = vstv %s1860_s19  ;;  %v151_v46 = vadd.f32 %v149_v38, %v145_v35  ;;  %s1954_s12 = sld [smem:[#allocation5 + $0x7]]  ;;  %s1960_s14 = sld [smem:[#allocation3 + $0x88]] }
  0x4f   :  { %v154_v47 = vmul.f32 %v1840_v4, %v153_v41  ;;  %v155_v48 = vmul.f32 %v1845_v5, %v153_v41  ;;  %v166_v49 = vmul.f32 %v165_v42, %v1814_v0  ;;  %1585 = vtanh.f32 %v117_v36  ;;  %s1971_s15 = sld [smem:[#allocation3 + $0x108]]  ;;  %s1979_s16 = sld [smem:[#allocation3 + $0x9]] }
  0x50   :  { %v167_v50 = vmul.f32 %v165_v42, %v1819_v1  ;;  %v169_v51 = vstv %s1868_s20  ;;  %v175_v52 = vstv %s1870_s21  ;;  %v138_v53 = vadd.f32 %v137_v43, %v134_v39  ;;  %s1981_s17 = sld [smem:[#allocation3 + $0x89]]  ;;  %s1989_s1 = sld [smem:[#allocation5 + $0x8]] }
  0x51   :  { %v139_v54 = vadd.f32 %v137_v43, %v135_v40  ;;  %v156_v55 = vadd.f32 %v154_v47, %v150_v44  ;;  %v170_v56 = vmul.f32 %v1826_v2, %v169_v51  ;;  %v157_v57 = vadd.f32 %v155_v48, %v151_v46  ;;  %s1996_s18 = sld [smem:[#allocation3 + $0x109]]  ;;  %s1998_s3 = sld [smem:[#allocation3 + $0xa]] }
  0x52   :  { %v171_v58 = vmul.f32 %v1831_v3, %v169_v51  ;;  %v176_v59 = vmul.f32 %v1840_v4, %v175_v52  ;;  %v177_v60 = vmul.f32 %v1845_v5, %v175_v52  ;;  %v181_v63 = vstv %s1878_s22  ;;  %s2005_s0 = sld [smem:[#allocation5 + $0x9]]  ;;  %s2008_s19 = sld [smem:[#allocation3 + $0x8a]] }
  0x53   :  { %v160_v61 = vadd.f32 %v159_v45, %v156_v55  ;;  %v172_v62 = vadd.f32 %v170_v56, %v166_v49  ;;  %v187_v6 = vstv %s1880_s23  ;;  %v191_v10 = vstv %s1884_s24  ;;  %s2010_s20 = sld [smem:[#allocation3 + $0x10a]]  ;;  %s2018_s21 = sld [smem:[#allocation3 + $0xb]] }
  0x54   :  { %v173_v7 = vadd.f32 %v171_v58, %v167_v50  ;;  %v188_v8 = vmul.f32 %v187_v6, %v1814_v0  ;;  %v189_v9 = vmul.f32 %v187_v6, %v1819_v1  ;;  %1587 = vtanh.f32 %v138_v53  ;;  %s2029_s22 = sld [smem:[#allocation3 + $0x8b]]  ;;  %s2038_s24 = sld [smem:[#allocation5 + $0xa]] }
  0x55   :  { %v178_v11 = vadd.f32 %v176_v59, %v172_v62  ;;  %v192_v12 = vmul.f32 %v1826_v2, %v191_v10  ;;  %v193_v13 = vmul.f32 %v1831_v3, %v191_v10  ;;  %1589 = vtanh.f32 %v139_v54  ;;  %s2031_s23 = sld [smem:[#allocation3 + $0x10b]] }
  0x56   :  { %v161_v14 = vadd.f32 %v159_v45, %v157_v57  ;;  %v179_v15 = vadd.f32 %v177_v60, %v173_v7  ;;  %v197_v16 = vstv %s1890_s25  ;;  %1591 = vtanh.f32 %v160_v61  ;;  %s2043_s25 = sld [smem:[#allocation7]] }
  0x57   :  { %v182_v17 = vadd.f32 %v181_v63, %v178_v11  ;;  %v194_v18 = vadd.f32 %v192_v12, %v188_v8  ;;  %v195_v19 = vadd.f32 %v193_v13, %v189_v9  ;;  %v198_v20 = vmul.f32 %v1840_v4, %v197_v16 }
  0x58   :  { %v1927_v21 = vpop.eup %1583  ;;  %v199_v22 = vmul.f32 %v1845_v5, %v197_v16  ;;  %v209_v23 = vstv %s1898_s5  ;;  %v213_v24 = vstv %s1900_s26  ;;  %v203_v26 = vstv %s1903_s27  ;;  %s2047_s5 = sld [smem:[#allocation7 + $0x80]]  ;;  %s2052_s26 = sld [smem:[#allocation5 + $0xb]] }
  0x59   :  { %v200_v25 = vadd.f32 %v198_v20, %v194_v18  ;;  %v210_v27 = vmul.f32 %v209_v23, %v1814_v0  ;;  %v211_v28 = vmul.f32 %v209_v23, %v1819_v1  ;;  %v1937_v29 = vpop.eup %1585  ;;  %1593 = vtanh.f32 %v161_v14  ;;  %s2058_s27 = sld [smem:[#allocation7 + $0x100]] }
  0x5a   :  { %v201_v30 = vadd.f32 %v199_v22, %v195_v19  ;;  %v214_v31 = vmul.f32 %v1826_v2, %v213_v24  ;;  %v215_v32 = vmul.f32 %v1831_v3, %v213_v24  ;;  %v183_v33 = vadd.f32 %v181_v63, %v179_v15 }
  0x5b   :  { %1595 = vtanh.f32 %v182_v17  ;;  %v219_v34 = vstv %s1910_s28  ;;  %v231_v35 = vstv %s1912_s29  ;;  %v204_v36 = vadd.f32 %v203_v26, %v200_v25  ;;  %s2060_s28 = sld [smem:[#allocation7 + $0x180]] }
  0x5c   :  { %v216_v37 = vadd.f32 %v214_v31, %v210_v27  ;;  %v217_v38 = vadd.f32 %v215_v32, %v211_v28  ;;  %v220_v39 = vmul.f32 %v1840_v4, %v219_v34  ;;  %v221_v40 = vmul.f32 %v1845_v5, %v219_v34  ;;  %s2070_s29 = sld [smem:[#allocation7 + $0x200]] }
  0x5d   :  { %v225_v41 = vstv %s1919_s30  ;;  %v232_v42 = vmul.f32 %v231_v35, %v1814_v0  ;;  %v233_v43 = vmul.f32 %v231_v35, %v1819_v1  ;;  %v205_v44 = vadd.f32 %v203_v26, %v201_v30  ;;  %s2072_s30 = sld [smem:[#allocation7 + $0x280]] }
  0x5e   :  { %v222_v45 = vadd.f32 %v220_v39, %v216_v37  ;;  %v235_v46 = vstv %s1922_s8  ;;  %v241_v47 = vstv %s1924_s9  ;;  %v1962_v48 = vpop.eup %1587  ;;  %v223_v49 = vadd.f32 %v221_v40, %v217_v38  ;;  %s2081_s8 = sld [smem:[#allocation7 + $0x300]] }
  0x5f   :  { %v236_v50 = vmul.f32 %v1826_v2, %v235_v46  ;;  %v237_v51 = vmul.f32 %v1831_v3, %v235_v46  ;;  %v242_v52 = vmul.f32 %v1840_v4, %v241_v47  ;;  %v1967_v53 = vpop.eup %1589  ;;  %1597 = vtanh.f32 %v183_v33  ;;  %s2088_s9 = sld [smem:[#allocation7 + $0x380]] }
  0x60   :  { %v226_v54 = vadd.f32 %v225_v41, %v222_v45  ;;  %v243_v55 = vmul.f32 %v1845_v5, %v241_v47  ;;  %v253_v56 = vstv %s1932_s2  ;;  %1599 = vtanh.f32 %v204_v36  ;;  %v1974_v60 = vpop.eup %1591  ;;  %s2095_s2 = sld [smem:[#allocation7 + $0x400]] }
  0x61   :  { %v238_v57 = vadd.f32 %v236_v50, %v232_v42  ;;  %v239_v58 = vadd.f32 %v237_v51, %v233_v43  ;;  %v254_v59 = vmul.f32 %v253_v56, %v1814_v0  ;;  %1601 = vtanh.f32 %v205_v44 }
  0x62   :  { %v255_v61 = vmul.f32 %v253_v56, %v1819_v1  ;;  %v257_v62 = vstv %s1941_s4  ;;  %v263_v63 = vstv %s1943_s10  ;;  %v227_v6 = vadd.f32 %v225_v41, %v223_v49  ;;  %s2107_s4 = sld [smem:[#allocation7 + $0x480]]  ;;  %s2109_s10 = sld [smem:[#allocation7 + $0x1]] }
  0x63   :  { %v244_v7 = vadd.f32 %v242_v52, %v238_v57  ;;  %v247_v8 = vstv %s1947_s11  ;;  %v258_v9 = vmul.f32 %v1826_v2, %v257_v62  ;;  %v1985_v10 = vpop.eup %1593  ;;  %1603 = vtanh.f32 %v226_v54  ;;  %s2115_s11 = sld [smem:[#allocation7 + $0x81]] }
  0x64   :  { %v245_v11 = vadd.f32 %v243_v55, %v239_v58  ;;  %v259_v12 = vmul.f32 %v1831_v3, %v257_v62  ;;  %v264_v13 = vmul.f32 %v1840_v4, %v263_v63  ;;  %v265_v16 = vmul.f32 %v1845_v5, %v263_v63 }
  0x65   :  { %v1991_v14 = vpop.eup %1595  ;;  %v260_v15 = vadd.f32 %v258_v9, %v254_v59  ;;  %v269_v17 = vstv %s1954_s12  ;;  %v275_v18 = vstv %s1956_s13  ;;  %v279_v23 = vstv %s1960_s14  ;;  %s2119_s12 = sld [smem:[#allocation7 + $0x101]]  ;;  %s2126_s13 = sld [smem:[#allocation7 + $0x500]] }
  0x66   :  { %v261_v19 = vadd.f32 %v259_v12, %v255_v61  ;;  %v276_v20 = vmul.f32 %v275_v18, %v1814_v0  ;;  %v277_v22 = vmul.f32 %v275_v18, %v1819_v1  ;;  %v248_v24 = vadd.f32 %v247_v8, %v244_v7  ;;  %s2128_s14 = sld [smem:[#allocation7 + $0x181]] }
  0x67   :  { %v266_v25 = vadd.f32 %v264_v13, %v260_v15  ;;  %v280_v26 = vmul.f32 %v1826_v2, %v279_v23  ;;  %v281_v27 = vmul.f32 %v1831_v3, %v279_v23  ;;  %1605 = vtanh.f32 %v227_v6 }
  0x68   :  { %v249_v28 = vadd.f32 %v247_v8, %v245_v11  ;;  %v285_v30 = vstv %s1971_s15  ;;  %v267_v31 = vadd.f32 %v265_v16, %v261_v19  ;;  %v297_v38 = vstv %s1979_s16  ;;  %s2132_s15 = sld [smem:[#allocation7 + $0x201]] }
  0x69   :  { %v282_v32 = vadd.f32 %v280_v26, %v276_v20  ;;  %v283_v33 = vadd.f32 %v281_v27, %v277_v22  ;;  %v286_v34 = vmul.f32 %v1840_v4, %v285_v30  ;;  %v2013_v35 = vpop.eup %1597  ;;  %v270_v36 = vadd.f32 %v269_v17, %v266_v25  ;;  %s2134_s16 = sld [smem:[#allocation7 + $0x281]] }
  0x6a   :  { %v287_v37 = vmul.f32 %v1845_v5, %v285_v30  ;;  %v301_v39 = vstv %s1981_s17  ;;  %v2020_v40 = vpop.eup %1599  ;;  %1607 = vtanh.f32 %v248_v24  ;;  %v298_v42 = vmul.f32 %v297_v38, %v1814_v0  ;;  %s2146_s17 = sld [smem:[#allocation7 + $0x301]] }
  0x6b   :  { %v288_v41 = vadd.f32 %v286_v34, %v282_v32  ;;  %v299_v43 = vmul.f32 %v297_v38, %v1819_v1  ;;  %v2024_v44 = vpop.eup %1601  ;;  %v291_v46 = vstv %s1989_s1  ;;  %v302_v47 = vmul.f32 %v1826_v2, %v301_v39  ;;  %s2148_s1 = sld [smem:[#allocation7 + $0x580]] }
  0x6c   :  { %v289_v45 = vadd.f32 %v287_v37, %v283_v33  ;;  %v303_v49 = vmul.f32 %v1831_v3, %v301_v39  ;;  %1609 = vtanh.f32 %v249_v28  ;;  %v271_v50 = vadd.f32 %v269_v17, %v267_v31 }
  0x6d   :  { %v307_v51 = vstv %s1996_s18  ;;  %v319_v52 = vstv %s1998_s3  ;;  %v2035_v54 = vpop.eup %1603  ;;  %1611 = vtanh.f32 %v270_v36  ;;  %v304_v55 = vadd.f32 %v302_v47, %v298_v42  ;;  %s2160_s18 = sld [smem:[#allocation7 + $0x381]] }
  0x6e   :  { %v305_v56 = vadd.f32 %v303_v49, %v299_v43  ;;  %v308_v57 = vmul.f32 %v1840_v4, %v307_v51  ;;  %v292_v58 = vadd.f32 %v291_v46, %v288_v41  ;;  %v309_v59 = vmul.f32 %v1845_v5, %v307_v51  ;;  %s2172_s3 = sld [smem:[#allocation7 + $0x401]] }
  0x6f   :  { %v313_v61 = vstv %s2005_s0  ;;  %v320_v62 = vmul.f32 %v319_v52, %v1814_v0  ;;  %v293_v63 = vadd.f32 %v291_v46, %v289_v45  ;;  %v323_v7 = vstv %s2008_s19  ;;  %s2177_s0 = sld [smem:[#allocation8]]  ;;  %s2184_s19 = sld [smem:[#allocation7 + $0x481]] }
  0x70   :  { %v310_v6 = vadd.f32 %v308_v57, %v304_v55  ;;  %v329_v8 = vstv %s2010_s20  ;;  %v311_v9 = vadd.f32 %v309_v59, %v305_v56  ;;  %v321_v11 = vmul.f32 %v319_v52, %v1819_v1  ;;  %s2186_s20 = sld [smem:[#allocation7 + $0x2]] }
  0x71   :  { %v324_v12 = vmul.f32 %v1826_v2, %v323_v7  ;;  %v325_v13 = vmul.f32 %v1831_v3, %v323_v7  ;;  %v2054_v15 = vpop.eup %1605  ;;  %1613 = vtanh.f32 %v271_v50  ;;  %v330_v17 = vmul.f32 %v1840_v4, %v329_v8 }
  0x72   :  { %v314_v16 = vadd.f32 %v313_v61, %v310_v6  ;;  %v341_v18 = vstv %s2018_s21  ;;  %1615 = vtanh.f32 %v292_v58  ;;  %v345_v23 = vstv %s2029_s22  ;;  %s2189_s21 = sld [smem:[#allocation7 + $0x82]] }
  0x73   :  { %v326_v19 = vadd.f32 %v324_v12, %v320_v62  ;;  %v342_v20 = vmul.f32 %v341_v18, %v1814_v0  ;;  %1617 = vtanh.f32 %v293_v63  ;;  %v343_v22 = vmul.f32 %v341_v18, %v1819_v1  ;;  %s2191_s22 = sld [smem:[#allocation7 + $0x102]] }
  0x74   :  { %v351_v24 = vstv %s2031_s23  ;;  %v2066_v25 = vpop.eup %1607  ;;  %v315_v26 = vadd.f32 %v313_v61, %v311_v9  ;;  %v327_v27 = vadd.f32 %v325_v13, %v321_v11  ;;  %v331_v28 = vmul.f32 %v1845_v5, %v329_v8  ;;  %s2198_s23 = sld [smem:[#allocation7 + $0x182]] }
  0x75   :  { %v346_v30 = vmul.f32 %v1826_v2, %v345_v23  ;;  %1619 = vtanh.f32 %v314_v16  ;;  %v332_v0 = vadd.f32 %v330_v17, %v326_v19  ;;  %v335_v31 = vstv %s2038_s24  ;;  %s2200_s24 = sld [smem:[#allocation7 + $0x202]] }
  0x76   :  { %v347_v1 = vmul.f32 %v1831_v3, %v345_v23  ;;  %v2076_v32 = vpop.eup %1609  ;;  %v352_v34 = vmul.f32 %v1840_v4, %v351_v24  ;;  %v353_v36 = vmul.f32 %v1845_v5, %v351_v24  ;;  %v363_v2 = vstv %s2043_s25  ;;  %s2204_s25 = sld [smem:[#allocation7 + $0x501]] }
  0x77   :  { %v348_v33 = vadd.f32 %v346_v30, %v342_v20  ;;  %v2083_v37 = vpop.eup %1611  ;;  %v364_v39 = vmul.f32 %v1927_v21, %v363_v2  ;;  %v365_v3 = vmul.f32 %v1937_v29, %v363_v2  ;;  %v367_v41 = vstv %s2047_s5  ;;  %s2208_s5 = sld [smem:[#allocation7 + $0x282]] }
  0x78   :  { %v349_v38 = vadd.f32 %v347_v1, %v343_v22  ;;  %1621 = vtanh.f32 %v315_v26  ;;  %v333_v42 = vadd.f32 %v331_v28, %v327_v27  ;;  %v368_v4 = vmul.f32 %v1962_v48, %v367_v41 }
  0x79   :  { %v369_v5 = vmul.f32 %v1967_v53, %v367_v41  ;;  %v336_v43 = vadd.f32 %v335_v31, %v332_v0  ;;  %v357_v45 = vstv %s2052_s26  ;;  %v373_v46 = vstv %s2058_s27  ;;  %s2210_s26 = sld [smem:[#allocation7 + $0x302]]  ;;  %s2218_s27 = sld [smem:[#allocation7 + $0x581]] }
  0x7a   :  { %v379_v47 = vstv %s2060_s28  ;;  %v354_v49 = vadd.f32 %v352_v34, %v348_v33  ;;  %v370_v50 = vadd.f32 %v368_v4, %v364_v39  ;;  %v374_v52 = vmul.f32 %v1974_v60, %v373_v46  ;;  %s2227_s28 = sld [smem:[#allocation7 + $0x382]] }
  0x7b   :  { %v371_v51 = vadd.f32 %v369_v5, %v365_v3  ;;  %v2098_v55 = vpop.eup %1613  ;;  %v355_v56 = vadd.f32 %v353_v36, %v349_v38  ;;  %v375_v57 = vmul.f32 %v1985_v10, %v373_v46  ;;  %v380_v58 = vmul.f32 %v1991_v14, %v379_v47 }
  0x7c   :  { %v381_v59 = vmul.f32 %v2013_v35, %v379_v47  ;;  %v2103_v61 = vpop.eup %1615  ;;  %v337_v62 = vadd.f32 %v335_v31, %v333_v42  ;;  %v376_v63 = vadd.f32 %v374_v52, %v370_v50  ;;  %v385_v6 = vstv %s2070_s29  ;;  %s2231_s29 = sld [smem:[#allocation10]] }
  0x7d   :  { %v391_v7 = vstv %s2072_s30  ;;  %v2111_v8 = vpop.eup %1617  ;;  %1623 = vtanh.f32 %v336_v43  ;;  %v377_v9 = vadd.f32 %v375_v57, %v371_v51  ;;  %v386_v11 = vmul.f32 %v2020_v40, %v385_v6  ;;  %s2236_s30 = sld [smem:[#allocation7 + $0x402]] }
  0x7e   :  { %v387_v12 = vmul.f32 %v2024_v44, %v385_v6  ;;  %v358_v13 = vadd.f32 %v357_v45, %v354_v49  ;;  %v382_v16 = vadd.f32 %v380_v58, %v376_v63  ;;  %v392_v17 = vmul.f32 %v2035_v54, %v391_v7 }
  0x7f   :  { %v397_v18 = vstv %s2081_s8  ;;  %v2121_v19 = vpop.eup %1619  ;;  %v359_v20 = vadd.f32 %v357_v45, %v355_v56  ;;  %v383_v22 = vadd.f32 %v381_v59, %v377_v9  ;;  %v393_v23 = vmul.f32 %v2054_v15, %v391_v7  ;;  %s2240_s8 = sld [smem:[#allocation7 + $0x482]] }
  0x80   :  { %v403_v24 = vstv %s2088_s9  ;;  %v388_v26 = vadd.f32 %v386_v11, %v382_v16  ;;  %v398_v27 = vmul.f32 %v2066_v25, %v397_v18  ;;  %1625 = vtanh.f32 %v337_v62  ;;  %s2250_s9 = sld [smem:[#allocation7 + $0x3]] }
  0x81   :  { %v389_v28 = vadd.f32 %v387_v12, %v383_v22  ;;  %v399_v30 = vmul.f32 %v2076_v32, %v397_v18  ;;  %v409_v0 = vstv %s2095_s2  ;;  %1627 = vtanh.f32 %v358_v13  ;;  %s2252_s2 = sld [smem:[#allocation7 + $0x83]] }
  0x82   :  { %v2136_v31 = vpop.eup %1621  ;;  %v394_v1 = vadd.f32 %v392_v17, %v388_v26  ;;  %v404_v33 = vmul.f32 %v2083_v37, %v403_v24  ;;  %1629 = vtanh.f32 %v359_v20  ;;  %v405_v36 = vmul.f32 %v2098_v55, %v403_v24 }
  0x83   :  { %v395_v34 = vadd.f32 %v393_v23, %v389_v28  ;;  %v410_v38 = vmul.f32 %v2103_v61, %v409_v0  ;;  %v415_v39 = vstv %s2107_s4  ;;  %v443_v3 = vstv %s2109_s10  ;;  %s2257_s4 = sld [smem:[#allocation7 + $0x502]]  ;;  %s2261_s10 = sld [smem:[#allocation7 + $0x103]] }
  0x84   :  { %v400_v2 = vadd.f32 %v398_v27, %v394_v1  ;;  %v444_v42 = vmul.f32 %v1927_v21, %v443_v3  ;;  %v445_v4 = vmul.f32 %v1937_v29, %v443_v3  ;;  %v447_v5 = vstv %s2115_s11  ;;  %s2263_s11 = sld [smem:[#allocation7 + $0x183]] }
  0x85   :  { %v401_v41 = vadd.f32 %v399_v30, %v395_v34  ;;  %v448_v45 = vmul.f32 %v1962_v48, %v447_v5  ;;  %v449_v46 = vmul.f32 %v1967_v53, %v447_v5  ;;  %v453_v47 = vstv %s2119_s12  ;;  %s2274_s12 = sld [smem:[#allocation8 + $0x1]] }
  0x86   :  { %v406_v43 = vadd.f32 %v404_v33, %v400_v2  ;;  %v411_v50 = vmul.f32 %v2111_v8, %v409_v0  ;;  %v416_v51 = vmul.f32 %v2121_v19, %v415_v39  ;;  %v454_v52 = vmul.f32 %v1974_v60, %v453_v47 }
  0x87   :  { %v2153_v49 = vpop.eup %1623  ;;  %v455_v56 = vmul.f32 %v1985_v10, %v453_v47  ;;  %v407_v57 = vadd.f32 %v405_v36, %v401_v41  ;;  %v421_v58 = vstv %s2126_s13  ;;  %v450_v59 = vadd.f32 %v448_v45, %v444_v42  ;;  %s2277_s13 = sld [smem:[#allocation7 + $0x203]] }
  0x88   :  { %v451_v62 = vadd.f32 %v449_v46, %v445_v4  ;;  %v412_v63 = vadd.f32 %v410_v38, %v406_v43  ;;  %v459_v6 = vstv %s2128_s14  ;;  %v465_v7 = vstv %s2132_s15  ;;  %s2283_s14 = sld [smem:[#allocation7 + $0x582]]  ;;  %s2288_s15 = sld [smem:[#allocation7 + $0x283]] }
  0x89   :  { %v471_v9 = vstv %s2134_s16  ;;  %v456_v11 = vadd.f32 %v454_v52, %v450_v59  ;;  %v460_v13 = vmul.f32 %v1991_v14, %v459_v6  ;;  %v417_v17 = vmul.f32 %v2136_v31, %v415_v39  ;;  %s2298_s16 = sld [smem:[#allocation7 + $0x303]] }
  0x8a   :  { %v457_v12 = vadd.f32 %v455_v56, %v451_v62  ;;  %v2166_v16 = vpop.eup %1625  ;;  %v461_v18 = vmul.f32 %v2013_v35, %v459_v6  ;;  %v466_v20 = vmul.f32 %v2020_v40, %v465_v7  ;;  %v467_v22 = vmul.f32 %v2024_v44, %v465_v7 }
  0x8b   :  { %v2174_v23 = vpop.eup %1627  ;;  %v413_v24 = vadd.f32 %v411_v50, %v407_v57  ;;  %v422_v26 = vmul.f32 %v2153_v49, %v421_v58  ;;  %v462_v27 = vadd.f32 %v460_v13, %v456_v11  ;;  %v472_v28 = vmul.f32 %v2035_v54, %v471_v9 }
  0x8c   :  { %v2180_v30 = vpop.eup %1629  ;;  %v418_v0 = vadd.f32 %v416_v51, %v412_v63  ;;  %v463_v1 = vadd.f32 %v461_v18, %v457_v12  ;;  %v473_v33 = vmul.f32 %v2054_v15, %v471_v9  ;;  %v477_v34 = vstv %s2146_s17  ;;  %s2300_s17 = sld [smem:[#allocation7 + $0x383]] }
  0x8d   :  { %v427_v36 = vstv %s2148_s1  ;;  %v468_v2 = vadd.f32 %v466_v20, %v462_v27  ;;  %v478_v39 = vmul.f32 %v2066_v25, %v477_v34  ;;  %v419_v3 = vadd.f32 %v417_v17, %v413_v24  ;;  %s2308_s1 = sld [smem:[#allocation7 + $0x403]] }
  0x8e   :  { %v469_v38 = vadd.f32 %v467_v22, %v463_v1  ;;  %v423_v41 = vmul.f32 %v2166_v16, %v421_v58  ;;  %v483_v4 = vstv %s2160_s18  ;;  %v424_v5 = vadd.f32 %v422_v26, %v418_v0  ;;  %s2310_s18 = sld [smem:[#allocation10 + $0x1]] }
  0x8f   :  { %v474_v42 = vadd.f32 %v472_v28, %v468_v2  ;;  %v428_v43 = vmul.f32 %v2174_v23, %v427_v36  ;;  %v479_v46 = vmul.f32 %v2076_v32, %v477_v34  ;;  %v484_v50 = vmul.f32 %v2083_v37, %v483_v4 }
  0x90   :  { %v475_v45 = vadd.f32 %v473_v33, %v469_v38  ;;  %v489_v51 = vstv %s2172_s3  ;;  %v425_v52 = vadd.f32 %v423_v41, %v419_v3  ;;  %v429_v56 = vmul.f32 %v2180_v30, %v427_v36  ;;  %s2316_s3 = sld [smem:[#allocation8 + $0x2]] }
  0x91   :  { %v480_v47 = vadd.f32 %v478_v39, %v474_v42  ;;  %v433_v57 = vstv %s2177_s0  ;;  %v430_v58 = vadd.f32 %v428_v43, %v424_v5  ;;  %v485_v62 = vmul.f32 %v2098_v55, %v483_v4  ;;  %s2319_s0 = sld [smem:[#allocation7 + $0x483]] }
  0x92   :  { %v481_v59 = vadd.f32 %v479_v46, %v475_v45  ;;  %v495_v63 = vstv %s2184_s19  ;;  %v490_v6 = vmul.f32 %v2103_v61, %v489_v51  ;;  %v525_v7 = vstv %s2186_s20  ;;  %s2324_s19 = sld [smem:[#allocation7 + $0x503]]  ;;  %s2326_s20 = sld [smem:[#allocation7 + $0x4]] }
  0x93   :  { %v529_v9 = vstv %s2189_s21  ;;  %v535_v11 = vstv %s2191_s22  ;;  %v486_v12 = vadd.f32 %v484_v50, %v480_v47  ;;  %v526_v13 = vmul.f32 %v1927_v21, %v525_v7  ;;  %s2331_s21 = sld [smem:[#allocation7 + $0x84]] }
  0x94   :  { %v527_v17 = vmul.f32 %v1937_v29, %v525_v7  ;;  %v530_v18 = vmul.f32 %v1962_v48, %v529_v9  ;;  %v491_v20 = vmul.f32 %v2111_v8, %v489_v51  ;;  %v531_v22 = vmul.f32 %v1967_v53, %v529_v9  ;;  %s2336_s22 = sld [smem:[#allocation7 + $0x104]] }
  0x95   :  { %v536_v24 = vmul.f32 %v1974_v60, %v535_v11  ;;  %v537_v26 = vmul.f32 %v1985_v10, %v535_v11  ;;  %v487_v27 = vadd.f32 %v485_v62, %v481_v59  ;;  %v541_v0 = vstv %s2198_s23  ;;  %s2339_s23 = sld [smem:[#allocation7 + $0x184]] }
  0x96   :  { %v532_v28 = vadd.f32 %v530_v18, %v526_v13  ;;  %v547_v1 = vstv %s2200_s24  ;;  %v496_v33 = vmul.f32 %v2121_v19, %v495_v63  ;;  %v533_v34 = vadd.f32 %v531_v22, %v527_v17  ;;  %s2349_s24 = sld [smem:[#allocation7 + $0x204]] }
  0x97   :  { %v542_v36 = vmul.f32 %v1991_v14, %v541_v0  ;;  %v543_v2 = vmul.f32 %v2013_v35, %v541_v0  ;;  %v492_v38 = vadd.f32 %v490_v6, %v486_v12  ;;  %v501_v39 = vstv %s2204_s25  ;;  %s2353_s25 = sld [smem:[#allocation7 + $0x583]] }
  0x98   :  { %v538_v3 = vadd.f32 %v536_v24, %v532_v28  ;;  %v548_v41 = vmul.f32 %v2020_v40, %v547_v1  ;;  %v539_v42 = vadd.f32 %v537_v26, %v533_v34  ;;  %v549_v4 = vmul.f32 %v2024_v44, %v547_v1 }
  0x99   :  { %v553_v5 = vstv %s2208_s5  ;;  %v559_v43 = vstv %s2210_s26  ;;  %v493_v45 = vadd.f32 %v491_v20, %v487_v27  ;;  %v497_v46 = vmul.f32 %v2136_v31, %v495_v63  ;;  %s2359_s5 = sld [smem:[#allocation7 + $0x284]] }
  0x9a   :  { %v544_v47 = vadd.f32 %v542_v36, %v538_v3  ;;  %v554_v50 = vmul.f32 %v2035_v54, %v553_v5  ;;  %v431_v51 = vadd.f32 %v429_v56, %v425_v52  ;;  %v434_v59 = vadd.f32 %v433_v57, %v430_v58  ;;  %s2365_s26 = sld [smem:[#allocation7 + $0x304]] }
  0x9b   :  { %v545_v62 = vadd.f32 %v543_v2, %v539_v42  ;;  %v555_v6 = vmul.f32 %v2054_v15, %v553_v5  ;;  %v502_v7 = vmul.f32 %v2153_v49, %v501_v39  ;;  %v507_v9 = vstv %s2218_s27  ;;  %s2367_s27 = sld [smem:[#allocation7 + $0x384]] }
  0x9c   :  { %v550_v11 = vadd.f32 %v548_v41, %v544_v47  ;;  %v560_v63 = vmul.f32 %v2066_v25, %v559_v43  ;;  %v498_v52 = vadd.f32 %v496_v33, %v492_v38  ;;  %v561_v58 = vmul.f32 %v2076_v32, %v559_v43 }
  0x9d   :  { %v551_v56 = vadd.f32 %v549_v4, %v545_v62  ;;  %v565_v12 = vstv %s2227_s28  ;;  %v499_v13 = vadd.f32 %v497_v46, %v493_v45  ;;  %v503_v17 = vmul.f32 %v2166_v16, %v501_v39  ;;  %s2377_s28 = sld [smem:[#allocation7 + $0x404]] }
  0x9e   :  { %v556_v18 = vadd.f32 %v554_v50, %v550_v11  ;;  %v566_v20 = vmul.f32 %v2083_v37, %v565_v12  ;;  %v439_v22 = vstv %s2231_s29  ;;  %v567_v26 = vmul.f32 %v2098_v55, %v565_v12  ;;  %s2426_s29 = sld [smem:[#allocation7 + $0x205]] }
  0x9f   :  { %v557_v24 = vadd.f32 %v555_v6, %v551_v56  ;;  %v571_v27 = vstv %s2236_s30  ;;  %v2272_v28 = vadd.f32 %v433_v57, %v431_v51  ;;  %1631 = vtanh.f32 %v434_v59  ;;  %s2381_s30 = sld [smem:[#allocation7 + $0x484]] }
  0xa0   :  { %v562_v0 = vadd.f32 %v560_v63, %v556_v18  ;;  %v577_v1 = vstv %s2240_s8  ;;  %v504_v33 = vadd.f32 %v502_v7, %v498_v52  ;;  %v508_v34 = vmul.f32 %v2174_v23, %v507_v9  ;;  %s2384_s8 = sld [smem:[#allocation7 + $0x504]] }
  0xa1   :  { %v509_v36 = vmul.f32 %v2180_v30, %v507_v9  ;;  %v563_v2 = vadd.f32 %v561_v58, %v557_v24  ;;  %v505_v38 = vadd.f32 %v503_v17, %v499_v13  ;;  %v572_v39 = vmul.f32 %v2103_v61, %v571_v27 }
  0xa2   :  { %v568_v57 = vadd.f32 %v566_v20, %v562_v0  ;;  %v573_v3 = vmul.f32 %v2111_v8, %v571_v27  ;;  %v578_v42 = vmul.f32 %v2121_v19, %v577_v1  ;;  %v607_v4 = vstv %s2250_s9  ;;  %s2387_s9 = sld [smem:[#allocation8 + $0x3]] }
  0xa3   :  { %v569_v41 = vadd.f32 %v567_v26, %v563_v2  ;;  %v611_v5 = vstv %s2252_s2  ;;  %v579_v43 = vmul.f32 %v2136_v31, %v577_v1  ;;  %v608_v45 = vmul.f32 %v1927_v21, %v607_v4  ;;  %s2394_s2 = sld [smem:[#allocation7 + $0x584]] }
  0xa4   :  { %v609_v46 = vmul.f32 %v1937_v29, %v607_v4  ;;  %v612_v47 = vmul.f32 %v1962_v48, %v611_v5  ;;  %v583_v50 = vstv %s2257_s4  ;;  %v613_v51 = vmul.f32 %v1967_v53, %v611_v5  ;;  %s2400_s4 = sld [smem:[#allocation7 + $0x5]] }
  0xa5   :  { %v617_v59 = vstv %s2261_s10  ;;  %v623_v62 = vstv %s2263_s11  ;;  %v574_v6 = vadd.f32 %v572_v39, %v568_v57  ;;  %v575_v63 = vadd.f32 %v573_v3, %v569_v41  ;;  %s2402_s10 = sld [smem:[#allocation7 + $0x85]] }
  0xa6   :  { %v614_v7 = vadd.f32 %v612_v47, %v608_v45  ;;  %v618_v9 = vmul.f32 %v1974_v60, %v617_v59  ;;  %v619_v11 = vmul.f32 %v1985_v10, %v617_v59  ;;  %v615_v52 = vadd.f32 %v613_v51, %v609_v46  ;;  %s2409_s11 = sld [smem:[#allocation7 + $0x105]] }
  0xa7   :  { %v624_v56 = vmul.f32 %v1991_v14, %v623_v62  ;;  %v625_v58 = vmul.f32 %v2013_v35, %v623_v62  ;;  %v510_v12 = vadd.f32 %v508_v34, %v504_v33  ;;  %v513_v13 = vstv %s2274_s12  ;;  %s2411_s12 = sld [smem:[#allocation7 + $0x185]] }
  0xa8   :  { %v620_v17 = vadd.f32 %v618_v9, %v614_v7  ;;  %v629_v18 = vstv %s2277_s13  ;;  %v511_v20 = vadd.f32 %v509_v36, %v505_v38  ;;  %v584_v24 = vmul.f32 %v2153_v49, %v583_v50  ;;  %s2419_s13 = sld [smem:[#allocation10 + $0x2]] }
  0xa9   :  { %v621_v26 = vadd.f32 %v619_v11, %v615_v52  ;;  %v630_v27 = vmul.f32 %v2020_v40, %v629_v18  ;;  %v1632_v0 = vpop.eup %1631  ;;  %v585_v1 = vmul.f32 %v2166_v16, %v583_v50  ;;  %v589_v2 = vstv %s2283_s14  ;;  %s2436_s14 = sld [smem:[#allocation7 + $0x285]] }
  0xaa   :  { %v626_v33 = vadd.f32 %v624_v56, %v620_v17  ;;  %v631_v34 = vmul.f32 %v2024_v44, %v629_v18  ;;  %v580_v36 = vadd.f32 %v578_v42, %v574_v6  ;;  %v581_v38 = vadd.f32 %v579_v43, %v575_v63 }
  0xab   :  { %v627_v57 = vadd.f32 %v625_v58, %v621_v26  ;;  %v635_v39 = vstv %s2288_s15  ;;  %v514_v3 = vadd.f32 %v513_v13, %v510_v12  ;;  %v590_v45 = vmul.f32 %v2174_v23, %v589_v2  ;;  %s2438_s15 = sld [smem:[#allocation8 + $0x4]] }
  0xac   :  { %v632_v41 = vadd.f32 %v630_v27, %v626_v33  ;;  %v636_v4 = vmul.f32 %v2035_v54, %v635_v39  ;;  %v637_v5 = vmul.f32 %v2054_v15, %v635_v39  ;;  %v641_v47 = vstv %s2298_s16  ;;  %s2446_s16 = sld [smem:[#allocation7 + $0x305]] }
  0xad   :  { %v633_v46 = vadd.f32 %v631_v34, %v627_v57  ;;  %v647_v50 = vstv %s2300_s17  ;;  %v591_v42 = vmul.f32 %v2180_v30, %v589_v2  ;;  %v642_v51 = vmul.f32 %v2066_v25, %v641_v47  ;;  %s2448_s17 = sld [smem:[#allocation7 + $0x385]] }
  0xae   :  { %v638_v43 = vadd.f32 %v636_v4, %v632_v41  ;;  %v643_v59 = vmul.f32 %v2076_v32, %v641_v47  ;;  %v586_v62 = vadd.f32 %v584_v24, %v580_v36  ;;  %v587_v6 = vadd.f32 %v585_v1, %v581_v38 }
  0xaf   :  { %v639_v7 = vadd.f32 %v637_v5, %v633_v46  ;;  %v648_v9 = vmul.f32 %v2083_v37, %v647_v50  ;;  %v649_v63 = vmul.f32 %v2098_v55, %v647_v50  ;;  %v653_v52 = vstv %s2308_s1  ;;  %s2461_s1 = sld [smem:[#allocation10 + $0x3]] }
  0xb0   :  { %v644_v11 = vadd.f32 %v642_v51, %v638_v43  ;;  %1633 = vtanh.f32 %v2272_v28  ;;  %v2346_v56 = vmul.f32 %v1632_v0, %v439_v22  ;;  %v519_v58 = vstv %s2310_s18  ;;  %s2494_s18 = sld [smem:[#allocation7 + $0x186]] }
  0xb1   :  { %v645_v12 = vadd.f32 %v643_v59, %v639_v7  ;;  %v515_v17 = vadd.f32 %v513_v13, %v511_v20  ;;  %1635 = vtanh.f32 %v514_v3  ;;  %v595_v18 = vstv %s2316_s3  ;;  %s2464_s3 = sld [smem:[#allocation7 + $0x405]] }
  0xb2   :  { %v659_v24 = vstv %s2319_s0  ;;  %v592_v26 = vadd.f32 %v590_v45, %v586_v62  ;;  %v593_v27 = vadd.f32 %v591_v42, %v587_v6  ;;  %v650_v1 = vadd.f32 %v648_v9, %v644_v11  ;;  %s2470_s0 = sld [smem:[#allocation7 + $0x485]] }
  0xb3   :  { %v654_v28 = vmul.f32 %v2103_v61, %v653_v52  ;;  %v651_v0 = vadd.f32 %v649_v63, %v645_v12  ;;  %v655_v2 = vmul.f32 %v2111_v8, %v653_v52  ;;  %v665_v33 = vstv %s2324_s19  ;;  %s2475_s19 = sld [smem:[#allocation7 + $0x505]] }
  0xb4   :  { %v689_v34 = vstv %s2326_s20  ;;  %v660_v13 = vmul.f32 %v2121_v19, %v659_v24  ;;  %v693_v38 = vstv %s2331_s21  ;;  %v661_v57 = vmul.f32 %v2136_v31, %v659_v24  ;;  %s2477_s20 = sld [smem:[#allocation7 + $0x6]] }
  0xb5   :  { %v690_v20 = vmul.f32 %v1927_v21, %v689_v34  ;;  %v691_v36 = vmul.f32 %v1937_v29, %v689_v34  ;;  %v694_v39 = vmul.f32 %v1962_v48, %v693_v38  ;;  %v695_v3 = vmul.f32 %v1967_v53, %v693_v38  ;;  %s2483_s21 = sld [smem:[#allocation7 + $0x86]] }
  0xb6   :  { %v699_v41 = vstv %s2336_s22  ;;  %v656_v4 = vadd.f32 %v654_v28, %v650_v1  ;;  %v705_v46 = vstv %s2339_s23  ;;  %v657_v47 = vadd.f32 %v655_v2, %v651_v0  ;;  %s2489_s22 = sld [smem:[#allocation7 + $0x106]] }
  0xb7   :  { %v700_v5 = vmul.f32 %v1974_v60, %v699_v41  ;;  %v701_v45 = vmul.f32 %v1985_v10, %v699_v41  ;;  %v696_v50 = vadd.f32 %v694_v39, %v690_v20  ;;  %v697_v42 = vadd.f32 %v695_v3, %v691_v36  ;;  %s2501_s23 = sld [smem:[#allocation7 + $0x206]] }
  0xb8   :  { %v706_v43 = vmul.f32 %v1991_v14, %v705_v46  ;;  %1637 = vtanh.f32 %v515_v17  ;;  %v596_v51 = vadd.f32 %v595_v18, %v592_v26  ;;  %v707_v59 = vmul.f32 %v2013_v35, %v705_v46 }
  0xb9   :  { %v711_v62 = vstv %s2349_s24  ;;  %v597_v6 = vadd.f32 %v595_v18, %v593_v27  ;;  %v671_v7 = vstv %s2353_s25  ;;  %v702_v9 = vadd.f32 %v700_v5, %v696_v50  ;;  %s2508_s24 = sld [smem:[#allocation7 + $0x585]]  ;;  %s2517_s25 = sld [smem:[#allocation7 + $0x286]] }
  0xba   :  { %v703_v11 = vadd.f32 %v701_v45, %v697_v42  ;;  %v1634_v63 = vpop.eup %1633  ;;  %v662_v52 = vadd.f32 %v660_v13, %v656_v4  ;;  %v666_v12 = vmul.f32 %v2153_v49, %v665_v33  ;;  %v712_v17 = vmul.f32 %v2020_v40, %v711_v62 }
  0xbb   :  { %v713_v24 = vmul.f32 %v2024_v44, %v711_v62  ;;  %v2391_v26 = vpop.eup %1635  ;;  %v663_v18 = vadd.f32 %v661_v57, %v657_v47  ;;  %v667_v27 = vmul.f32 %v2166_v16, %v665_v33  ;;  %v708_v1 = vadd.f32 %v706_v43, %v702_v9 }
  0xbc   :  { %v709_v28 = vadd.f32 %v707_v59, %v703_v11  ;;  %v672_v0 = vmul.f32 %v2174_v23, %v671_v7  ;;  %v717_v2 = vstv %s2359_s5  ;;  %v723_v34 = vstv %s2365_s26  ;;  %s2519_s5 = sld [smem:[#allocation7 + $0x306]]  ;;  %s2525_s26 = sld [smem:[#allocation10 + $0x4]] }
  0xbd   :  { %v729_v13 = vstv %s2367_s27  ;;  %v673_v20 = vmul.f32 %v2180_v30, %v671_v7  ;;  %v714_v36 = vadd.f32 %v712_v17, %v708_v1  ;;  %v718_v33 = vmul.f32 %v2035_v54, %v717_v2  ;;  %s2533_s27 = sld [smem:[#allocation7 + $0x386]] }
  0xbe   :  { %v715_v38 = vadd.f32 %v713_v24, %v709_v28  ;;  %v668_v57 = vadd.f32 %v666_v12, %v662_v52  ;;  %v719_v39 = vmul.f32 %v2054_v15, %v717_v2  ;;  %v724_v3 = vmul.f32 %v2066_v25, %v723_v34 }
  0xbf   :  { %v725_v41 = vmul.f32 %v2076_v32, %v723_v34  ;;  %v669_v4 = vadd.f32 %v667_v27, %v663_v18  ;;  %v720_v5 = vadd.f32 %v718_v33, %v714_v36  ;;  %v730_v45 = vmul.f32 %v2083_v37, %v729_v13 }
  0xc0   :  { %v735_v46 = vstv %s2377_s28  ;;  %v2417_v47 = vmul.f32 %v1634_v63, %v439_v22  ;;  %1639 = vtanh.f32 %v596_v51  ;;  %v721_v50 = vadd.f32 %v719_v39, %v715_v38  ;;  %s2538_s28 = sld [smem:[#allocation8 + $0x5]] }
  0xc1   :  { %v741_v42 = vstv %s2381_s30  ;;  %1641 = vtanh.f32 %v597_v6  ;;  %v726_v43 = vadd.f32 %v724_v3, %v720_v5  ;;  %v736_v59 = vmul.f32 %v2103_v61, %v735_v46  ;;  %s2542_s30 = sld [smem:[#allocation7 + $0x406]] }
  0xc2   :  { %v747_v62 = vstv %s2384_s8  ;;  %v1638_v7 = vpop.eup %1637  ;;  %v674_v9 = vadd.f32 %v672_v0, %v668_v57  ;;  %v677_v11 = vstv %s2387_s9  ;;  %v727_v52 = vadd.f32 %v725_v41, %v721_v50  ;;  %s2546_s8 = sld [smem:[#allocation7 + $0x7]] }
  0xc3   :  { %v731_v22 = vmul.f32 %v2098_v55, %v729_v13  ;;  %v675_v51 = vadd.f32 %v673_v20, %v669_v4  ;;  %v732_v63 = vadd.f32 %v730_v45, %v726_v43  ;;  %v737_v6 = vmul.f32 %v2111_v8, %v735_v46  ;;  %s2548_s9 = sld [smem:[#allocation7 + $0x87]] }
  0xc4   :  { %v742_v12 = vmul.f32 %v2121_v19, %v741_v42  ;;  %v748_v17 = vmul.f32 %v2153_v49, %v747_v62  ;;  %v753_v24 = vstv %s2394_s2  ;;  %v771_v18 = vstv %s2400_s4  ;;  %s2553_s2 = sld [smem:[#allocation7 + $0x486]]  ;;  %s2559_s4 = sld [smem:[#allocation7 + $0x107]] }
  0xc5   :  { %v775_v27 = vstv %s2402_s10  ;;  %v738_v1 = vadd.f32 %v736_v59, %v732_v63  ;;  %v772_v28 = vmul.f32 %v1927_v21, %v771_v18  ;;  %v773_v0 = vmul.f32 %v1937_v29, %v771_v18  ;;  %s2561_s10 = sld [smem:[#allocation7 + $0x187]] }
  0xc6   :  { %v776_v2 = vmul.f32 %v1962_v48, %v775_v27  ;;  %v733_v34 = vadd.f32 %v731_v22, %v727_v52  ;;  %v777_v13 = vmul.f32 %v1967_v53, %v775_v27  ;;  %v781_v20 = vstv %s2409_s11  ;;  %s2577_s11 = sld [smem:[#allocation7 + $0x207]] }
  0xc7   :  { %v787_v36 = vstv %s2411_s12  ;;  %v744_v38 = vadd.f32 %v742_v12, %v738_v1  ;;  %v782_v57 = vmul.f32 %v1974_v60, %v781_v20  ;;  %v783_v39 = vmul.f32 %v1985_v10, %v781_v20  ;;  %s2580_s12 = sld [smem:[#allocation7 + $0x506]] }
  0xc8   :  { %v778_v33 = vadd.f32 %v776_v2, %v772_v28  ;;  %v601_v3 = vstv %s2419_s13  ;;  %v754_v41 = vmul.f32 %v2174_v23, %v753_v24  ;;  %v779_v4 = vadd.f32 %v777_v13, %v773_v0  ;;  %s2585_s13 = sld [smem:[#allocation7 + $0x287]] }
  0xc9   :  { %v788_v5 = vmul.f32 %v1991_v14, %v787_v36  ;;  %v520_v45 = vmul.f32 %v2391_v26, %v519_v58  ;;  %v750_v46 = vadd.f32 %v748_v17, %v744_v38  ;;  %v789_v43 = vmul.f32 %v2013_v35, %v787_v36 }
  0xca   :  { %v784_v50 = vadd.f32 %v782_v57, %v778_v33  ;;  %v1640_v59 = vpop.eup %1639  ;;  %v678_v52 = vadd.f32 %v677_v11, %v674_v9  ;;  %v679_v22 = vadd.f32 %v677_v11, %v675_v51  ;;  %v785_v63 = vadd.f32 %v783_v39, %v779_v4 }
  0xcb   :  { %v793_v12 = vstv %s2426_s29  ;;  %v1642_v18 = vpop.eup %1641  ;;  %v739_v27 = vadd.f32 %v737_v6, %v733_v34  ;;  %v743_v26 = vmul.f32 %v2136_v31, %v741_v42  ;;  %v756_v28 = vadd.f32 %v754_v41, %v750_v46  ;;  %s2595_s29 = sld [smem:[#allocation7 + $0x307]] }
  0xcc   :  { %v790_v17 = vadd.f32 %v788_v5, %v784_v50  ;;  %v794_v1 = vmul.f32 %v2020_v40, %v793_v12  ;;  %v791_v9 = vadd.f32 %v789_v43, %v785_v63  ;;  %v795_v11 = vmul.f32 %v2024_v44, %v793_v12 }
  0xcd   :  { %v799_v51 = vstv %s2436_s14  ;;  %v759_v0 = vstv %s2438_s15  ;;  %v521_v34 = vmul.f32 %v1638_v7, %v519_v58  ;;  %v805_v20 = vstv %s2446_s16  ;;  %s2597_s14 = sld [smem:[#allocation7 + $0x586]]  ;;  %s2603_s15 = sld [smem:[#allocation10 + $0x5]] }
  0xce   :  { %v796_v2 = vadd.f32 %v794_v1, %v790_v17  ;;  %v800_v6 = vmul.f32 %v2035_v54, %v799_v51  ;;  %v801_v42 = vmul.f32 %v2054_v15, %v799_v51  ;;  %v797_v13 = vadd.f32 %v795_v11, %v791_v9  ;;  %s2606_s16 = sld [smem:[#allocation7 + $0x387]] }
  0xcf   :  { %v811_v36 = vstv %s2448_s17  ;;  %v745_v38 = vadd.f32 %v743_v26, %v739_v27  ;;  %v749_v33 = vmul.f32 %v2166_v16, %v747_v62  ;;  %v806_v39 = vmul.f32 %v2066_v25, %v805_v20  ;;  %s2610_s17 = sld [smem:[#allocation8 + $0x6]] }
  0xd0   :  { %v802_v57 = vadd.f32 %v800_v6, %v796_v2  ;;  %1643 = vtanh.f32 %v678_v52  ;;  %v760_v58 = vadd.f32 %v759_v0, %v756_v28  ;;  %v803_v7 = vadd.f32 %v801_v42, %v797_v13 }
  0xd1   :  { %v807_v41 = vmul.f32 %v2076_v32, %v805_v20  ;;  %1645 = vtanh.f32 %v679_v22  ;;  %v812_v5 = vmul.f32 %v2083_v37, %v811_v36  ;;  %v522_v62 = vadd.f32 %v520_v45, %v2346_v56 }
  0xd2   :  { %v808_v4 = vadd.f32 %v806_v39, %v802_v57  ;;  %v523_v46 = vadd.f32 %v521_v34, %v2417_v47  ;;  %v683_v50 = vstv %s2461_s1  ;;  %v817_v43 = vstv %s2464_s3  ;;  %s2614_s1 = sld [smem:[#allocation10 + $0x6]]  ;;  %s2617_s3 = sld [smem:[#allocation7 + $0x407]] }
  0xd3   :  { %v602_v52 = vmul.f32 %v1640_v59, %v601_v3  ;;  %v603_v63 = vmul.f32 %v1642_v18, %v601_v3  ;;  %v751_v12 = vadd.f32 %v749_v33, %v745_v38  ;;  %v755_v22 = vmul.f32 %v2180_v30, %v753_v24 }
  0xd4   :  { %1647 = vtanh.f32 %v760_v58  ;;  %v809_v27 = vadd.f32 %v807_v41, %v803_v7  ;;  %v813_v26 = vmul.f32 %v2098_v55, %v811_v36  ;;  %v823_v56 = vstv %s2470_s0  ;;  %s2623_s0 = sld [smem:[#allocation7 + $0x487]] }
  0xd5   :  { %v814_v47 = vadd.f32 %v812_v5, %v808_v4  ;;  %v818_v45 = vmul.f32 %v2103_v61, %v817_v43  ;;  %v829_v17 = vstv %s2475_s19  ;;  %v853_v59 = vstv %s2477_s20  ;;  %s2625_s19 = sld [smem:[#allocation7 + $0x8]] }
  0xd6   :  { %v819_v3 = vmul.f32 %v2111_v8, %v817_v43  ;;  %v854_v18 = vmul.f32 %v1927_v21, %v853_v59  ;;  %v855_v24 = vmul.f32 %v1937_v29, %v853_v59  ;;  %v857_v1 = vstv %s2483_s21  ;;  %s2630_s20 = sld [smem:[#allocation7 + $0x88]] }
  0xd7   :  { %v824_v28 = vmul.f32 %v2121_v19, %v823_v56  ;;  %v858_v9 = vmul.f32 %v1962_v48, %v857_v1  ;;  %v859_v11 = vmul.f32 %v1967_v53, %v857_v1  ;;  %v863_v51 = vstv %s2489_s22  ;;  %s2635_s21 = sld [smem:[#allocation7 + $0x108]] }
  0xd8   :  { %v815_v2 = vadd.f32 %v813_v26, %v809_v27  ;;  %v864_v6 = vmul.f32 %v1974_v60, %v863_v51  ;;  %v865_v42 = vmul.f32 %v1985_v10, %v863_v51  ;;  %v869_v34 = vstv %s2494_s18  ;;  %s2638_s22 = sld [smem:[#allocation7 + $0x188]] }
  0xd9   :  { %v820_v13 = vadd.f32 %v818_v45, %v814_v47  ;;  %v860_v20 = vadd.f32 %v858_v9, %v854_v18  ;;  %v861_v36 = vadd.f32 %v859_v11, %v855_v24  ;;  %v870_v38 = vmul.f32 %v1991_v14, %v869_v34  ;;  %s2651_s18 = sld [smem:[#allocation7 + $0x208]] }
  0xda   :  { %v1644_v33 = vpop.eup %1643  ;;  %v604_v57 = vadd.f32 %v602_v52, %v522_v62  ;;  %v605_v39 = vadd.f32 %v603_v63, %v523_v46  ;;  %v871_v58 = vmul.f32 %v2013_v35, %v869_v34  ;;  %v875_v7 = vstv %s2501_s23  ;;  %s2657_s23 = sld [smem:[#allocation7 + $0x507]] }
  0xdb   :  { %v1646_v41 = vpop.eup %1645  ;;  %v757_v4 = vadd.f32 %v755_v22, %v751_v12  ;;  %v825_v5 = vmul.f32 %v2136_v31, %v823_v56  ;;  %v866_v43 = vadd.f32 %v864_v6, %v860_v20  ;;  %v867_v27 = vadd.f32 %v865_v42, %v861_v36 }
  0xdc   :  { %v830_v26 = vmul.f32 %v2153_v49, %v829_v17  ;;  %v835_v47 = vstv %s2508_s24  ;;  %v876_v62 = vmul.f32 %v2020_v40, %v875_v7  ;;  %v877_v46 = vmul.f32 %v2024_v44, %v875_v7  ;;  %s2667_s24 = sld [smem:[#allocation7 + $0x288]] }
  0xdd   :  { %v821_v52 = vadd.f32 %v819_v3, %v815_v2  ;;  %v826_v63 = vadd.f32 %v824_v28, %v820_v13  ;;  %v872_v12 = vadd.f32 %v870_v38, %v866_v43  ;;  %v873_v22 = vadd.f32 %v871_v58, %v867_v27 }
  0xde   :  { %v1648_v56 = vpop.eup %1647  ;;  %v684_v45 = vmul.f32 %v1644_v33, %v683_v50  ;;  %v685_v59 = vmul.f32 %v1646_v41, %v683_v50  ;;  %v881_v18 = vstv %s2517_s25  ;;  %v887_v24 = vstv %s2519_s5  ;;  %s2669_s25 = sld [smem:[#allocation7 + $0x308]] }
  0xdf   :  { %v761_v1 = vadd.f32 %v759_v0, %v757_v4  ;;  %v878_v9 = vadd.f32 %v876_v62, %v872_v12  ;;  %v879_v11 = vadd.f32 %v877_v46, %v873_v22  ;;  %v882_v3 = vmul.f32 %v2035_v54, %v881_v18  ;;  %s2675_s5 = sld [smem:[#allocation7 + $0x388]] }
  0xe0   :  { %v765_v28 = vstv %s2525_s26  ;;  %v831_v51 = vmul.f32 %v2166_v16, %v829_v17  ;;  %v836_v50 = vmul.f32 %v2174_v23, %v835_v47  ;;  %v883_v2 = vmul.f32 %v2054_v15, %v881_v18  ;;  %s2680_s26 = sld [smem:[#allocation7 + $0x587]] }
  0xe1   :  { %v827_v0 = vadd.f32 %v825_v5, %v821_v52  ;;  %v832_v6 = vadd.f32 %v830_v26, %v826_v63  ;;  %v884_v42 = vadd.f32 %v882_v3, %v878_v9  ;;  %v888_v34 = vmul.f32 %v2066_v25, %v887_v24 }
  0xe2   :  { %v885_v13 = vadd.f32 %v883_v2, %v879_v11  ;;  %v889_v20 = vmul.f32 %v2076_v32, %v887_v24  ;;  %v893_v36 = vstv %s2533_s27  ;;  %v2566_v17 = vadd.f32 %v684_v45, %v604_v57  ;;  %s2689_s27 = sld [smem:[#allocation7 + $0x408]] }
  0xe3   :  { %v2568_v38 = vadd.f32 %v685_v59, %v605_v39  ;;  %1649 = vtanh.f32 %v761_v1  ;;  %v2572_v33 = vmul.f32 %v1648_v56, %v765_v28  ;;  %v837_v58 = vmul.f32 %v2180_v30, %v835_v47 }
  0xe4   :  { %v841_v7 = vstv %s2538_s28  ;;  %v899_v41 = vstv %s2542_s30  ;;  %v833_v4 = vadd.f32 %v831_v51, %v827_v0  ;;  %v838_v5 = vadd.f32 %v836_v50, %v832_v6  ;;  %s2693_s28 = sld [smem:[#allocation8 + $0x7]]  ;;  %s2698_s30 = sld [smem:[#allocation7 + $0x488]] }
  0xe5   :  { %v890_v57 = vadd.f32 %v888_v34, %v884_v42  ;;  %v894_v43 = vmul.f32 %v2083_v37, %v893_v36  ;;  %v891_v39 = vadd.f32 %v889_v20, %v885_v13  ;;  %v895_v27 = vmul.f32 %v2098_v55, %v893_v36 }
  0xe6   :  { %v935_v26 = vstv %s2546_s8  ;;  %v939_v62 = vstv %s2548_s9  ;;  %v900_v47 = vmul.f32 %v2103_v61, %v899_v41  ;;  %v905_v12 = vstv %s2553_s2  ;;  %s2705_s8 = sld [smem:[#allocation7 + $0x9]] }
  0xe7   :  { %v936_v46 = vmul.f32 %v1927_v21, %v935_v26  ;;  %v937_v52 = vmul.f32 %v1937_v29, %v935_v26  ;;  %v940_v63 = vmul.f32 %v1962_v48, %v939_v62  ;;  %v941_v22 = vmul.f32 %v1967_v53, %v939_v62  ;;  %s2707_s9 = sld [smem:[#allocation7 + $0x89]] }
  0xe8   :  { %v945_v56 = vstv %s2559_s4  ;;  %v951_v45 = vstv %s2561_s10  ;;  %v896_v59 = vadd.f32 %v894_v43, %v890_v57  ;;  %v897_v9 = vadd.f32 %v895_v27, %v891_v39  ;;  %s2714_s2 = sld [smem:[#allocation7 + $0x109]]  ;;  %s2720_s10 = sld [smem:[#allocation7 + $0x508]] }
  0xe9   :  { %v942_v18 = vadd.f32 %v940_v63, %v936_v46  ;;  %v946_v24 = vmul.f32 %v1974_v60, %v945_v56  ;;  %v947_v1 = vmul.f32 %v1985_v10, %v945_v56  ;;  %v901_v11 = vmul.f32 %v2111_v8, %v899_v41  ;;  %s2716_s4 = sld [smem:[#allocation7 + $0x189]] }
  0xea   :  { %v943_v3 = vadd.f32 %v941_v22, %v937_v52  ;;  %v952_v51 = vmul.f32 %v1991_v14, %v951_v45  ;;  %v839_v50 = vadd.f32 %v837_v58, %v833_v4  ;;  %v842_v2 = vadd.f32 %v841_v7, %v838_v5 }
  0xeb   :  { %v948_v0 = vadd.f32 %v946_v24, %v942_v18  ;;  %v953_v6 = vmul.f32 %v2013_v35, %v951_v45  ;;  %v906_v42 = vmul.f32 %v2121_v19, %v905_v12  ;;  %v907_v34 = vmul.f32 %v2136_v31, %v905_v12 }
  0xec   :  { %v949_v13 = vadd.f32 %v947_v1, %v943_v3  ;;  %v957_v20 = vstv %s2577_s11  ;;  %v902_v41 = vadd.f32 %v900_v47, %v896_v59  ;;  %v911_v58 = vstv %s2580_s12  ;;  %s2735_s11 = sld [smem:[#allocation7 + $0x209]]  ;;  %s2740_s12 = sld [smem:[#allocation7 + $0x588]] }
  0xed   :  { %v1650_v36 = vpop.eup %1649  ;;  %v954_v4 = vadd.f32 %v952_v51, %v948_v0  ;;  %v958_v5 = vmul.f32 %v2020_v40, %v957_v20  ;;  %v903_v57 = vadd.f32 %v901_v11, %v897_v9  ;;  %v959_v39 = vmul.f32 %v2024_v44, %v957_v20 }
  0xee   :  { %v955_v43 = vadd.f32 %v953_v6, %v949_v13  ;;  %v963_v27 = vstv %s2585_s13  ;;  %1651 = vtanh.f32 %v842_v2  ;;  %v767_v46 = vmul.f32 %v1650_v36, %v765_v28  ;;  %s2745_s13 = sld [smem:[#allocation7 + $0x289]] }
  0xef   :  { %v960_v26 = vadd.f32 %v958_v5, %v954_v4  ;;  %v964_v62 = vmul.f32 %v2035_v54, %v963_v27  ;;  %v965_v47 = vmul.f32 %v2054_v15, %v963_v27  ;;  %v843_v52 = vadd.f32 %v841_v7, %v839_v50 }
  0xf0   :  { %v961_v63 = vadd.f32 %v959_v39, %v955_v43  ;;  %v969_v12 = vstv %s2595_s29  ;;  %v912_v22 = vmul.f32 %v2153_v49, %v911_v58  ;;  %v913_v56 = vmul.f32 %v2166_v16, %v911_v58  ;;  %s2753_s29 = sld [smem:[#allocation7 + $0x309]] }
  0xf1   :  { %v917_v45 = vstv %s2597_s14  ;;  %v908_v59 = vadd.f32 %v906_v42, %v902_v41  ;;  %v909_v18 = vadd.f32 %v907_v34, %v903_v57  ;;  %v966_v24 = vadd.f32 %v964_v62, %v960_v26  ;;  %s2755_s14 = sld [smem:[#allocation7 + $0x389]] }
  0xf2   :  { %v970_v28 = vmul.f32 %v2066_v25, %v969_v12  ;;  %v847_v7 = vstv %s2603_s15  ;;  %v967_v1 = vadd.f32 %v965_v47, %v961_v63  ;;  %v971_v9 = vmul.f32 %v2076_v32, %v969_v12  ;;  %s2764_s15 = sld [smem:[#allocation7 + $0x409]] }
  0xf3   :  { %v975_v11 = vstv %s2606_s16  ;;  %v2645_v3 = vadd.f32 %v2572_v33, %v2566_v17  ;;  %v2648_v51 = vadd.f32 %v767_v46, %v2568_v38  ;;  %1653 = vtanh.f32 %v843_v52  ;;  %s2771_s16 = sld [smem:[#allocation7 + $0x489]] }
  0xf4   :  { %v918_v50 = vmul.f32 %v2174_v23, %v917_v45  ;;  %v919_v2 = vmul.f32 %v2180_v30, %v917_v45  ;;  %v923_v0 = vstv %s2610_s17  ;;  %v929_v6 = vstv %s2614_s1  ;;  %s2773_s17 = sld [smem:[#allocation8 + $0x8]]  ;;  %s1561_s1 = sld [smem:[#allocation10 + $0xa]] }
  0xf5   :  { %v981_v42 = vstv %s2617_s3  ;;  %v914_v17 = vadd.f32 %v912_v22, %v908_v59  ;;  %v915_v33 = vadd.f32 %v913_v56, %v909_v18  ;;  %v972_v34 = vadd.f32 %v970_v28, %v966_v24  ;;  %s2779_s3 = sld [smem:[#allocation7 + $0xa]] }
  0xf6   :  { %v976_v38 = vmul.f32 %v2083_v37, %v975_v11  ;;  %v973_v13 = vadd.f32 %v971_v9, %v967_v1  ;;  %v977_v20 = vmul.f32 %v2098_v55, %v975_v11  ;;  %v987_v36 = vstv %s2623_s0  ;;  %s2783_s0 = sld [smem:[#allocation7 + $0x8a]] }
  0xf7   :  { %v1017_v41 = vstv %s2625_s19  ;;  %v982_v58 = vmul.f32 %v2103_v61, %v981_v42  ;;  %v1021_v57 = vstv %s2630_s20  ;;  %v983_v39 = vmul.f32 %v2111_v8, %v981_v42  ;;  %s2787_s19 = sld [smem:[#allocation7 + $0x10a]] }
  0xf8   :  { %v1018_v4 = vmul.f32 %v1927_v21, %v1017_v41  ;;  %v1019_v5 = vmul.f32 %v1937_v29, %v1017_v41  ;;  %v1652_v43 = vpop.eup %1651  ;;  %v1022_v27 = vmul.f32 %v1962_v48, %v1021_v57  ;;  %v1023_v26 = vmul.f32 %v1967_v53, %v1021_v57  ;;  %s2792_s20 = sld [smem:[#allocation7 + $0x18a]] }
  0xf9   :  { %v1027_v62 = vstv %s2635_s21  ;;  %v978_v47 = vadd.f32 %v976_v38, %v972_v34  ;;  %v1033_v63 = vstv %s2638_s22  ;;  %v979_v12 = vadd.f32 %v977_v20, %v973_v13  ;;  %s2795_s21 = sld [smem:[#allocation7 + $0x509]]  ;;  %s2810_s22 = sld [smem:[#allocation7 + $0x20a]] }
  0xfa   :  { %v1028_v46 = vmul.f32 %v1974_v60, %v1027_v62  ;;  %v1029_v52 = vmul.f32 %v1985_v10, %v1027_v62  ;;  %v1024_v22 = vadd.f32 %v1022_v27, %v1018_v4  ;;  %v1025_v56 = vadd.f32 %v1023_v26, %v1019_v5 }
  0xfb   :  { %v1034_v45 = vmul.f32 %v1991_v14, %v1033_v63  ;;  %v2685_v59 = vmul.f32 %v1652_v43, %v847_v7  ;;  %v920_v18 = vadd.f32 %v918_v50, %v914_v17  ;;  %v1035_v24 = vmul.f32 %v2013_v35, %v1033_v63 }
  0xfc   :  { %v1039_v28 = vstv %s2651_s18  ;;  %v921_v1 = vadd.f32 %v919_v2, %v915_v33  ;;  %v993_v9 = vstv %s2657_s23  ;;  %v1030_v11 = vadd.f32 %v1028_v46, %v1024_v22  ;;  %s2814_s18 = sld [smem:[#allocation7 + $0x589]]  ;;  %s2820_s23 = sld [smem:[#allocation7 + $0x28a]] }
  0xfd   :  { %v1031_v42 = vadd.f32 %v1029_v52, %v1025_v56  ;;  %v1654_v34 = vpop.eup %1653  ;;  %v984_v38 = vadd.f32 %v982_v58, %v978_v47  ;;  %v988_v13 = vmul.f32 %v2121_v19, %v987_v36  ;;  %v1040_v50 = vmul.f32 %v2020_v40, %v1039_v28 }
  0xfe   :  { %v1041_v17 = vmul.f32 %v2024_v44, %v1039_v28  ;;  %v985_v20 = vadd.f32 %v983_v39, %v979_v12  ;;  %v989_v41 = vmul.f32 %v2136_v31, %v987_v36  ;;  %v1036_v2 = vadd.f32 %v1034_v45, %v1030_v11 }
  0xff   :  { %v1037_v33 = vadd.f32 %v1035_v24, %v1031_v42  ;;  %v924_v4 = vadd.f32 %v923_v0, %v920_v18  ;;  %v994_v58 = vmul.f32 %v2153_v49, %v993_v9  ;;  %v1045_v5 = vstv %s2667_s24  ;;  %s2826_s24 = sld [smem:[#allocation7 + $0x30a]] }
 0x100   :  { %v1051_v57 = vstv %s2669_s25  ;;  %v1042_v43 = vadd.f32 %v1040_v50, %v1036_v2  ;;  %v1046_v36 = vmul.f32 %v2035_v54, %v1045_v5  ;;  %v1057_v27 = vstv %s2675_s5  ;;  %s2828_s25 = sld [smem:[#allocation7 + $0x38a]] }
 0x101   :  { %v1043_v39 = vadd.f32 %v1041_v17, %v1037_v33  ;;  %v990_v26 = vadd.f32 %v988_v13, %v984_v38  ;;  %v1047_v62 = vmul.f32 %v2054_v15, %v1045_v5  ;;  %v1052_v47 = vmul.f32 %v2066_v25, %v1051_v57  ;;  %s2838_s5 = sld [smem:[#allocation7 + $0x40a]] }
 0x102   :  { %v1053_v46 = vmul.f32 %v2076_v32, %v1051_v57  ;;  %v991_v52 = vadd.f32 %v989_v41, %v985_v20  ;;  %v995_v63 = vmul.f32 %v2166_v16, %v993_v9  ;;  %v999_v12 = vstv %s2680_s26  ;;  %s2841_s26 = sld [smem:[#allocation8 + $0x9]] }
 0x103   :  { %v1048_v22 = vadd.f32 %v1046_v36, %v1042_v43  ;;  %v2724_v56 = vmul.f32 %v1654_v34, %v847_v7  ;;  %v1049_v45 = vadd.f32 %v1047_v62, %v1043_v39  ;;  %v1058_v18 = vmul.f32 %v2083_v37, %v1057_v27 }
 0x104   :  { %v1063_v24 = vstv %s2689_s27  ;;  %v2730_v28 = vadd.f32 %v923_v0, %v921_v1  ;;  %1655 = vtanh.f32 %v924_v4  ;;  %v1059_v9 = vmul.f32 %v2098_v55, %v1057_v27  ;;  %s2845_s27 = sld [smem:[#allocation7 + $0x48a]] }
 0x105   :  { %v1054_v11 = vadd.f32 %v1052_v47, %v1048_v22  ;;  %v996_v42 = vadd.f32 %v994_v58, %v990_v26  ;;  %v1000_v38 = vmul.f32 %v2174_v23, %v999_v12  ;;  %v1005_v13 = vstv %s2693_s28  ;;  %s2848_s28 = sld [smem:[#allocation7 + $0x50a]] }
 0x106   :  { %v1055_v7 = vadd.f32 %v1053_v46, %v1049_v45  ;;  %v997_v34 = vadd.f32 %v995_v63, %v991_v52  ;;  %v1001_v50 = vmul.f32 %v2180_v30, %v999_v12  ;;  %v1064_v0 = vmul.f32 %v2103_v61, %v1063_v24 }
 0x107   :  { %v1065_v1 = vmul.f32 %v2111_v8, %v1063_v24  ;;  %v1060_v17 = vadd.f32 %v1058_v18, %v1054_v11  ;;  %v1069_v20 = vstv %s2698_s30  ;;  %v1099_v41 = vstv %s2705_s8  ;;  %s2860_s30 = sld [smem:[#allocation7 + $0xb]]  ;;  %s2868_s8 = sld [smem:[#allocation7 + $0x58a]] }
 0x108   :  { %v1103_v2 = vstv %s2707_s9  ;;  %v1061_v33 = vadd.f32 %v1059_v9, %v1055_v7  ;;  %v1100_v4 = vmul.f32 %v1927_v21, %v1099_v41  ;;  %v1101_v58 = vmul.f32 %v1937_v29, %v1099_v41  ;;  %s2870_s9 = sld [smem:[#allocation7 + $0x8b]] }
 0x109   :  { %v1104_v5 = vmul.f32 %v1962_v48, %v1103_v2  ;;  %v1002_v57 = vadd.f32 %v1000_v38, %v996_v42  ;;  %v1105_v43 = vmul.f32 %v1967_v53, %v1103_v2  ;;  %v1109_v39 = vstv %s2714_s2  ;;  %s2876_s2 = sld [smem:[#allocation7 + $0x10b]] }
 0x10a   :  { %v1115_v36 = vstv %s2716_s4  ;;  %v1075_v27 = vstv %s2720_s10  ;;  %v1110_v62 = vmul.f32 %v1974_v60, %v1109_v39  ;;  %v1111_v47 = vmul.f32 %v1985_v10, %v1109_v39  ;;  %s2878_s4 = sld [smem:[#allocation7 + $0x18b]] }
 0x10b   :  { %v1106_v26 = vadd.f32 %v1104_v5, %v1100_v4  ;;  %v1066_v46 = vadd.f32 %v1064_v0, %v1060_v17  ;;  %v1070_v52 = vmul.f32 %v2121_v19, %v1069_v20  ;;  %v1107_v63 = vadd.f32 %v1105_v43, %v1101_v58  ;;  %s2889_s10 = sld [smem:[#allocation7 + $0x20b]] }
 0x10c   :  { %v1116_v12 = vmul.f32 %v1991_v14, %v1115_v36  ;;  %v1067_v22 = vadd.f32 %v1065_v1, %v1061_v33  ;;  %v1071_v45 = vmul.f32 %v2136_v31, %v1069_v20  ;;  %v1117_v24 = vmul.f32 %v2013_v35, %v1115_v36 }
 0x10d   :  { %v1112_v18 = vadd.f32 %v1110_v62, %v1106_v26  ;;  %v1003_v11 = vadd.f32 %v1001_v50, %v997_v34  ;;  %v1076_v9 = vmul.f32 %v2153_v49, %v1075_v27  ;;  %v1113_v42 = vadd.f32 %v1111_v47, %v1107_v63 }
 0x10e   :  { %v1121_v38 = vstv %s2735_s11  ;;  %v1656_v7 = vpop.eup %1655  ;;  %v1077_v0 = vmul.f32 %v2166_v16, %v1075_v27  ;;  %v1081_v17 = vstv %s2740_s12  ;;  %v1072_v20 = vadd.f32 %v1070_v52, %v1066_v46  ;;  %s2897_s11 = sld [smem:[#allocation7 + $0x28b]]  ;;  %s2899_s12 = sld [smem:[#allocation8 + $0xa]] }
 0x10f   :  { %v1118_v41 = vadd.f32 %v1116_v12, %v1112_v18  ;;  %v1122_v1 = vmul.f32 %v2020_v40, %v1121_v38  ;;  %v1119_v2 = vadd.f32 %v1117_v24, %v1113_v42  ;;  %v1123_v34 = vmul.f32 %v2024_v44, %v1121_v38 }
 0x110   :  { %v1127_v50 = vstv %s2745_s13  ;;  %v1073_v33 = vadd.f32 %v1071_v45, %v1067_v22  ;;  %v1006_v43 = vadd.f32 %v1005_v13, %v1002_v57  ;;  %v1133_v36 = vstv %s2753_s29  ;;  %s2907_s13 = sld [smem:[#allocation7 + $0x30b]] }
 0x111   :  { %v1124_v4 = vadd.f32 %v1122_v1, %v1118_v41  ;;  %v1128_v58 = vmul.f32 %v2035_v54, %v1127_v50  ;;  %v1129_v5 = vmul.f32 %v2054_v15, %v1127_v50  ;;  %v1125_v39 = vadd.f32 %v1123_v34, %v1119_v2  ;;  %s2909_s29 = sld [smem:[#allocation7 + $0x38b]] }
 0x112   :  { %v1139_v27 = vstv %s2755_s14  ;;  %v1007_v26 = vadd.f32 %v1005_v13, %v1003_v11  ;;  %v1134_v47 = vmul.f32 %v2066_v25, %v1133_v36  ;;  %v1135_v46 = vmul.f32 %v2076_v32, %v1133_v36  ;;  %s2919_s14 = sld [smem:[#allocation7 + $0x40b]] }
 0x113   :  { %v1130_v62 = vadd.f32 %v1128_v58, %v1124_v4  ;;  %v1082_v52 = vmul.f32 %v2174_v23, %v1081_v17  ;;  %v1083_v63 = vmul.f32 %v2180_v30, %v1081_v17  ;;  %v1131_v57 = vadd.f32 %v1129_v5, %v1125_v39 }
 0x114   :  { %v1140_v12 = vmul.f32 %v2083_v37, %v1139_v27  ;;  %v1078_v22 = vadd.f32 %v1076_v9, %v1072_v20  ;;  %v1079_v13 = vadd.f32 %v1077_v0, %v1073_v33  ;;  %v1145_v18 = vstv %s2764_s15  ;;  %s2921_s15 = sld [smem:[#allocation7 + $0x48b]] }
 0x115   :  { %v1136_v45 = vadd.f32 %v1134_v47, %v1130_v62  ;;  %v2799_v24 = vadd.f32 %v2685_v59, %v2645_v3  ;;  %v2803_v11 = vadd.f32 %v2724_v56, %v2648_v51  ;;  %1657 = vtanh.f32 %v2730_v28 }
 0x116   :  { %v2808_v42 = vmul.f32 %v1656_v7, %v929_v6  ;;  %1659 = vtanh.f32 %v1006_v43  ;;  %v1137_v9 = vadd.f32 %v1135_v46, %v1131_v57  ;;  %v1141_v38 = vmul.f32 %v2098_v55, %v1139_v27 }
 0x117   :  { %v1151_v0 = vstv %s2771_s16  ;;  %1661 = vtanh.f32 %v1007_v26  ;;  %v1087_v3 = vstv %s2773_s17  ;;  %v1142_v51 = vadd.f32 %v1140_v12, %v1136_v45  ;;  %s2927_s16 = sld [smem:[#allocation7 + $0x50b]] }
 0x118   :  { %v1146_v59 = vmul.f32 %v2103_v61, %v1145_v18  ;;  %v1084_v56 = vadd.f32 %v1082_v52, %v1078_v22  ;;  %v1085_v28 = vadd.f32 %v1083_v63, %v1079_v13  ;;  %v1147_v7 = vmul.f32 %v2111_v8, %v1145_v18  ;;  %s2933_s17 = sld [smem:[#allocation7 + $0x58b]] }
 0x119   :  { %v1181_v17 = vstv %s2779_s3  ;;  %v1152_v41 = vmul.f32 %v2121_v19, %v1151_v0  ;;  %v1185_v2 = vstv %s2783_s0  ;;  %v1143_v34 = vadd.f32 %v1141_v38, %v1137_v9  ;;  %s2935_s3 = sld [smem:[#allocation10 + $0x7]]  ;;  %s2948_s0 = sld [smem:[#allocation10 + $0x8]] }
 0x11a   :  { %v1182_v1 = vmul.f32 %v1927_v21, %v1181_v17  ;;  %v1183_v20 = vmul.f32 %v1937_v29, %v1181_v17  ;;  %v1186_v50 = vmul.f32 %v1962_v48, %v1185_v2  ;;  %v1187_v33 = vmul.f32 %v1967_v53, %v1185_v2 }
 0x11b   :  { %v1191_v4 = vstv %s2787_s19  ;;  %v1148_v58 = vadd.f32 %v1146_v59, %v1142_v51  ;;  %v1197_v39 = vstv %s2792_s20  ;;  %v1157_v36 = vstv %s2795_s21  ;;  %s2955_s19 = sld [smem:[#allocation8 + $0xb]]  ;;  %s2964_s20 = sld [smem:[#allocation10 + $0x9]] }
 0x11c   :  { %v1192_v5 = vmul.f32 %v1974_v60, %v1191_v4  ;;  %v1193_v43 = vmul.f32 %v1985_v10, %v1191_v4  ;;  %v1188_v27 = vadd.f32 %v1186_v50, %v1182_v1  ;;  %v1189_v26 = vadd.f32 %v1187_v33, %v1183_v20  ;;  %s1575_s21 = sld [smem:[#allocation10 + $0xb]] }
 0x11d   :  { %v1198_v62 = vmul.f32 %v1991_v14, %v1197_v39  ;;  %v1088_v47 = vadd.f32 %v1087_v3, %v1084_v56  ;;  %v1153_v46 = vmul.f32 %v2136_v31, %v1151_v0  ;;  %v1199_v52 = vmul.f32 %v2013_v35, %v1197_v39 }
 0x11e   :  { %v1203_v63 = vstv %s2810_s22  ;;  %v1149_v57 = vadd.f32 %v1147_v7, %v1143_v34  ;;  %v1163_v12 = vstv %s2814_s18  ;;  %v1194_v22 = vadd.f32 %v1192_v5, %v1188_v27 }
 0x11f   :  { %v1195_v13 = vadd.f32 %v1193_v43, %v1189_v26  ;;  %v2850_v45 = vpop.eup %1657  ;;  %v1154_v18 = vadd.f32 %v1152_v41, %v1148_v58  ;;  %v1158_v9 = vmul.f32 %v2153_v49, %v1157_v36  ;;  %v1204_v38 = vmul.f32 %v2020_v40, %v1203_v63 }
 0x120   :  { %v1205_v0 = vmul.f32 %v2024_v44, %v1203_v63  ;;  %v2855_v51 = vpop.eup %1659  ;;  %v2857_v59 = vadd.f32 %v1087_v3, %v1085_v28  ;;  %v1159_v56 = vmul.f32 %v2166_v16, %v1157_v36  ;;  %v1200_v7 = vadd.f32 %v1198_v62, %v1194_v22 }
 0x121   :  { %v1201_v17 = vadd.f32 %v1199_v52, %v1195_v13  ;;  %v2862_v1 = vpop.eup %1661  ;;  %v1164_v41 = vmul.f32 %v2174_v23, %v1163_v12  ;;  %v1209_v20 = vstv %s2820_s23  ;;  %v1215_v2 = vstv %s2826_s24 }
 0x122   :  { %v1221_v34 = vstv %s2828_s25  ;;  %v1155_v3 = vadd.f32 %v1153_v46, %v1149_v57  ;;  %v1206_v28 = vadd.f32 %v1204_v38, %v1200_v7  ;;  %v1210_v33 = vmul.f32 %v2035_v54, %v1209_v20 }
 0x123   :  { %v1207_v50 = vadd.f32 %v1205_v0, %v1201_v17  ;;  %v1160_v4 = vadd.f32 %v1158_v9, %v1154_v18  ;;  %v1211_v58 = vmul.f32 %v2054_v15, %v1209_v20  ;;  %v1216_v5 = vmul.f32 %v2066_v25, %v1215_v2 }
 0x124   :  { %v1217_v43 = vmul.f32 %v2076_v32, %v1215_v2  ;;  %1663 = vtanh.f32 %v1088_v47  ;;  %v1212_v39 = vadd.f32 %v1210_v33, %v1206_v28  ;;  %v1222_v36 = vmul.f32 %v2083_v37, %v1221_v34 }
 0x125   :  { %v1227_v27 = vstv %s2838_s5  ;;  %v1169_v26 = vstv %s2841_s26  ;;  %v1213_v62 = vadd.f32 %v1211_v58, %v1207_v50  ;;  %v1223_v46 = vmul.f32 %v2098_v55, %v1221_v34 }
 0x126   :  { %v1233_v52 = vstv %s2845_s27  ;;  %v1165_v63 = vmul.f32 %v2180_v30, %v1163_v12  ;;  %v1218_v57 = vadd.f32 %v1216_v5, %v1212_v39  ;;  %v1228_v22 = vmul.f32 %v2103_v61, %v1227_v27 }
 0x127   :  { %v1239_v13 = vstv %s2848_s28  ;;  %v1161_v18 = vadd.f32 %v1159_v56, %v1155_v3  ;;  %v1166_v47 = vadd.f32 %v1164_v41, %v1160_v4  ;;  %v1219_v9 = vadd.f32 %v1217_v43, %v1213_v62 }
 0x128   :  { %v1229_v38 = vmul.f32 %v2111_v8, %v1227_v27  ;;  %v1224_v0 = vadd.f32 %v1222_v36, %v1218_v57  ;;  %v1234_v7 = vmul.f32 %v2121_v19, %v1233_v52  ;;  %v1235_v17 = vmul.f32 %v2136_v31, %v1233_v52 }
 0x129   :  { %v1240_v12 = vmul.f32 %v2153_v49, %v1239_v13  ;;  %v1225_v20 = vadd.f32 %v1223_v46, %v1219_v9  ;;  %v1245_v2 = vstv %s2868_s8  ;;  %v1263_v34 = vstv %s2860_s30 }
 0x12a   :  { %v1267_v28 = vstv %s2870_s9  ;;  %v1230_v56 = vadd.f32 %v1228_v22, %v1224_v0  ;;  %v1264_v41 = vmul.f32 %v1927_v21, %v1263_v34  ;;  %v1265_v3 = vmul.f32 %v1937_v29, %v1263_v34 }
 0x12b   :  { %v1268_v50 = vmul.f32 %v1962_v48, %v1267_v28  ;;  %v1231_v33 = vadd.f32 %v1229_v38, %v1225_v20  ;;  %v1269_v4 = vmul.f32 %v1967_v53, %v1267_v28  ;;  %v1273_v58 = vstv %s2876_s2 }
 0x12c   :  { %v1279_v5 = vstv %s2878_s4  ;;  %v1236_v43 = vadd.f32 %v1234_v7, %v1230_v56  ;;  %v1274_v36 = vmul.f32 %v1974_v60, %v1273_v58  ;;  %v1275_v21 = vmul.f32 %v1985_v10, %v1273_v58 }
 0x12d   :  { %v1270_v39 = vadd.f32 %v1268_v50, %v1264_v41  ;;  %v1237_v29 = vadd.f32 %v1235_v17, %v1231_v33  ;;  %v1241_v48 = vmul.f32 %v2166_v16, %v1239_v13  ;;  %v1271_v27 = vadd.f32 %v1269_v4, %v1265_v3 }
 0x12e   :  { %v1280_v53 = vmul.f32 %v1991_v14, %v1279_v5  ;;  %v2915_v62 = vpop.eup %1663  ;;  %1665 = vtanh.f32 %v2857_v59  ;;  %v1167_v46 = vadd.f32 %v1165_v63, %v1161_v18  ;;  %v1281_v57 = vmul.f32 %v2013_v35, %v1279_v5 }
 0x12f   :  { %v1276_v52 = vadd.f32 %v1274_v36, %v1270_v39  ;;  %v1170_v60 = vadd.f32 %v1169_v26, %v1166_v47  ;;  %v1246_v10 = vmul.f32 %v2174_v23, %v1245_v2  ;;  %v1277_v22 = vadd.f32 %v1275_v21, %v1271_v27 }
 0x130   :  { %v1285_v14 = vstv %s2889_s10  ;;  %v1242_v59 = vadd.f32 %v1240_v12, %v1236_v43  ;;  %v1247_v63 = vmul.f32 %v2180_v30, %v1245_v2  ;;  %v1243_v18 = vadd.f32 %v1241_v48, %v1237_v29 }
 0x131   :  { %v1282_v35 = vadd.f32 %v1280_v53, %v1276_v52  ;;  %v1286_v13 = vmul.f32 %v2020_v40, %v1285_v14  ;;  %v1283_v9 = vadd.f32 %v1281_v57, %v1277_v22  ;;  %v1287_v38 = vmul.f32 %v2024_v44, %v1285_v14 }
 0x132   :  { %v1291_v47 = vstv %s2897_s11  ;;  %v1171_v0 = vadd.f32 %v1169_v26, %v1167_v46  ;;  %v1251_v20 = vstv %s2899_s12  ;;  %v1297_v2 = vstv %s2907_s13 }
 0x133   :  { %v1288_v7 = vadd.f32 %v1286_v13, %v1282_v35  ;;  %v1292_v17 = vmul.f32 %v2035_v54, %v1291_v47  ;;  %v1293_v12 = vmul.f32 %v2054_v15, %v1291_v47  ;;  %v1289_v40 = vadd.f32 %v1287_v38, %v1283_v9 }
 0x134   :  { %v1303_v34 = vstv %s2909_s29  ;;  %v1248_v28 = vadd.f32 %v1246_v10, %v1242_v59  ;;  %v1298_v56 = vmul.f32 %v2066_v25, %v1297_v2  ;;  %v1299_v41 = vmul.f32 %v2076_v32, %v1297_v2 }
 0x135   :  { %v1294_v44 = vadd.f32 %v1292_v17, %v1288_v7  ;;  %v1249_v3 = vadd.f32 %v1247_v63, %v1243_v18  ;;  %v1295_v26 = vadd.f32 %v1293_v12, %v1289_v40  ;;  %v1304_v50 = vmul.f32 %v2083_v37, %v1303_v34 }
 0x136   :  { %v1305_v54 = vmul.f32 %v2098_v55, %v1303_v34  ;;  %1667 = vtanh.f32 %v1170_v60  ;;  %v1309_v33 = vstv %s2919_s14  ;;  %v1315_v4 = vstv %s2921_s15 }
 0x137   :  { %v1300_v15 = vadd.f32 %v1298_v56, %v1294_v44  ;;  %v1301_v58 = vadd.f32 %v1299_v41, %v1295_v26  ;;  %v1310_v25 = vmul.f32 %v2103_v61, %v1309_v33  ;;  %v1311_v32 = vmul.f32 %v2111_v8, %v1309_v33 }
 0x138   :  { %v1321_v5 = vstv %s2927_s16  ;;  %v1666_v37 = vpop.eup %1665  ;;  %1669 = vtanh.f32 %v1171_v0  ;;  %v1252_v55 = vadd.f32 %v1251_v20, %v1248_v28  ;;  %v1316_v39 = vmul.f32 %v2121_v19, %v1315_v4 }
 0x139   :  { %v1306_v43 = vadd.f32 %v1304_v50, %v1300_v15  ;;  %v1253_v36 = vadd.f32 %v1251_v20, %v1249_v3  ;;  %v1307_v21 = vadd.f32 %v1305_v54, %v1301_v58  ;;  %v1317_v29 = vmul.f32 %v2136_v31, %v1315_v4 }
 0x13a   :  { %v1327_v48 = vstv %s2933_s17  ;;  %v931_v27 = vmul.f32 %v2850_v45, %v929_v6  ;;  %v1011_v61 = vstv %s2935_s3  ;;  %v1322_v53 = vmul.f32 %v2153_v49, %v1321_v5 }
 0x13b   :  { %v1312_v8 = vadd.f32 %v1310_v25, %v1306_v43  ;;  %v1313_v46 = vadd.f32 %v1311_v32, %v1307_v21  ;;  %v1323_v52 = vmul.f32 %v2166_v16, %v1321_v5  ;;  %v932_v19 = vadd.f32 %v2808_v42, %v2799_v24 }
 0x13c   :  { %1671 = vtanh.f32 %v1252_v55  ;;  %v1328_v57 = vmul.f32 %v2174_v23, %v1327_v48  ;;  %v1012_v6 = vmul.f32 %v2855_v51, %v1011_v61  ;;  %v1329_v60 = vmul.f32 %v2180_v30, %v1327_v48 }
 0x13d   :  { %v1318_v31 = vadd.f32 %v1316_v39, %v1312_v8  ;;  %1673 = vtanh.f32 %v1253_v36  ;;  %v1319_v45 = vadd.f32 %v1317_v29, %v1313_v46  ;;  %v933_v49 = vadd.f32 %v931_v27, %v2803_v11 }
 0x13e   :  { %v1013_v10 = vmul.f32 %v2862_v1, %v1011_v61  ;;  %v1093_v22 = vstv %s2948_s0  ;;  %v1333_v24 = vstv %s2955_s19  ;;  %v1014_v63 = vadd.f32 %v1012_v6, %v932_v19 }
 0x13f   :  { %v1324_v16 = vadd.f32 %v1322_v53, %v1318_v31  ;;  %v1325_v14 = vadd.f32 %v1323_v52, %v1319_v45  ;;  %v1094_v23 = vmul.f32 %v2915_v62, %v1093_v22  ;;  %v1095_v18 = vmul.f32 %v1666_v37, %v1093_v22 }
 0x140   :  { %v1668_v42 = vpop.eup %1667  ;;  %v1015_v13 = vadd.f32 %v1013_v10, %v933_v49  ;;  %v1175_v30 = vstv %s2964_s20  ;;  %v1257_v17 = vstv %s1561_s1  ;;  %v1339_v34 = vstv %s1575_s21 }
 0x141   :  { %v1330_v59 = vadd.f32 %v1328_v57, %v1324_v16  ;;  %v1331_v51 = vadd.f32 %v1329_v60, %v1325_v14  ;;  %v1096_v11 = vadd.f32 %v1094_v23, %v1014_v63  ;;  %v1176_v1 = vmul.f32 %v1668_v42, %v1175_v30 }
 0x142   :  { %v1670_v35 = vpop.eup %1669  ;;  %v1097_v0 = vadd.f32 %v1095_v18, %v1015_v13  ;;  %v1345_v50 = vstv %s2994_s6 }
 0x143   :  { %v1334_v9 = vadd.f32 %v1333_v24, %v1330_v59  ;;  %v1335_v38 = vadd.f32 %v1333_v24, %v1331_v51  ;;  %v1177_v7 = vmul.f32 %v1670_v35, %v1175_v30  ;;  %v1178_v20 = vadd.f32 %v1176_v1, %v1096_v11 }
 0x145   :  { %1675 = vtanh.f32 %v1334_v9  ;;  %v1179_v62 = vadd.f32 %v1177_v7, %v1097_v0 }
 0x146   :  { %1677 = vtanh.f32 %v1335_v38  ;;  %v1672_v47 = vpop.eup %1671 }
 0x147   :  { %v1674_v12 = vpop.eup %1673  ;;  %v1258_v40 = vmul.f32 %v1672_v47, %v1257_v17 }
 0x148   :  { %v1259_v2 = vmul.f32 %v1674_v12, %v1257_v17 }
 0x149   :  { %v1260_v28 = vadd.f32 %v1258_v40, %v1178_v20 }
 0x14a   :  { %v1261_v56 = vadd.f32 %v1259_v2, %v1179_v62 }
 0x14f   :  { %v1676_v44 = vpop.eup %1675 }
 0x150   :  { %v1678_v41 = vpop.eup %1677  ;;  %v1340_v3 = vmul.f32 %v1676_v44, %v1339_v34 }
 0x151   :  { %v1341_v26 = vmul.f32 %v1678_v41, %v1339_v34 }
 0x152   :  { %v1342_v54 = vadd.f32 %v1340_v3, %v1260_v28 }
 0x153   :  { %v1343_v15 = vadd.f32 %v1341_v26, %v1261_v56 }
 0x154   :  { %v1346_v33 = vadd.f32 %v1345_v50, %v1342_v54 }
 0x155   :  { %v1347_v4 = vadd.f32 %v1345_v50, %v1343_v15 }
 0x156   :  { %v1348_v58 = vmax.f32 %v1346_v33, 0.0 }
 0x157   :  { %v1349_v25 = vmax.f32 %v1347_v4, 0.0 }
 0x158   :  { %1350 = vst [vmem:[%s2995_s7] sm:$0xff] %v1348_v58 }
 0x159   :  { %1351 = vst [vmem:[%s2995_s7 + $0x8] sm:$0xff] %v1349_v25 }
 0x15a   :  { %1356 = vsyncpa [#allocation4], 1 }
 0x15b   :  { %1357 = vsyncpa [#allocation6], 1 }
 0x15c   :  { %1358 = vsyncpa [#allocation9], 1 }

</bundles_post_ra>
